<compile_context>
chip_gen: v7x
topology: tpu7x:2x2x1
jax: 0.10.0
libtpu: 0.0.40
codegen_flags: <defaults>
</compile_context>

<pallas_src>
import functools

import jax
import jax.numpy as jnp
import numpy as np
from jax import lax
from jax.experimental import pallas as pl
from jax.experimental.pallas import tpu as pltpu

NUM_GROUPS = 32
EPS = 1e-6
# SiLU/affine compute dtype: bf16 uses the native bf16 VPU/EUP path on v6e/v7x.
# TODO(synk): set to jnp.float32 on v5e (no bf16 VPU/EUP) or for max fidelity.
SILU_DTYPE = jnp.bfloat16


# ----------------------------- in-kernel helpers -----------------------------
def _silu(y):
    # y * sigmoid(y) == y / (1 + exp(-y)); EUP exp + VPU div, dtype-preserving.
    return y / (1.0 + jnp.exp(-y))


def _norm_silu(v, scale, shift):
    """Folded GroupNorm affine (f32) + SiLU, returning bf16 MXU operand."""
    y = v.astype(jnp.float32) * scale + shift
    return _silu(y.astype(SILU_DTYPE)).astype(jnp.bfloat16)


def _temporal_conv3(hc, hp_edge, hn_edge, w_ref, b_ref, kt, hw):
    """3-tap temporal conv on channel-first tiles.

    hc:        (Cin, kt*hw) bf16 center tile (kt whole time-steps).
    hp_edge:   (Cin, hw)    bf16 time-step t0-1 (already zeroed at the sequence start).
    hn_edge:   (Cin, hw)    bf16 time-step t0+kt (already zeroed at the sequence end).
    w_ref:     (3, Cout, Cin) bf16 = [W_prev, W_center, W_next];  b_ref: (Cout, 1) f32.

    The +/-1 time-step shift is applied to the bf16 *input* (halo sliver + lane concat),
    so only one (Cout, kt*hw) f32 accumulator is live.
    """
    if kt > 1:
        h_prev = jnp.concatenate([hp_edge, hc[:, : (kt - 1) * hw]], axis=1)
        h_next = jnp.concatenate([hc[:, hw:], hn_edge], axis=1)
    else:
        h_prev, h_next = hp_edge, hn_edge
    acc = jnp.dot(w_ref[1], hc, preferred_element_type=jnp.float32)
    acc = acc + jnp.dot(w_ref[0], h_prev, preferred_element_type=jnp.float32)
    acc = acc + jnp.dot(w_ref[2], h_next, preferred_element_type=jnp.float32)
    return acc + b_ref[...]


# --------------------------------- kernels ------------------------------------
def _gn_stats_kernel(x_ref, s1_ref, s2_ref):
    """Per-channel [sum, sum^2] of x, accumulated across the time-tile grid axis."""
    t = pl.program_id(1)

    @pl.when(t == 0)
    def _init():
        s1_ref[...] = jnp.zeros_like(s1_ref)
        s2_ref[...] = jnp.zeros_like(s2_ref)

    x = x_ref[0].astype(jnp.float32)                    # (C, KT*HW)
    # TODO(synk): single-pass E[x^2]-E[x]^2 stats; switch to a mean-shifted (Chan)
    # combine if production activations have large per-group means vs. their std.
    s1_ref[0] += jnp.sum(x, axis=1, keepdims=True)
    s2_ref[0] += jnp.sum(x * x, axis=1, keepdims=True)


def _conv1_kernel(xc_ref, xp_ref, xn_ref, scale_ref, shift_ref, w_ref, b_ref,
                  h_ref, s1_ref, s2_ref, *, kt, hw):
    """GN1-affine + SiLU + temporal conv1; fused GN2 stats of the conv1 output."""
    t = pl.program_id(1)
    nt = pl.num_programs(1)
    scale = scale_ref[0]                                # (Cin, 1) f32
    shift = shift_ref[0]                                # (Cin, 1) f32

    hc = _norm_silu(xc_ref[0], scale, shift)                                 # center
    hp = _norm_silu(xp_ref[0], scale, shift) * (t > 0).astype(jnp.bfloat16)  # halo t0-1
    hn = _norm_silu(xn_ref[0], scale, shift) * (t < nt - 1).astype(jnp.bfloat16)
    acc = _temporal_conv3(hc, hp, hn, w_ref, b_ref, kt, hw)                  # (Cout, kt*hw) f32
    h_ref[0] = acc.astype(h_ref.dtype)

    @pl.when(t == 0)
    def _init():
        s1_ref[...] = jnp.zeros_like(s1_ref)
        s2_ref[...] = jnp.zeros_like(s2_ref)

    s1_ref[0] += jnp.sum(acc, axis=1, keepdims=True)
    s2_ref[0] += jnp.sum(acc * acc, axis=1, keepdims=True)


def _conv2_kernel(x_ref, hc_ref, hp_ref, hn_ref, scale_ref, shift_ref,
                  w_ref, b_ref, wsc_ref, bsc_ref, o_ref, *, kt, hw):
    """GN2-affine + SiLU + temporal conv2 + 1x1x1 shortcut + residual."""
    t = pl.program_id(1)
    nt = pl.num_programs(1)

    # 1x1x1 shortcut first: seeds the residual accumulator, ends x's live range early.
    acc = jnp.dot(wsc_ref[...], x_ref[0].astype(jnp.bfloat16),
                  preferred_element_type=jnp.float32) + bsc_ref[...]

    scale = scale_ref[0]                                # (Cout, 1) f32
    shift = shift_ref[0]
    hc = _norm_silu(hc_ref[0], scale, shift)
    hp = _norm_silu(hp_ref[0], scale, shift) * (t > 0).astype(jnp.bfloat16)
    hn = _norm_silu(hn_ref[0], scale, shift) * (t < nt - 1).astype(jnp.bfloat16)
    acc = acc + _temporal_conv3(hc, hp, hn, w_ref, b_ref, kt, hw)
    o_ref[0] = acc.astype(o_ref.dtype)


# -------------------------------- wrapper helpers ------------------------------
def _choose_time_tile(t_len, hw, c_max, act_tile_bytes=4 * 1024 * 1024):
    """Largest kt dividing T with the (c_max, kt*hw) f32 tile under budget and >= 4
    time-tiles per sample for pipeline depth.  Budget sized for v7x (64 MiB VMEM):
    double-buffered ins/outs of the conv kernels land around 6-7x this value."""
    cap = max(1, min(act_tile_bytes // max(1, hw * c_max * 4), max(1, t_len // 4)))
    kt = 1
    for c in range(1, t_len + 1):
        if t_len % c == 0 and c <= cap:
            kt = c
    return kt


def _buf_bytes(shape, dtype, bufs=2):
    return int(np.prod(shape)) * np.dtype(dtype).itemsize * bufs


def _vmem_limit_bytes(need):
    # Headroom for Mosaic-internal scratch; floor at the default scoped limit, capped
    # below v7x's 64 MiB physical VMEM (the tile chooser keeps blocks well under this).
    return int(min(max(2 * int(need) + (8 << 20), 32 << 20), 56 << 20))


def _fold_groupnorm(s1, s2, gamma, beta, n_per_group):
    """(N, C, 1) channel [sum, sum^2] -> per-channel scale/shift: GN+affine == x*s + b."""
    n, c, _ = s1.shape
    g = NUM_GROUPS
    mean = s1.reshape(n, g, c // g).sum(axis=2) / n_per_group       # (N, G)
    ex2 = s2.reshape(n, g, c // g).sum(axis=2) / n_per_group
    var = jnp.maximum(ex2 - mean * mean, 0.0)
    inv = lax.rsqrt(var + EPS)                                      # (N, G)
    inv_c = jnp.repeat(inv, c // g, axis=1)                         # (N, C)
    mean_c = jnp.repeat(mean, c // g, axis=1)
    scale = inv_c * gamma[None, :]
    shift = beta[None, :] - mean_c * scale
    return scale.reshape(n, c, 1), shift.reshape(n, c, 1)


# ---------------------------------- wrapper ------------------------------------
@jax.jit
def temporal_resnet_block(x_ncthw, params):
    """x_ncthw: (N, Cin, T, H, W) float32 -> (N, Cout, T, H, W) float32."""
    N, Cin, T, H, W = x_ncthw.shape
    Cout = params["w1"].shape[0]
    assert Cin % NUM_GROUPS == 0 and Cout % NUM_GROUPS == 0, \
        "GroupNorm(32) requires channel counts that are multiples of 32"
    HW = H * W
    L = T * HW
    # TODO(synk): pad the spatial plane to a multiple of 128 lanes for odd H*W.
    assert HW % 128 == 0, "H*W must be a multiple of 128 lanes"

    KT = _choose_time_tile(T, HW, max(Cin, Cout))       # time-steps per L-tile
    TT = T // KT                                        # number of time-tiles
    TILE = KT * HW                                      # lane width of a tile

    # NCDHW -> (N, C, T*H*W): free reshape, no HBM transpose.
    x = x_ncthw.reshape(N, Cin, L)

    def taps(w):  # (Cout, Ci, 3, 1, 1) -> (3, Cout, Ci) bf16 = [W_prev, W_center, W_next]
        return jnp.transpose(w[:, :, :, 0, 0], (2, 0, 1)).astype(jnp.bfloat16)

    w1 = taps(params["w1"])
    w2 = taps(params["w2"])
    b1 = params["b1"].reshape(Cout, 1).astype(jnp.float32)
    b2 = params["b2"].reshape(Cout, 1).astype(jnp.float32)
    if "wsc" in params:
        wsc = params["wsc"][:, :, 0, 0, 0].astype(jnp.bfloat16)     # (Cout, Cin)
        bsc = params["bsc"].reshape(Cout, 1).astype(jnp.float32)
    else:  # identity shortcut (Cin == Cout)
        wsc = jnp.eye(Cout, Cin, dtype=jnp.bfloat16)
        bsc = jnp.zeros((Cout, 1), jnp.float32)

    # ------------------------------ block specs ------------------------------
    def tile_spec(c):          # (1, C, KT*HW) activation tile at time-tile t
        return pl.BlockSpec((1, c, TILE), lambda n, t: (n, 0, t))

    def prev_spec(c):          # one-time-step halo at t*KT - 1 (clamped; masked in-kernel)
        return pl.BlockSpec((1, c, HW),
                            lambda n, t: (n, 0, jnp.maximum(t * KT - 1, 0)))

    def next_spec(c):          # one-time-step halo at t*KT + KT (clamped; masked in-kernel)
        return pl.BlockSpec((1, c, HW),
                            lambda n, t: (n, 0, jnp.minimum(t * KT + KT, T - 1)))

    def cvec_spec(c):          # per-sample per-channel column (scale/shift/stats)
        return pl.BlockSpec((1, c, 1), lambda n, t: (n, 0, 0))

    def const_spec(shape):     # grid-invariant weights/biases: single-buffered
        nd = len(shape)
        return pl.BlockSpec(shape, lambda n, t: (0,) * nd,
                            pipeline_mode=pl.Buffered(1))

    f32, bf16 = jnp.float32, jnp.bfloat16
    vmem_a = _vmem_limit_bytes(
        _buf_bytes((1, Cin, TILE), f32) + 2 * _buf_bytes((1, Cin, 1), f32))
    vmem_b = _vmem_limit_bytes(
        _buf_bytes((1, Cin, TILE), f32) + 2 * _buf_bytes((1, Cin, HW), f32)
        + 2 * _buf_bytes((1, Cin, 1), f32)
        + _buf_bytes((3, Cout, Cin), bf16, 1) + _buf_bytes((Cout, 1), f32, 1)
        + _buf_bytes((1, Cout, TILE), f32) + 2 * _buf_bytes((1, Cout, 1), f32))
    vmem_c = _vmem_limit_bytes(
        _buf_bytes((1, Cin, TILE), f32) + _buf_bytes((1, Cout, TILE), f32)
        + 2 * _buf_bytes((1, Cout, HW), f32) + 2 * _buf_bytes((1, Cout, 1), f32)
        + _buf_bytes((3, Cout, Cout), bf16, 1) + 2 * _buf_bytes((Cout, 1), f32, 1)
        + _buf_bytes((Cout, Cin), bf16, 1)
        + _buf_bytes((1, Cout, TILE), f32))

    # ------------------------- pass A: GN1 statistics -------------------------
    xs1, xs2 = pl.pallas_call(
        _gn_stats_kernel,
        out_shape=(jax.ShapeDtypeStruct((N, Cin, 1), jnp.float32),
                   jax.ShapeDtypeStruct((N, Cin, 1), jnp.float32)),
        grid_spec=pltpu.PrefetchScalarGridSpec(
            num_scalar_prefetch=0,
            grid=(N, TT),
            in_specs=[tile_spec(Cin)],
            out_specs=(cvec_spec(Cin), cvec_spec(Cin)),
        ),
        compiler_params=pltpu.CompilerParams(
            dimension_semantics=("parallel", "arbitrary"),
            vmem_limit_bytes=vmem_a,
        ),
    )(x)
    scale1, shift1 = _fold_groupnorm(xs1, xs2, params["g1"], params["bn1"],
                                     float((Cin // NUM_GROUPS) * L))

    # ------------- pass B: GN1 apply + SiLU + conv1 (+ GN2 statistics) -------------
    h1, hs1, hs2 = pl.pallas_call(
        functools.partial(_conv1_kernel, kt=KT, hw=HW),
        out_shape=(jax.ShapeDtypeStruct((N, Cout, L), jnp.float32),
                   jax.ShapeDtypeStruct((N, Cout, 1), jnp.float32),
                   jax.ShapeDtypeStruct((N, Cout, 1), jnp.float32)),
        grid_spec=pltpu.PrefetchScalarGridSpec(
            num_scalar_prefetch=0,
            grid=(N, TT),
            in_specs=[tile_spec(Cin), prev_spec(Cin), next_spec(Cin),
                      cvec_spec(Cin), cvec_spec(Cin),
                      const_spec((3, Cout, Cin)), const_spec((Cout, 1))],
            out_specs=(tile_spec(Cout), cvec_spec(Cout), cvec_spec(Cout)),
        ),
        compiler_params=pltpu.CompilerParams(
            dimension_semantics=("parallel", "arbitrary"),
            vmem_limit_bytes=vmem_b,
        ),
    )(x, x, x, scale1, shift1, w1, b1)
    scale2, shift2 = _fold_groupnorm(hs1, hs2, params["g2"], params["bn2"],
                                     float((Cout // NUM_GROUPS) * L))

    # --------- pass C: GN2 apply + SiLU + conv2 + 1x1x1 shortcut + residual ---------
    out = pl.pallas_call(
        functools.partial(_conv2_kernel, kt=KT, hw=HW),
        out_shape=jax.ShapeDtypeStruct((N, Cout, L), jnp.float32),
        grid_spec=pltpu.PrefetchScalarGridSpec(
            num_scalar_prefetch=0,
            grid=(N, TT),
            in_specs=[tile_spec(Cin),
                      tile_spec(Cout), prev_spec(Cout), next_spec(Cout),
                      cvec_spec(Cout), cvec_spec(Cout),
                      const_spec((3, Cout, Cout)), const_spec((Cout, 1)),
                      const_spec((Cout, Cin)), const_spec((Cout, 1))],
            out_specs=tile_spec(Cout),
        ),
        compiler_params=pltpu.CompilerParams(
            dimension_semantics=("parallel", "parallel"),   # shards across v7x's 2 TCs
            vmem_limit_bytes=vmem_c,
        ),
    )(x, h1, h1, h1, scale2, shift2, w2, b2, wsc, bsc)

    return out.reshape(N, Cout, T, H, W)


# ------------------------------ pure-JAX reference ----------------------------
def reference(x, p):
    def gn(x, gamma, beta):
        N, C, T, H, W = x.shape
        xg = x.reshape(N, NUM_GROUPS, C // NUM_GROUPS, T, H, W)
        mean = xg.mean(axis=(2, 3, 4, 5), keepdims=True)
        var = ((xg - mean) ** 2).mean(axis=(2, 3, 4, 5), keepdims=True)
        xn = ((xg - mean) / jnp.sqrt(var + EPS)).reshape(N, C, T, H, W)
        return xn * gamma[None, :, None, None, None] + beta[None, :, None, None, None]

    def silu(v):
        return v * jax.nn.sigmoid(v)

    def conv(v, w, b, pad):
        y = lax.conv_general_dilated(v, w, window_strides=(1, 1, 1),
                                     padding=((pad, pad), (0, 0), (0, 0)),
                                     dimension_numbers=("NCDHW", "OIDHW", "NCDHW"))
        return y + b[None, :, None, None, None]

    h = conv(silu(gn(x, p["g1"], p["bn1"])), p["w1"], p["b1"], 1)
    h = conv(silu(gn(h, p["g2"], p["bn2"])), p["w2"], p["b2"], 1)
    sc = conv(x, p["wsc"], p["bsc"], 0)
    return sc + h


# ----------------------------------- main -------------------------------------
if __name__ == "__main__":
    # channels multiples of 32 (GroupNorm); H*W = 128 keeps every tile lane-aligned
    N, Cin, Cout, T, H, W = 2, 32, 64, 8, 16, 8

    key = jax.random.PRNGKey(0)
    keys = jax.random.split(key, 11)
    x = jax.random.normal(keys[0], (N, Cin, T, H, W), jnp.float32)

    params = {
        "g1": 1.0 + 0.1 * jax.random.normal(keys[1], (Cin,), jnp.float32),
        "bn1": 0.1 * jax.random.normal(keys[2], (Cin,), jnp.float32),
        "w1": 0.05 * jax.random.normal(keys[3], (Cout, Cin, 3, 1, 1), jnp.float32),
        "b1": 0.05 * jax.random.normal(keys[4], (Cout,), jnp.float32),
        "g2": 1.0 + 0.1 * jax.random.normal(keys[5], (Cout,), jnp.float32),
        "bn2": 0.1 * jax.random.normal(keys[6], (Cout,), jnp.float32),
        "w2": 0.05 * jax.random.normal(keys[7], (Cout, Cout, 3, 1, 1), jnp.float32),
        "b2": 0.05 * jax.random.normal(keys[8], (Cout,), jnp.float32),
        "wsc": 0.05 * jax.random.normal(keys[9], (Cout, Cin, 1, 1, 1), jnp.float32),
        "bsc": 0.05 * jax.random.normal(keys[10], (Cout,), jnp.float32),
    }

    out = jax.block_until_ready(temporal_resnet_block(x, params))
    ref = jax.block_until_ready(reference(x, params))

    # tolerance accounts for bf16 conv operands + bf16 SiLU (v6e/v7x fast path)
    # vs. the pure-f32 reference.
    np.testing.assert_allclose(np.asarray(out), np.asarray(ref), atol=3e-2, rtol=3e-2)
    assert out.shape == (N, Cout, T, H, W)
    print("KERNEL_OK")
</pallas_src>

<mosaic_0001>
module attributes {stable_mosaic.version = 11 : i64} {
  func.func @_gn_stats_kernel(%arg0: i32, %arg1: i32, %arg2: memref<1x32x256xf32, #tpu.memory_space<vmem>>, %arg3: memref<1x32x1xf32, #tpu.memory_space<vmem>>, %arg4: memref<1x32x1xf32, #tpu.memory_space<vmem>>) attributes {dimension_semantics = [#tpu.dimension_semantics<parallel>, #tpu.dimension_semantics<arbitrary>], iteration_bounds = array<i64: 2, 4>, scalar_prefetch = 0 : i64, scratch_operands = 0 : i64, tpu.core_type = #tpu.core_type<tc>, window_params = [{transform_indices = @transform_0, window_bounds = array<i64: 1, 32, 256>}, {transform_indices = @transform_1, window_bounds = array<i64: 1, 32, 1>}, {transform_indices = @transform_2, window_bounds = array<i64: 1, 32, 1>}]} {
    %c0_i32 = arith.constant 0 : i32
    %0 = arith.cmpi eq, %arg1, %c0_i32 : i32
    %1 = arith.extui %0 : i1 to i32
    %c0_i32_0 = arith.constant 0 : i32
    %2 = arith.cmpi ne, %1, %c0_i32_0 : i32
    scf.if %2 {
      %cst_16 = arith.constant 0.000000e+00 : f32
      %22 = vector.broadcast %cst_16 : f32 to vector<1x32x1xf32>
      %c0_17 = arith.constant 0 : index
      %c0_18 = arith.constant 0 : index
      %c0_19 = arith.constant 0 : index
      %23 = vector.load %arg3[%c0_17, %c0_18, %c0_19] : memref<1x32x1xf32, #tpu.memory_space<vmem>>, vector<1x32x1xf32>
      tpu.vector_store %arg3[%c0_17, %c0_18, %c0_19], %22 {strides = array<i32>} : memref<1x32x1xf32, #tpu.memory_space<vmem>>, vector<1x32x1xf32>,
      %cst_20 = arith.constant 0.000000e+00 : f32
      %24 = vector.broadcast %cst_20 : f32 to vector<1x32x1xf32>
      %c0_21 = arith.constant 0 : index
      %c0_22 = arith.constant 0 : index
      %c0_23 = arith.constant 0 : index
      %25 = vector.load %arg4[%c0_21, %c0_22, %c0_23] : memref<1x32x1xf32, #tpu.memory_space<vmem>>, vector<1x32x1xf32>
      tpu.vector_store %arg4[%c0_21, %c0_22, %c0_23], %24 {strides = array<i32>} : memref<1x32x1xf32, #tpu.memory_space<vmem>>, vector<1x32x1xf32>,
    } else {
    }
    %c0 = arith.constant 0 : index
    %c0_1 = arith.constant 0 : index
    %c0_2 = arith.constant 0 : index
    %3 = vector.load %arg2[%c0, %c0_1, %c0_2] : memref<1x32x256xf32, #tpu.memory_space<vmem>>, vector<1x32x256xf32>
    %4 = vector.shape_cast %3 : vector<1x32x256xf32> to vector<32x256xf32>
    %c0_3 = arith.constant 0 : index
    %c0_4 = arith.constant 0 : index
    %c0_5 = arith.constant 0 : index
    %5 = vector.load %arg3[%c0_3, %c0_4, %c0_5] : memref<1x32x1xf32, #tpu.memory_space<vmem>>, vector<1x32x1xf32>
    %6 = vector.shape_cast %5 : vector<1x32x1xf32> to vector<32x1xf32>
    %cst = arith.constant dense<0.000000e+00> : vector<32xf32>
    %7 = vector.multi_reduction <add>, %4, %cst [1] : vector<32x256xf32> to vector<32xf32>
    %8 = vector.shape_cast %7 : vector<32xf32> to vector<32x1xf32>
    %9 = arith.addf %6, %8 : vector<32x1xf32>
    %c0_6 = arith.constant 0 : index
    %c0_7 = arith.constant 0 : index
    %c0_8 = arith.constant 0 : index
    %10 = vector.load %arg3[%c0_6, %c0_7, %c0_8] : memref<1x32x1xf32, #tpu.memory_space<vmem>>, vector<1x32x1xf32>
    %11 = vector.shape_cast %10 : vector<1x32x1xf32> to vector<32x1xf32>
    %12 = vector.shape_cast %9 : vector<32x1xf32> to vector<1x32x1xf32>
    tpu.vector_store %arg3[%c0_6, %c0_7, %c0_8], %12 {strides = array<i32>} : memref<1x32x1xf32, #tpu.memory_space<vmem>>, vector<1x32x1xf32>,
    %c0_9 = arith.constant 0 : index
    %c0_10 = arith.constant 0 : index
    %c0_11 = arith.constant 0 : index
    %13 = vector.load %arg4[%c0_9, %c0_10, %c0_11] : memref<1x32x1xf32, #tpu.memory_space<vmem>>, vector<1x32x1xf32>
    %14 = vector.shape_cast %13 : vector<1x32x1xf32> to vector<32x1xf32>
    %15 = arith.mulf %4, %4 : vector<32x256xf32>
    %cst_12 = arith.constant dense<0.000000e+00> : vector<32xf32>
    %16 = vector.multi_reduction <add>, %15, %cst_12 [1] : vector<32x256xf32> to vector<32xf32>
    %17 = vector.shape_cast %16 : vector<32xf32> to vector<32x1xf32>
    %18 = arith.addf %14, %17 : vector<32x1xf32>
    %c0_13 = arith.constant 0 : index
    %c0_14 = arith.constant 0 : index
    %c0_15 = arith.constant 0 : index
    %19 = vector.load %arg4[%c0_13, %c0_14, %c0_15] : memref<1x32x1xf32, #tpu.memory_space<vmem>>, vector<1x32x1xf32>
    %20 = vector.shape_cast %19 : vector<1x32x1xf32> to vector<32x1xf32>
    %21 = vector.shape_cast %18 : vector<32x1xf32> to vector<1x32x1xf32>
    tpu.vector_store %arg4[%c0_13, %c0_14, %c0_15], %21 {strides = array<i32>} : memref<1x32x1xf32, #tpu.memory_space<vmem>>, vector<1x32x1xf32>,
    return
  }
  func.func @transform_0(%arg0: i32, %arg1: i32) -> (i32, i32, i32) {
    %c0_i32 = arith.constant 0 : i32
    %c0_i32_0 = arith.constant 0 : i32
    return %arg0, %c0_i32, %arg1 : i32, i32, i32
  }
  func.func @transform_1(%arg0: i32, %arg1: i32) -> (i32, i32, i32) {
    %c0_i32 = arith.constant 0 : i32
    %c0_i32_0 = arith.constant 0 : i32
    %c0_i32_1 = arith.constant 0 : i32
    return %arg0, %c0_i32, %c0_i32_0 : i32, i32, i32
  }
  func.func @transform_2(%arg0: i32, %arg1: i32) -> (i32, i32, i32) {
    %c0_i32 = arith.constant 0 : i32
    %c0_i32_0 = arith.constant 0 : i32
    %c0_i32_1 = arith.constant 0 : i32
    return %arg0, %c0_i32, %c0_i32_0 : i32, i32, i32
  }
}

module attributes {stable_mosaic.version = 11 : i64} {
  func.func @_conv1_kernel(%arg0: i32, %arg1: i32, %arg2: memref<1x32x256xf32, #tpu.memory_space<vmem>>, %arg3: memref<1x32x128xf32, #tpu.memory_space<vmem>>, %arg4: memref<1x32x128xf32, #tpu.memory_space<vmem>>, %arg5: memref<1x32x1xf32, #tpu.memory_space<vmem>>, %arg6: memref<1x32x1xf32, #tpu.memory_space<vmem>>, %arg7: memref<3x64x32xbf16, #tpu.memory_space<vmem>>, %arg8: memref<64x1xf32, #tpu.memory_space<vmem>>, %arg9: memref<1x64x256xf32, #tpu.memory_space<vmem>>, %arg10: memref<1x64x1xf32, #tpu.memory_space<vmem>>, %arg11: memref<1x64x1xf32, #tpu.memory_space<vmem>>) attributes {dimension_semantics = [#tpu.dimension_semantics<parallel>, #tpu.dimension_semantics<arbitrary>], iteration_bounds = array<i64: 2, 4>, scalar_prefetch = 0 : i64, scratch_operands = 0 : i64, tpu.core_type = #tpu.core_type<tc>, window_params = [{transform_indices = @transform_0, window_bounds = array<i64: 1, 32, 256>}, {transform_indices = @transform_1, window_bounds = array<i64: 1, 32, 128>}, {transform_indices = @transform_2, window_bounds = array<i64: 1, 32, 128>}, {transform_indices = @transform_3, window_bounds = array<i64: 1, 32, 1>}, {transform_indices = @transform_4, window_bounds = array<i64: 1, 32, 1>}, {pipeline_mode = #tpu.pipeline_mode<synchronous>, transform_indices = @transform_5, window_bounds = array<i64: 3, 64, 32>}, {pipeline_mode = #tpu.pipeline_mode<synchronous>, transform_indices = @transform_6, window_bounds = array<i64: 64, 1>}, {transform_indices = @transform_7, window_bounds = array<i64: 1, 64, 256>}, {transform_indices = @transform_8, window_bounds = array<i64: 1, 64, 1>}, {transform_indices = @transform_9, window_bounds = array<i64: 1, 64, 1>}]} {
    %c0 = arith.constant 0 : index
    %c0_0 = arith.constant 0 : index
    %c0_1 = arith.constant 0 : index
    %0 = vector.load %arg5[%c0, %c0_0, %c0_1] : memref<1x32x1xf32, #tpu.memory_space<vmem>>, vector<1x32x1xf32>
    %1 = vector.shape_cast %0 : vector<1x32x1xf32> to vector<32x1xf32>
    %c0_2 = arith.constant 0 : index
    %c0_3 = arith.constant 0 : index
    %c0_4 = arith.constant 0 : index
    %2 = vector.load %arg6[%c0_2, %c0_3, %c0_4] : memref<1x32x1xf32, #tpu.memory_space<vmem>>, vector<1x32x1xf32>
    %3 = vector.shape_cast %2 : vector<1x32x1xf32> to vector<32x1xf32>
    %c0_5 = arith.constant 0 : index
    %c0_6 = arith.constant 0 : index
    %c0_7 = arith.constant 0 : index
    %4 = vector.load %arg2[%c0_5, %c0_6, %c0_7] : memref<1x32x256xf32, #tpu.memory_space<vmem>>, vector<1x32x256xf32>
    %5 = vector.shape_cast %4 : vector<1x32x256xf32> to vector<32x256xf32>
    %6 = vector.broadcast %1 : vector<32x1xf32> to vector<32x256xf32>
    %7 = arith.mulf %5, %6 : vector<32x256xf32>
    %8 = vector.broadcast %3 : vector<32x1xf32> to vector<32x256xf32>
    %9 = arith.addf %7, %8 : vector<32x256xf32>
    %10 = arith.truncf %9 : vector<32x256xf32> to vector<32x256xbf16>
    %cst = arith.constant 0.000000e+00 : bf16
    %11 = vector.broadcast %cst : bf16 to vector<32x256xbf16>
    %12 = arith.subf %11, %10 : vector<32x256xbf16>
    %13 = math.exp %12 : vector<32x256xbf16>
    %cst_8 = arith.constant 1.000000e+00 : bf16
    %14 = vector.broadcast %cst_8 : bf16 to vector<32x256xbf16>
    %15 = arith.addf %14, %13 : vector<32x256xbf16>
    %16 = arith.divf %10, %15 : vector<32x256xbf16>
    %c0_9 = arith.constant 0 : index
    %c0_10 = arith.constant 0 : index
    %c0_11 = arith.constant 0 : index
    %17 = vector.load %arg3[%c0_9, %c0_10, %c0_11] : memref<1x32x128xf32, #tpu.memory_space<vmem>>, vector<1x32x128xf32>
    %18 = vector.shape_cast %17 : vector<1x32x128xf32> to vector<32x128xf32>
    %19 = vector.broadcast %1 : vector<32x1xf32> to vector<32x128xf32>
    %20 = arith.mulf %18, %19 : vector<32x128xf32>
    %21 = vector.broadcast %3 : vector<32x1xf32> to vector<32x128xf32>
    %22 = arith.addf %20, %21 : vector<32x128xf32>
    %23 = arith.truncf %22 : vector<32x128xf32> to vector<32x128xbf16>
    %cst_12 = arith.constant 0.000000e+00 : bf16
    %24 = vector.broadcast %cst_12 : bf16 to vector<32x128xbf16>
    %25 = arith.subf %24, %23 : vector<32x128xbf16>
    %26 = math.exp %25 : vector<32x128xbf16>
    %cst_13 = arith.constant 1.000000e+00 : bf16
    %27 = vector.broadcast %cst_13 : bf16 to vector<32x128xbf16>
    %28 = arith.addf %27, %26 : vector<32x128xbf16>
    %29 = arith.divf %23, %28 : vector<32x128xbf16>
    %c0_i32 = arith.constant 0 : i32
    %30 = arith.cmpi sgt, %arg1, %c0_i32 : i32
    %31 = arith.extui %30 : i1 to i32
    %32 = arith.sitofp %31 : i32 to f32
    %33 = arith.truncf %32 : f32 to bf16
    %34 = vector.broadcast %33 : bf16 to vector<32x128xbf16>
    %35 = arith.mulf %29, %34 : vector<32x128xbf16>
    %c0_14 = arith.constant 0 : index
    %c0_15 = arith.constant 0 : index
    %c0_16 = arith.constant 0 : index
    %36 = vector.load %arg4[%c0_14, %c0_15, %c0_16] : memref<1x32x128xf32, #tpu.memory_space<vmem>>, vector<1x32x128xf32>
    %37 = vector.shape_cast %36 : vector<1x32x128xf32> to vector<32x128xf32>
    %38 = vector.broadcast %1 : vector<32x1xf32> to vector<32x128xf32>
    %39 = arith.mulf %37, %38 : vector<32x128xf32>
    %40 = vector.broadcast %3 : vector<32x1xf32> to vector<32x128xf32>
    %41 = arith.addf %39, %40 : vector<32x128xf32>
    %42 = arith.truncf %41 : vector<32x128xf32> to vector<32x128xbf16>
    %cst_17 = arith.constant 0.000000e+00 : bf16
    %43 = vector.broadcast %cst_17 : bf16 to vector<32x128xbf16>
    %44 = arith.subf %43, %42 : vector<32x128xbf16>
    %45 = math.exp %44 : vector<32x128xbf16>
    %cst_18 = arith.constant 1.000000e+00 : bf16
    %46 = vector.broadcast %cst_18 : bf16 to vector<32x128xbf16>
    %47 = arith.addf %46, %45 : vector<32x128xbf16>
    %48 = arith.divf %42, %47 : vector<32x128xbf16>
    %c3_i32 = arith.constant 3 : i32
    %49 = arith.cmpi slt, %arg1, %c3_i32 : i32
    %50 = arith.extui %49 : i1 to i32
    %51 = arith.sitofp %50 : i32 to f32
    %52 = arith.truncf %51 : f32 to bf16
    %53 = vector.broadcast %52 : bf16 to vector<32x128xbf16>
    %54 = arith.mulf %48, %53 : vector<32x128xbf16>
    %55 = vector.extract_strided_slice %16 {offsets = [0, 0], sizes = [32, 128], strides = [1, 1]} : vector<32x256xbf16> to vector<32x128xbf16>
    %56 = tpu.concatenate %35, %55 in 1 : vector<32x128xbf16>, vector<32x128xbf16> -> vector<32x256xbf16>
    %57 = vector.extract_strided_slice %16 {offsets = [0, 128], sizes = [32, 128], strides = [1, 1]} : vector<32x256xbf16> to vector<32x128xbf16>
    %58 = tpu.concatenate %57, %54 in 1 : vector<32x128xbf16>, vector<32x128xbf16> -> vector<32x256xbf16>
    %c1 = arith.constant 1 : index
    %c0_19 = arith.constant 0 : index
    %c0_20 = arith.constant 0 : index
    %59 = vector.load %arg7[%c1, %c0_19, %c0_20] : memref<3x64x32xbf16, #tpu.memory_space<vmem>>, vector<1x64x32xbf16>
    %60 = vector.shape_cast %59 : vector<1x64x32xbf16> to vector<64x32xbf16>
    %cst_21 = arith.constant dense<0.000000e+00> : vector<64x256xf32>
    %61 = tpu.matmul %60, %16, %cst_21 {dimension_numbers = #tpu.dot_dimension_numbers<[1], [0], [0], [1], [0, 0, 1, 1], [], []>} : vector<64x32xbf16>, vector<32x256xbf16>, vector<64x256xf32> -> vector<64x256xf32>
    %c0_22 = arith.constant 0 : index
    %c0_23 = arith.constant 0 : index
    %c0_24 = arith.constant 0 : index
    %62 = vector.load %arg7[%c0_22, %c0_23, %c0_24] : memref<3x64x32xbf16, #tpu.memory_space<vmem>>, vector<1x64x32xbf16>
    %63 = vector.shape_cast %62 : vector<1x64x32xbf16> to vector<64x32xbf16>
    %cst_25 = arith.constant dense<0.000000e+00> : vector<64x256xf32>
    %64 = tpu.matmul %63, %56, %cst_25 {dimension_numbers = #tpu.dot_dimension_numbers<[1], [0], [0], [1], [0, 0, 1, 1], [], []>} : vector<64x32xbf16>, vector<32x256xbf16>, vector<64x256xf32> -> vector<64x256xf32>
    %65 = arith.addf %61, %64 : vector<64x256xf32>
    %c2 = arith.constant 2 : index
    %c0_26 = arith.constant 0 : index
    %c0_27 = arith.constant 0 : index
    %66 = vector.load %arg7[%c2, %c0_26, %c0_27] : memref<3x64x32xbf16, #tpu.memory_space<vmem>>, vector<1x64x32xbf16>
    %67 = vector.shape_cast %66 : vector<1x64x32xbf16> to vector<64x32xbf16>
    %cst_28 = arith.constant dense<0.000000e+00> : vector<64x256xf32>
    %68 = tpu.matmul %67, %58, %cst_28 {dimension_numbers = #tpu.dot_dimension_numbers<[1], [0], [0], [1], [0, 0, 1, 1], [], []>} : vector<64x32xbf16>, vector<32x256xbf16>, vector<64x256xf32> -> vector<64x256xf32>
    %69 = arith.addf %65, %68 : vector<64x256xf32>
    %c0_29 = arith.constant 0 : index
    %c0_30 = arith.constant 0 : index
    %70 = vector.load %arg8[%c0_29, %c0_30] : memref<64x1xf32, #tpu.memory_space<vmem>>, vector<64x1xf32>
    %71 = vector.broadcast %70 : vector<64x1xf32> to vector<64x256xf32>
    %72 = arith.addf %69, %71 : vector<64x256xf32>
    %c0_31 = arith.constant 0 : index
    %c0_32 = arith.constant 0 : index
    %c0_33 = arith.constant 0 : index
    %73 = vector.load %arg9[%c0_31, %c0_32, %c0_33] : memref<1x64x256xf32, #tpu.memory_space<vmem>>, vector<1x64x256xf32>
    %74 = vector.shape_cast %73 : vector<1x64x256xf32> to vector<64x256xf32>
    %75 = vector.shape_cast %72 : vector<64x256xf32> to vector<1x64x256xf32>
    tpu.vector_store %arg9[%c0_31, %c0_32, %c0_33], %75 {strides = array<i32>} : memref<1x64x256xf32, #tpu.memory_space<vmem>>, vector<1x64x256xf32>,
    %c0_i32_34 = arith.constant 0 : i32
    %76 = arith.cmpi eq, %arg1, %c0_i32_34 : i32
    %77 = arith.extui %76 : i1 to i32
    %c0_i32_35 = arith.constant 0 : i32
    %78 = arith.cmpi ne, %77, %c0_i32_35 : i32
    scf.if %78 {
      %cst_50 = arith.constant 0.000000e+00 : f32
      %96 = vector.broadcast %cst_50 : f32 to vector<1x64x1xf32>
      %c0_51 = arith.constant 0 : index
      %c0_52 = arith.constant 0 : index
      %c0_53 = arith.constant 0 : index
      %97 = vector.load %arg10[%c0_51, %c0_52, %c0_53] : memref<1x64x1xf32, #tpu.memory_space<vmem>>, vector<1x64x1xf32>
      tpu.vector_store %arg10[%c0_51, %c0_52, %c0_53], %96 {strides = array<i32>} : memref<1x64x1xf32, #tpu.memory_space<vmem>>, vector<1x64x1xf32>,
      %cst_54 = arith.constant 0.000000e+00 : f32
      %98 = vector.broadcast %cst_54 : f32 to vector<1x64x1xf32>
      %c0_55 = arith.constant 0 : index
      %c0_56 = arith.constant 0 : index
      %c0_57 = arith.constant 0 : index
      %99 = vector.load %arg11[%c0_55, %c0_56, %c0_57] : memref<1x64x1xf32, #tpu.memory_space<vmem>>, vector<1x64x1xf32>
      tpu.vector_store %arg11[%c0_55, %c0_56, %c0_57], %98 {strides = array<i32>} : memref<1x64x1xf32, #tpu.memory_space<vmem>>, vector<1x64x1xf32>,
    } else {
    }
    %c0_36 = arith.constant 0 : index
    %c0_37 = arith.constant 0 : index
    %c0_38 = arith.constant 0 : index
    %79 = vector.load %arg10[%c0_36, %c0_37, %c0_38] : memref<1x64x1xf32, #tpu.memory_space<vmem>>, vector<1x64x1xf32>
    %80 = vector.shape_cast %79 : vector<1x64x1xf32> to vector<64x1xf32>
    %cst_39 = arith.constant dense<0.000000e+00> : vector<64xf32>
    %81 = vector.multi_reduction <add>, %72, %cst_39 [1] : vector<64x256xf32> to vector<64xf32>
    %82 = vector.shape_cast %81 : vector<64xf32> to vector<64x1xf32>
    %83 = arith.addf %80, %82 : vector<64x1xf32>
    %c0_40 = arith.constant 0 : index
    %c0_41 = arith.constant 0 : index
    %c0_42 = arith.constant 0 : index
    %84 = vector.load %arg10[%c0_40, %c0_41, %c0_42] : memref<1x64x1xf32, #tpu.memory_space<vmem>>, vector<1x64x1xf32>
    %85 = vector.shape_cast %84 : vector<1x64x1xf32> to vector<64x1xf32>
    %86 = vector.shape_cast %83 : vector<64x1xf32> to vector<1x64x1xf32>
    tpu.vector_store %arg10[%c0_40, %c0_41, %c0_42], %86 {strides = array<i32>} : memref<1x64x1xf32, #tpu.memory_space<vmem>>, vector<1x64x1xf32>,
    %c0_43 = arith.constant 0 : index
    %c0_44 = arith.constant 0 : index
    %c0_45 = arith.constant 0 : index
    %87 = vector.load %arg11[%c0_43, %c0_44, %c0_45] : memref<1x64x1xf32, #tpu.memory_space<vmem>>, vector<1x64x1xf32>
    %88 = vector.shape_cast %87 : vector<1x64x1xf32> to vector<64x1xf32>
    %89 = arith.mulf %72, %72 : vector<64x256xf32>
    %cst_46 = arith.constant dense<0.000000e+00> : vector<64xf32>
    %90 = vector.multi_reduction <add>, %89, %cst_46 [1] : vector<64x256xf32> to vector<64xf32>
    %91 = vector.shape_cast %90 : vector<64xf32> to vector<64x1xf32>
    %92 = arith.addf %88, %91 : vector<64x1xf32>
    %c0_47 = arith.constant 0 : index
    %c0_48 = arith.constant 0 : index
    %c0_49 = arith.constant 0 : index
    %93 = vector.load %arg11[%c0_47, %c0_48, %c0_49] : memref<1x64x1xf32, #tpu.memory_space<vmem>>, vector<1x64x1xf32>
    %94 = vector.shape_cast %93 : vector<1x64x1xf32> to vector<64x1xf32>
    %95 = vector.shape_cast %92 : vector<64x1xf32> to vector<1x64x1xf32>
    tpu.vector_store %arg11[%c0_47, %c0_48, %c0_49], %95 {strides = array<i32>} : memref<1x64x1xf32, #tpu.memory_space<vmem>>, vector<1x64x1xf32>,
    return
  }
  func.func @transform_0(%arg0: i32, %arg1: i32) -> (i32, i32, i32) {
    %c0_i32 = arith.constant 0 : i32
    %c0_i32_0 = arith.constant 0 : i32
    return %arg0, %c0_i32, %arg1 : i32, i32, i32
  }
  func.func @transform_1(%arg0: i32, %arg1: i32) -> (i32, i32, i32) {
    %c2_i32 = arith.constant 2 : i32
    %0 = arith.muli %arg1, %c2_i32 : i32
    %c1_i32 = arith.constant 1 : i32
    %1 = arith.subi %0, %c1_i32 : i32
    %c0_i32 = arith.constant 0 : i32
    %2 = arith.maxsi %1, %c0_i32 : i32
    %c0_i32_0 = arith.constant 0 : i32
    %c0_i32_1 = arith.constant 0 : i32
    return %arg0, %c0_i32_0, %2 : i32, i32, i32
  }
  func.func @transform_2(%arg0: i32, %arg1: i32) -> (i32, i32, i32) {
    %c2_i32 = arith.constant 2 : i32
    %0 = arith.muli %arg1, %c2_i32 : i32
    %c2_i32_0 = arith.constant 2 : i32
    %1 = arith.addi %0, %c2_i32_0 : i32
    %c7_i32 = arith.constant 7 : i32
    %2 = arith.minsi %1, %c7_i32 : i32
    %c0_i32 = arith.constant 0 : i32
    %c0_i32_1 = arith.constant 0 : i32
    return %arg0, %c0_i32, %2 : i32, i32, i32
  }
  func.func @transform_3(%arg0: i32, %arg1: i32) -> (i32, i32, i32) {
    %c0_i32 = arith.constant 0 : i32
    %c0_i32_0 = arith.constant 0 : i32
    %c0_i32_1 = arith.constant 0 : i32
    return %arg0, %c0_i32, %c0_i32_0 : i32, i32, i32
  }
  func.func @transform_4(%arg0: i32, %arg1: i32) -> (i32, i32, i32) {
    %c0_i32 = arith.constant 0 : i32
    %c0_i32_0 = arith.constant 0 : i32
    %c0_i32_1 = arith.constant 0 : i32
    return %arg0, %c0_i32, %c0_i32_0 : i32, i32, i32
  }
  func.func @transform_5(%arg0: i32, %arg1: i32) -> (i32, i32, i32) {
    %c0_i32 = arith.constant 0 : i32
    %c0_i32_0 = arith.constant 0 : i32
    %c0_i32_1 = arith.constant 0 : i32
    %c0_i32_2 = arith.constant 0 : i32
    return %c0_i32, %c0_i32_0, %c0_i32_1 : i32, i32, i32
  }
  func.func @transform_6(%arg0: i32, %arg1: i32) -> (i32, i32) {
    %c0_i32 = arith.constant 0 : i32
    %c0_i32_0 = arith.constant 0 : i32
    %c0_i32_1 = arith.constant 0 : i32
    return %c0_i32, %c0_i32_0 : i32, i32
  }
  func.func @transform_7(%arg0: i32, %arg1: i32) -> (i32, i32, i32) {
    %c0_i32 = arith.constant 0 : i32
    %c0_i32_0 = arith.constant 0 : i32
    return %arg0, %c0_i32, %arg1 : i32, i32, i32
  }
  func.func @transform_8(%arg0: i32, %arg1: i32) -> (i32, i32, i32) {
    %c0_i32 = arith.constant 0 : i32
    %c0_i32_0 = arith.constant 0 : i32
    %c0_i32_1 = arith.constant 0 : i32
    return %arg0, %c0_i32, %c0_i32_0 : i32, i32, i32
  }
  func.func @transform_9(%arg0: i32, %arg1: i32) -> (i32, i32, i32) {
    %c0_i32 = arith.constant 0 : i32
    %c0_i32_0 = arith.constant 0 : i32
    %c0_i32_1 = arith.constant 0 : i32
    return %arg0, %c0_i32, %c0_i32_0 : i32, i32, i32
  }
}

module attributes {stable_mosaic.version = 11 : i64} {
  func.func @_conv2_kernel(%arg0: i32, %arg1: i32, %arg2: memref<1x32x256xf32, #tpu.memory_space<vmem>>, %arg3: memref<1x64x256xf32, #tpu.memory_space<vmem>>, %arg4: memref<1x64x128xf32, #tpu.memory_space<vmem>>, %arg5: memref<1x64x128xf32, #tpu.memory_space<vmem>>, %arg6: memref<1x64x1xf32, #tpu.memory_space<vmem>>, %arg7: memref<1x64x1xf32, #tpu.memory_space<vmem>>, %arg8: memref<3x64x64xbf16, #tpu.memory_space<vmem>>, %arg9: memref<64x1xf32, #tpu.memory_space<vmem>>, %arg10: memref<64x32xbf16, #tpu.memory_space<vmem>>, %arg11: memref<64x1xf32, #tpu.memory_space<vmem>>, %arg12: memref<1x64x256xf32, #tpu.memory_space<vmem>>) attributes {dimension_semantics = [#tpu.dimension_semantics<parallel>, #tpu.dimension_semantics<parallel>], iteration_bounds = array<i64: 2, 4>, scalar_prefetch = 0 : i64, scratch_operands = 0 : i64, tpu.core_type = #tpu.core_type<tc>, window_params = [{transform_indices = @transform_0, window_bounds = array<i64: 1, 32, 256>}, {transform_indices = @transform_1, window_bounds = array<i64: 1, 64, 256>}, {transform_indices = @transform_2, window_bounds = array<i64: 1, 64, 128>}, {transform_indices = @transform_3, window_bounds = array<i64: 1, 64, 128>}, {transform_indices = @transform_4, window_bounds = array<i64: 1, 64, 1>}, {transform_indices = @transform_5, window_bounds = array<i64: 1, 64, 1>}, {pipeline_mode = #tpu.pipeline_mode<synchronous>, transform_indices = @transform_6, window_bounds = array<i64: 3, 64, 64>}, {pipeline_mode = #tpu.pipeline_mode<synchronous>, transform_indices = @transform_7, window_bounds = array<i64: 64, 1>}, {pipeline_mode = #tpu.pipeline_mode<synchronous>, transform_indices = @transform_8, window_bounds = array<i64: 64, 32>}, {pipeline_mode = #tpu.pipeline_mode<synchronous>, transform_indices = @transform_9, window_bounds = array<i64: 64, 1>}, {transform_indices = @transform_10, window_bounds = array<i64: 1, 64, 256>}]} {
    %c0 = arith.constant 0 : index
    %c0_0 = arith.constant 0 : index
    %0 = vector.load %arg10[%c0, %c0_0] : memref<64x32xbf16, #tpu.memory_space<vmem>>, vector<64x32xbf16>
    %c0_1 = arith.constant 0 : index
    %c0_2 = arith.constant 0 : index
    %c0_3 = arith.constant 0 : index
    %1 = vector.load %arg2[%c0_1, %c0_2, %c0_3] : memref<1x32x256xf32, #tpu.memory_space<vmem>>, vector<1x32x256xf32>
    %2 = vector.shape_cast %1 : vector<1x32x256xf32> to vector<32x256xf32>
    %3 = arith.truncf %2 : vector<32x256xf32> to vector<32x256xbf16>
    %cst = arith.constant dense<0.000000e+00> : vector<64x256xf32>
    %4 = tpu.matmul %0, %3, %cst {dimension_numbers = #tpu.dot_dimension_numbers<[1], [0], [0], [1], [0, 0, 1, 1], [], []>} : vector<64x32xbf16>, vector<32x256xbf16>, vector<64x256xf32> -> vector<64x256xf32>
    %c0_4 = arith.constant 0 : index
    %c0_5 = arith.constant 0 : index
    %5 = vector.load %arg11[%c0_4, %c0_5] : memref<64x1xf32, #tpu.memory_space<vmem>>, vector<64x1xf32>
    %6 = vector.broadcast %5 : vector<64x1xf32> to vector<64x256xf32>
    %7 = arith.addf %4, %6 : vector<64x256xf32>
    %c0_6 = arith.constant 0 : index
    %c0_7 = arith.constant 0 : index
    %c0_8 = arith.constant 0 : index
    %8 = vector.load %arg6[%c0_6, %c0_7, %c0_8] : memref<1x64x1xf32, #tpu.memory_space<vmem>>, vector<1x64x1xf32>
    %9 = vector.shape_cast %8 : vector<1x64x1xf32> to vector<64x1xf32>
    %c0_9 = arith.constant 0 : index
    %c0_10 = arith.constant 0 : index
    %c0_11 = arith.constant 0 : index
    %10 = vector.load %arg7[%c0_9, %c0_10, %c0_11] : memref<1x64x1xf32, #tpu.memory_space<vmem>>, vector<1x64x1xf32>
    %11 = vector.shape_cast %10 : vector<1x64x1xf32> to vector<64x1xf32>
    %c0_12 = arith.constant 0 : index
    %c0_13 = arith.constant 0 : index
    %c0_14 = arith.constant 0 : index
    %12 = vector.load %arg3[%c0_12, %c0_13, %c0_14] : memref<1x64x256xf32, #tpu.memory_space<vmem>>, vector<1x64x256xf32>
    %13 = vector.shape_cast %12 : vector<1x64x256xf32> to vector<64x256xf32>
    %14 = vector.broadcast %9 : vector<64x1xf32> to vector<64x256xf32>
    %15 = arith.mulf %13, %14 : vector<64x256xf32>
    %16 = vector.broadcast %11 : vector<64x1xf32> to vector<64x256xf32>
    %17 = arith.addf %15, %16 : vector<64x256xf32>
    %18 = arith.truncf %17 : vector<64x256xf32> to vector<64x256xbf16>
    %cst_15 = arith.constant 0.000000e+00 : bf16
    %19 = vector.broadcast %cst_15 : bf16 to vector<64x256xbf16>
    %20 = arith.subf %19, %18 : vector<64x256xbf16>
    %21 = math.exp %20 : vector<64x256xbf16>
    %cst_16 = arith.constant 1.000000e+00 : bf16
    %22 = vector.broadcast %cst_16 : bf16 to vector<64x256xbf16>
    %23 = arith.addf %22, %21 : vector<64x256xbf16>
    %24 = arith.divf %18, %23 : vector<64x256xbf16>
    %c0_17 = arith.constant 0 : index
    %c0_18 = arith.constant 0 : index
    %c0_19 = arith.constant 0 : index
    %25 = vector.load %arg4[%c0_17, %c0_18, %c0_19] : memref<1x64x128xf32, #tpu.memory_space<vmem>>, vector<1x64x128xf32>
    %26 = vector.shape_cast %25 : vector<1x64x128xf32> to vector<64x128xf32>
    %27 = vector.broadcast %9 : vector<64x1xf32> to vector<64x128xf32>
    %28 = arith.mulf %26, %27 : vector<64x128xf32>
    %29 = vector.broadcast %11 : vector<64x1xf32> to vector<64x128xf32>
    %30 = arith.addf %28, %29 : vector<64x128xf32>
    %31 = arith.truncf %30 : vector<64x128xf32> to vector<64x128xbf16>
    %cst_20 = arith.constant 0.000000e+00 : bf16
    %32 = vector.broadcast %cst_20 : bf16 to vector<64x128xbf16>
    %33 = arith.subf %32, %31 : vector<64x128xbf16>
    %34 = math.exp %33 : vector<64x128xbf16>
    %cst_21 = arith.constant 1.000000e+00 : bf16
    %35 = vector.broadcast %cst_21 : bf16 to vector<64x128xbf16>
    %36 = arith.addf %35, %34 : vector<64x128xbf16>
    %37 = arith.divf %31, %36 : vector<64x128xbf16>
    %c0_i32 = arith.constant 0 : i32
    %38 = arith.cmpi sgt, %arg1, %c0_i32 : i32
    %39 = arith.extui %38 : i1 to i32
    %40 = arith.sitofp %39 : i32 to f32
    %41 = arith.truncf %40 : f32 to bf16
    %42 = vector.broadcast %41 : bf16 to vector<64x128xbf16>
    %43 = arith.mulf %37, %42 : vector<64x128xbf16>
    %c0_22 = arith.constant 0 : index
    %c0_23 = arith.constant 0 : index
    %c0_24 = arith.constant 0 : index
    %44 = vector.load %arg5[%c0_22, %c0_23, %c0_24] : memref<1x64x128xf32, #tpu.memory_space<vmem>>, vector<1x64x128xf32>
    %45 = vector.shape_cast %44 : vector<1x64x128xf32> to vector<64x128xf32>
    %46 = vector.broadcast %9 : vector<64x1xf32> to vector<64x128xf32>
    %47 = arith.mulf %45, %46 : vector<64x128xf32>
    %48 = vector.broadcast %11 : vector<64x1xf32> to vector<64x128xf32>
    %49 = arith.addf %47, %48 : vector<64x128xf32>
    %50 = arith.truncf %49 : vector<64x128xf32> to vector<64x128xbf16>
    %cst_25 = arith.constant 0.000000e+00 : bf16
    %51 = vector.broadcast %cst_25 : bf16 to vector<64x128xbf16>
    %52 = arith.subf %51, %50 : vector<64x128xbf16>
    %53 = math.exp %52 : vector<64x128xbf16>
    %cst_26 = arith.constant 1.000000e+00 : bf16
    %54 = vector.broadcast %cst_26 : bf16 to vector<64x128xbf16>
    %55 = arith.addf %54, %53 : vector<64x128xbf16>
    %56 = arith.divf %50, %55 : vector<64x128xbf16>
    %c3_i32 = arith.constant 3 : i32
    %57 = arith.cmpi slt, %arg1, %c3_i32 : i32
    %58 = arith.extui %57 : i1 to i32
    %59 = arith.sitofp %58 : i32 to f32
    %60 = arith.truncf %59 : f32 to bf16
    %61 = vector.broadcast %60 : bf16 to vector<64x128xbf16>
    %62 = arith.mulf %56, %61 : vector<64x128xbf16>
    %63 = vector.extract_strided_slice %24 {offsets = [0, 0], sizes = [64, 128], strides = [1, 1]} : vector<64x256xbf16> to vector<64x128xbf16>
    %64 = tpu.concatenate %43, %63 in 1 : vector<64x128xbf16>, vector<64x128xbf16> -> vector<64x256xbf16>
    %65 = vector.extract_strided_slice %24 {offsets = [0, 128], sizes = [64, 128], strides = [1, 1]} : vector<64x256xbf16> to vector<64x128xbf16>
    %66 = tpu.concatenate %65, %62 in 1 : vector<64x128xbf16>, vector<64x128xbf16> -> vector<64x256xbf16>
    %c1 = arith.constant 1 : index
    %c0_27 = arith.constant 0 : index
    %c0_28 = arith.constant 0 : index
    %67 = vector.load %arg8[%c1, %c0_27, %c0_28] : memref<3x64x64xbf16, #tpu.memory_space<vmem>>, vector<1x64x64xbf16>
    %68 = vector.shape_cast %67 : vector<1x64x64xbf16> to vector<64x64xbf16>
    %cst_29 = arith.constant dense<0.000000e+00> : vector<64x256xf32>
    %69 = tpu.matmul %68, %24, %cst_29 {dimension_numbers = #tpu.dot_dimension_numbers<[1], [0], [0], [1], [0, 0, 1, 1], [], []>} : vector<64x64xbf16>, vector<64x256xbf16>, vector<64x256xf32> -> vector<64x256xf32>
    %c0_30 = arith.constant 0 : index
    %c0_31 = arith.constant 0 : index
    %c0_32 = arith.constant 0 : index
    %70 = vector.load %arg8[%c0_30, %c0_31, %c0_32] : memref<3x64x64xbf16, #tpu.memory_space<vmem>>, vector<1x64x64xbf16>
    %71 = vector.shape_cast %70 : vector<1x64x64xbf16> to vector<64x64xbf16>
    %cst_33 = arith.constant dense<0.000000e+00> : vector<64x256xf32>
    %72 = tpu.matmul %71, %64, %cst_33 {dimension_numbers = #tpu.dot_dimension_numbers<[1], [0], [0], [1], [0, 0, 1, 1], [], []>} : vector<64x64xbf16>, vector<64x256xbf16>, vector<64x256xf32> -> vector<64x256xf32>
    %73 = arith.addf %69, %72 : vector<64x256xf32>
    %c2 = arith.constant 2 : index
    %c0_34 = arith.constant 0 : index
    %c0_35 = arith.constant 0 : index
    %74 = vector.load %arg8[%c2, %c0_34, %c0_35] : memref<3x64x64xbf16, #tpu.memory_space<vmem>>, vector<1x64x64xbf16>
    %75 = vector.shape_cast %74 : vector<1x64x64xbf16> to vector<64x64xbf16>
    %cst_36 = arith.constant dense<0.000000e+00> : vector<64x256xf32>
    %76 = tpu.matmul %75, %66, %cst_36 {dimension_numbers = #tpu.dot_dimension_numbers<[1], [0], [0], [1], [0, 0, 1, 1], [], []>} : vector<64x64xbf16>, vector<64x256xbf16>, vector<64x256xf32> -> vector<64x256xf32>
    %77 = arith.addf %73, %76 : vector<64x256xf32>
    %c0_37 = arith.constant 0 : index
    %c0_38 = arith.constant 0 : index
    %78 = vector.load %arg9[%c0_37, %c0_38] : memref<64x1xf32, #tpu.memory_space<vmem>>, vector<64x1xf32>
    %79 = vector.broadcast %78 : vector<64x1xf32> to vector<64x256xf32>
    %80 = arith.addf %77, %79 : vector<64x256xf32>
    %81 = arith.addf %7, %80 : vector<64x256xf32>
    %c0_39 = arith.constant 0 : index
    %c0_40 = arith.constant 0 : index
    %c0_41 = arith.constant 0 : index
    %82 = vector.load %arg12[%c0_39, %c0_40, %c0_41] : memref<1x64x256xf32, #tpu.memory_space<vmem>>, vector<1x64x256xf32>
    %83 = vector.shape_cast %82 : vector<1x64x256xf32> to vector<64x256xf32>
    %84 = vector.shape_cast %81 : vector<64x256xf32> to vector<1x64x256xf32>
    tpu.vector_store %arg12[%c0_39, %c0_40, %c0_41], %84 {strides = array<i32>} : memref<1x64x256xf32, #tpu.memory_space<vmem>>, vector<1x64x256xf32>,
    return
  }
  func.func @transform_0(%arg0: i32, %arg1: i32) -> (i32, i32, i32) {
    %c0_i32 = arith.constant 0 : i32
    %c0_i32_0 = arith.constant 0 : i32
    return %arg0, %c0_i32, %arg1 : i32, i32, i32
  }
  func.func @transform_1(%arg0: i32, %arg1: i32) -> (i32, i32, i32) {
    %c0_i32 = arith.constant 0 : i32
    %c0_i32_0 = arith.constant 0 : i32
    return %arg0, %c0_i32, %arg1 : i32, i32, i32
  }
  func.func @transform_2(%arg0: i32, %arg1: i32) -> (i32, i32, i32) {
    %c2_i32 = arith.constant 2 : i32
    %0 = arith.muli %arg1, %c2_i32 : i32
    %c1_i32 = arith.constant 1 : i32
    %1 = arith.subi %0, %c1_i32 : i32
    %c0_i32 = arith.constant 0 : i32
    %2 = arith.maxsi %1, %c0_i32 : i32
    %c0_i32_0 = arith.constant 0 : i32
    %c0_i32_1 = arith.constant 0 : i32
    return %arg0, %c0_i32_0, %2 : i32, i32, i32
  }
  func.func @transform_3(%arg0: i32, %arg1: i32) -> (i32, i32, i32) {
    %c2_i32 = arith.constant 2 : i32
    %0 = arith.muli %arg1, %c2_i32 : i32
    %c2_i32_0 = arith.constant 2 : i32
    %1 = arith.addi %0, %c2_i32_0 : i32
    %c7_i32 = arith.constant 7 : i32
    %2 = arith.minsi %1, %c7_i32 : i32
    %c0_i32 = arith.constant 0 : i32
    %c0_i32_1 = arith.constant 0 : i32
    return %arg0, %c0_i32, %2 : i32, i32, i32
  }
  func.func @transform_4(%arg0: i32, %arg1: i32) -> (i32, i32, i32) {
    %c0_i32 = arith.constant 0 : i32
    %c0_i32_0 = arith.constant 0 : i32
    %c0_i32_1 = arith.constant 0 : i32
    return %arg0, %c0_i32, %c0_i32_0 : i32, i32, i32
  }
  func.func @transform_5(%arg0: i32, %arg1: i32) -> (i32, i32, i32) {
    %c0_i32 = arith.constant 0 : i32
    %c0_i32_0 = arith.constant 0 : i32
    %c0_i32_1 = arith.constant 0 : i32
    return %arg0, %c0_i32, %c0_i32_0 : i32, i32, i32
  }
  func.func @transform_6(%arg0: i32, %arg1: i32) -> (i32, i32, i32) {
    %c0_i32 = arith.constant 0 : i32
    %c0_i32_0 = arith.constant 0 : i32
    %c0_i32_1 = arith.constant 0 : i32
    %c0_i32_2 = arith.constant 0 : i32
    return %c0_i32, %c0_i32_0, %c0_i32_1 : i32, i32, i32
  }
  func.func @transform_7(%arg0: i32, %arg1: i32) -> (i32, i32) {
    %c0_i32 = arith.constant 0 : i32
    %c0_i32_0 = arith.constant 0 : i32
    %c0_i32_1 = arith.constant 0 : i32
    return %c0_i32, %c0_i32_0 : i32, i32
  }
  func.func @transform_8(%arg0: i32, %arg1: i32) -> (i32, i32) {
    %c0_i32 = arith.constant 0 : i32
    %c0_i32_0 = arith.constant 0 : i32
    %c0_i32_1 = arith.constant 0 : i32
    return %c0_i32, %c0_i32_0 : i32, i32
  }
  func.func @transform_9(%arg0: i32, %arg1: i32) -> (i32, i32) {
    %c0_i32 = arith.constant 0 : i32
    %c0_i32_0 = arith.constant 0 : i32
    %c0_i32_1 = arith.constant 0 : i32
    return %c0_i32, %c0_i32_0 : i32, i32
  }
  func.func @transform_10(%arg0: i32, %arg1: i32) -> (i32, i32, i32) {
    %c0_i32 = arith.constant 0 : i32
    %c0_i32_0 = arith.constant 0 : i32
    return %arg0, %c0_i32, %arg1 : i32, i32, i32
  }
}

</mosaic_0001>

<bundles_post_ra>
// kernel: temporal_resnet_block.3
= control target key start
LH: loop header
LB: loop body
LE: loop exit
PB: predicated region body
PF: predicated region fallthrough
CT: control target
= control target key end

     0   :  { %s542_s9 = smov 0   ;;  %s544_s10 = smov 0   ;;  %s671_s0 = inlined_call_operand.vmem [shape: f32[2,32,1024], index: 0, kind: input, shape index: {}]   ;;  %s672_s1 = inlined_call_operand.vmem [shape: f32[2,32,1], index: 1, kind: output, shape index: {0}]   ;;  %s673_s2 = inlined_call_operand.vmem [shape: f32[2,32,1], index: 2, kind: output, shape index: {1}]  }
   0x1   :  { %s546_s11 = smov 0   ;;  %s548_s12 = smov 0  }
   0x2   :  { %s550_s13 = smov 0   ;;  %s552_s14 = smov 0  }
   0x3   :  { %s554_s15 = smov 0  }
   0x4 LB: > { %s22_s16 = sadd.s32 1, %s516_s13  ;;  %s25_s17 = sadd.s32 1, %s520_s14  ;;  %s524_s15 = sphi %s554_s15, %s13_s15   ;;  %s520_s14 = sphi %s552_s14, %s679_s14   ;;  %s516_s13 = sphi %s550_s13, %s678_s13   ;;  %s512_s12 = sphi %s548_s12, %s677_s12   ;;  %s508_s11 = sphi %s546_s11, %s676_s11   ;;  %s504_s10 = sphi %s544_s10, %s675_s10   ;;  %s500_s9 = sphi %s542_s9, %s674_s9  }
   0x5   : > { %p23_p0 = scmp.ge.s32.totalorder %s22_s16, 4  ;;  %p41_p1 = scmp.ne.s32.totalorder %s504_s10, %s500_s9 }
   0x6   : > { %p42_p2 = scmp.eq.s32.totalorder %s524_s15, 0  ;;  %s34_s21 = sadd.s32 1, %s504_s10 }
   0x7   : > { %s681_s16 = smov (%p23_p0, %s22_s16), 0  ;;  %s683_s17 = smov (!%p23_p0, %s25_s17), %s520_s14 }
   0x8   : > { %p43_p3 = por %p42_p2, %p41_p1  ;;  %p27_p4 = scmp.ge.s32.totalorder %s683_s17, 2 }
   0x9   : > { %s30_s18 = ssub.s32 %s516_s13, %s681_s16  ;;  %p397_p6 = scmp.ge.s32.totalorder %s524_s15, 8 }
   0xa   : > { %s685_s17 = smov (%p27_p4, %s683_s17), 0 }
   0xb   : > { %s29_s19 = ssub.s32 %s520_s14, %s685_s17  ;;  %119 = sbr.rel (%p397_p6) target bundleno = 29 (0x1d), region = 16 }
   0xc   : > { %s31_s20 = sor.u32 %s30_s18, %s29_s19 }
   0xd   : > { %p32_p5 = scmp.eq.s32.totalorder %s31_s20, 0 }
   0xf   : > { %s593_s22 = scalar_select %p32_p5, %s504_s10, %s34_s21  }
  0x12   : > { %122 = sbr.rel (!%p43_p3) target bundleno = 29 (0x1d), region = 20  ;;  %s124_s23 = sand.u32 (%p43_p3), 1, %s504_s10  }
  0x13   : > { %s399_s24 = sshll.u32 (%p43_p3), %s516_s13, 1  ;;  %s398_s25 = sshll.u32 (%p43_p3), %s124_s23, 6 }
  0x14   : > { %s400_s26 = sshll.u32 (%p43_p3), %s520_s14, 5  ;;  %s126_s4 = scalar_lea.vmem (%p43_p3), [#allocation2], %s398_s25 }
  0x15   : > { %s129_s27 = sadd.s32 (%p43_p3), %s400_s26, %s399_s24 }
  0x16   : > { %s401_s28 = sshll.u32 (%p43_p3), %s129_s27, 3 }
  0x17   : > { %s131_s3 = scalar_lea.vmem (%p43_p3), %s671_s0, %s401_s28 }
  0x18   : > { %v144_v0 = vld [vmem:[%s131_s3] sm:$0xff] (%p43_p3)  ;;  %v146_v1 = vld [vmem:[%s131_s3 + $0x8] sm:$0xff] (%p43_p3) }
  0x19   : > { %v148_v2 = vld [vmem:[%s131_s3 + $0x40] sm:$0xff]  ;;  %145 = vst [vmem:[%s126_s4] sm:$0xff] %v144_v0  ;;  %147 = vst [vmem:[%s126_s4 + $0x8] sm:$0xff] %v146_v1  ;;  %v150_v3 = vld [vmem:[%s131_s3 + $0x48] sm:$0xff] }
  0x1a   : > { %149 = vst [vmem:[%s126_s4 + $0x10] sm:$0xff] %v148_v2  ;;  %v152_v4 = vld [vmem:[%s131_s3 + $0x80] sm:$0xff]  ;;  %v154_v5 = vld [vmem:[%s131_s3 + $0x88] sm:$0xff]  ;;  %151 = vst [vmem:[%s126_s4 + $0x18] sm:$0xff] %v150_v3 }
  0x1b   : > { %153 = vst [vmem:[%s126_s4 + $0x20] sm:$0xff] %v152_v4  ;;  %155 = vst [vmem:[%s126_s4 + $0x28] sm:$0xff] %v154_v5  ;;  %v156_v6 = vld [vmem:[%s131_s3 + $0xc0] sm:$0xff]  ;;  %v158_v7 = vld [vmem:[%s131_s3 + $0xc8] sm:$0xff] }
  0x1c   : > { %157 = vst [vmem:[%s126_s4 + $0x30] sm:$0xff] %v156_v6  ;;  %159 = vst [vmem:[%s126_s4 + $0x38] sm:$0xff] %v158_v7 }
  0x1d PF: > { %p402_p7 = scmp.ge.s32.totalorder %s524_s15, 1  ;;  %p164_p8 = scmp.lt.s32.totalorder %s524_s15, 9 }
  0x1f   : > { %p165_p9 = pnand %p402_p7, %p164_p8 }
  0x20   : > { %s171_s5 = sand.u32 (!%p165_p9), 1, %s500_s9   ;;  %p198_p10 = scmp.lt.s32.totalorder (!%p165_p9), %s512_s12, 1 }
  0x21   : > { %168 = sbr.rel (%p165_p9) target bundleno = 208 (0xd0), region = 43  ;;  %s403_s6 = sshll.u32 (!%p165_p9), %s171_s5, 6 }
  0x22   : > { %s173_s24 = scalar_lea.vmem (!%p165_p9), [#allocation2], %s403_s6  ;;  %p408_p11 = scmp.ne.s32.totalorder (!%p165_p9), %s508_s11, 0 }
  0x28   : > { %s687_s12 = smov (!%p198_p10, %s512_s12), 1  ;;  %211 = sbr.rel (%p408_p11) target bundleno = 47 (0x2f), region = 51 }
  0x29   : > { %s411_s7 = sshll.u32 %s687_s12, 5  ;;  %vm212_vm0 = vcmask (!%p408_p11), 7168   ;;  %v526_v8 = vmov (!%p408_p11), 0.0  }
  0x2a   : > { %s610_s19 = scalar_lea.vmem %s672_s1, %s411_s7  ;;  %s615_s23 = scalar_lea.vmem %s673_s2, %s411_s7 }
  0x2b   : > { %213 = vst.msk [vmem:[%s610_s19] sm:$0xff] (!%p408_p11), %vm212_vm0, %v526_v8  ;;  %214 = vst.msk [vmem:[%s610_s19 + $0x8] sm:$0xff] (!%p408_p11), %vm212_vm0, %v526_v8 }
  0x2c   : > { %215 = vst.msk [vmem:[%s610_s19 + $0x10] sm:$0xff] (!%p408_p11), %vm212_vm0, %v526_v8  ;;  %216 = vst.msk [vmem:[%s610_s19 + $0x18] sm:$0xff] (!%p408_p11), %vm212_vm0, %v526_v8 }
  0x2d   : > { %217 = vst.msk [vmem:[%s615_s23] sm:$0xff] (!%p408_p11), %vm212_vm0, %v526_v8  ;;  %218 = vst.msk [vmem:[%s615_s23 + $0x8] sm:$0xff] (!%p408_p11), %vm212_vm0, %v526_v8 }
  0x2e   : > { %219 = vst.msk [vmem:[%s615_s23 + $0x10] sm:$0xff] (!%p408_p11), %vm212_vm0, %v526_v8  ;;  %220 = vst.msk [vmem:[%s615_s23 + $0x18] sm:$0xff] (!%p408_p11), %vm212_vm0, %v526_v8 }
  0x2f PF: > { %v225_v9 = vld [vmem:[%s173_s24 + $0x20] sm:$0xff]  ;;  %v226_v10 = vld [vmem:[%s173_s24 + $0x28] sm:$0xff]  ;;  %v227_v14 = vld [vmem:[%s173_s24 + $0x30] sm:$0xff]  ;;  %vm249_vm1 = vcmask 7168  }
  0x30   : > { %v221_v11 = vld [vmem:[%s173_s24] sm:$0xff]  ;;  %v239_v12 = vadd.f32 %v226_v10, %v225_v9  ;;  %v222_v13 = vld [vmem:[%s173_s24 + $0x8] sm:$0xff]  ;;  %v228_v15 = vld [vmem:[%s173_s24 + $0x38] sm:$0xff]  ;;  %v264_v26 = vmul.f32 %v227_v14, %v227_v14  ;;  %v262_v28 = vmul.f32 %v225_v9, %v225_v9  ;;  %v263_v29 = vmul.f32 %v226_v10, %v226_v10 }
  0x31   : > { %v233_v16 = vadd.f32 %v222_v13, %v221_v11  ;;  %v223_v17 = vld [vmem:[%s173_s24 + $0x10] sm:$0xff]  ;;  %v224_v18 = vld [vmem:[%s173_s24 + $0x18] sm:$0xff]  ;;  %v242_v19 = vadd.f32 %v228_v15, %v227_v14  ;;  %v258_v22 = vmul.f32 %v221_v11, %v221_v11  ;;  %v259_v23 = vmul.f32 %v222_v13, %v222_v13 }
  0x32   : > { %240 = vadd.xlane.f32.xlu1 %v239_v12  ;;  %v260_v20 = vmul.f32 %v223_v17, %v223_v17  ;;  %v261_v21 = vmul.f32 %v224_v18, %v224_v18  ;;  %v236_v24 = vadd.f32 %v224_v18, %v223_v17  ;;  %v265_v27 = vmul.f32 %v228_v15, %v228_v15  ;;  %v229_v34 = vld [vmem:[%s610_s19] sm:$0xff]  ;;  %v230_v40 = vld [vmem:[%s610_s19 + $0x8] sm:$0xff] }
  0x33   : > { %234 = vadd.xlane.f32.xlu0 %v233_v16  ;;  %v266_v30 = vadd.f32 %v259_v23, %v258_v22  ;;  %v272_v32 = vadd.f32 %v263_v29, %v262_v28  ;;  %v231_v33 = vld [vmem:[%s610_s19 + $0x10] sm:$0xff]  ;;  %v232_v39 = vld [vmem:[%s610_s19 + $0x18] sm:$0xff] }
  0x34   : > { %v269_v25 = vadd.f32 %v261_v21, %v260_v20  ;;  %v275_v31 = vadd.f32 %v265_v27, %v264_v26  ;;  %v255_v45 = vld [vmem:[%s615_s23 + $0x8] sm:$0xff]  ;;  %v254_v46 = vld [vmem:[%s615_s23] sm:$0xff] }
  0x35   : > { %v257_v51 = vld [vmem:[%s615_s23 + $0x18] sm:$0xff]  ;;  %v256_v52 = vld [vmem:[%s615_s23 + $0x10] sm:$0xff] }
  0x36   : > { %243 = vadd.xlane.f32.xlu1 %v242_v19 }
  0x37   : > { %237 = vadd.xlane.f32.xlu0 %v236_v24 }
  0x3a   : > { %270 = vadd.xlane.f32.xlu1 %v269_v25 }
  0x3b   : > { %267 = vadd.xlane.f32.xlu0 %v266_v30 }
  0x3e   : > { %276 = vadd.xlane.f32.xlu1 %v275_v31 }
  0x3f   : > { %273 = vadd.xlane.f32.xlu0 %v272_v32 }
  0xbf   : > { %v241_v35 = vpop.xlane.xlu1 %240 }
  0xc0   : > { %v247_v36 = vadd.f32 %v241_v35, %v231_v33  ;;  %v235_v37 = vpop.xlane.xlu0 %234 }
  0xc1   : > { %v245_v38 = vadd.f32 %v235_v37, %v229_v34 }
  0xc2   : > { %252 = vst.msk [vmem:[%s610_s19 + $0x10] sm:$0xff] %vm249_vm1, %v247_v36 }
  0xc3   : > { %250 = vst.msk [vmem:[%s610_s19] sm:$0xff] %vm249_vm1, %v245_v38  ;;  %v244_v41 = vpop.xlane.xlu1 %243 }
  0xc4   : > { %v248_v42 = vadd.f32 %v244_v41, %v232_v39  ;;  %v238_v43 = vpop.xlane.xlu0 %237 }
  0xc5   : > { %v246_v44 = vadd.f32 %v238_v43, %v230_v40 }
  0xc6   : > { %253 = vst.msk [vmem:[%s610_s19 + $0x18] sm:$0xff] %vm249_vm1, %v248_v42 }
  0xc7   : > { %251 = vst.msk [vmem:[%s610_s19 + $0x8] sm:$0xff] %vm249_vm1, %v246_v44  ;;  %v271_v47 = vpop.xlane.xlu1 %270 }
  0xc8   : > { %v279_v48 = vadd.f32 %v271_v47, %v255_v45  ;;  %v268_v49 = vpop.xlane.xlu0 %267 }
  0xc9   : > { %v278_v50 = vadd.f32 %v268_v49, %v254_v46 }
  0xca   : > { %283 = vst.msk [vmem:[%s615_s23 + $0x8] sm:$0xff] %vm249_vm1, %v279_v48 }
  0xcb   : > { %282 = vst.msk [vmem:[%s615_s23] sm:$0xff] %vm249_vm1, %v278_v50  ;;  %v277_v53 = vpop.xlane.xlu1 %276 }
  0xcc   : > { %v281_v54 = vadd.f32 %v277_v53, %v257_v51  ;;  %v274_v55 = vpop.xlane.xlu0 %273 }
  0xcd   : > { %v280_v56 = vadd.f32 %v274_v55, %v256_v52 }
  0xce   : > { %285 = vst.msk [vmem:[%s615_s23 + $0x18] sm:$0xff] %vm249_vm1, %v281_v54 }
  0xcf   : > { %284 = vst.msk [vmem:[%s615_s23 + $0x10] sm:$0xff] %vm249_vm1, %v280_v56 }
  0xd0 PF: > { %s13_s15 = sadd.s32 1, %s524_s15   ;;  %s674_s9 = smov %s504_s10 }
  0xd1   : > { %p10_p12 = scmp.ge.s32.totalorder %s13_s15, 10   ;;  %s675_s10 = smov %s593_s22 }
  0xd2   : > { %s676_s11 = smov %s516_s13  ;;  %s677_s12 = smov %s520_s14 }
  0xd3   : > { %s678_s13 = smov %s681_s16  ;;  %s679_s14 = smov %s685_s17 }
  0xd4   :  { %12 = sbr.rel (!%p10_p12) target bundleno = 4 (0x4), region = 98 }

// kernel: temporal_resnet_block.4
= control target key start
LH: loop header
LB: loop body
LE: loop exit
PB: predicated region body
PF: predicated region fallthrough
CT: control target
= control target key end

     0   :  { %s2632_s0 = inlined_call_operand.vmem [shape: f32[2,32,1024], index: 0, kind: input, shape index: {}, may-alias: {0,1,2}]   ;;  %s2633_s1 = inlined_call_operand.vmem [shape: f32[2,32,1024], index: 1, kind: input, shape index: {}, may-alias: {0,1,2}]   ;;  %s2634_s2 = inlined_call_operand.vmem [shape: f32[2,32,1024], index: 2, kind: input, shape index: {}, may-alias: {0,1,2}]   ;;  %s2635_s3 = inlined_call_operand.vmem [shape: f32[2,32,1], index: 3, kind: input, shape index: {}]   ;;  %s2636_s4 = inlined_call_operand.vmem [shape: f32[2,32,1], index: 4, kind: input, shape index: {}]   ;;  %s2637_s5 = inlined_call_operand.vmem [shape: bf16[3,64,32], index: 5, kind: input, shape index: {}]   ;;  %s2638_s6 = inlined_call_operand.vmem [shape: f32[64,1], index: 6, kind: input, shape index: {}]   ;;  %s2639_s7 = inlined_call_operand.vmem [shape: f32[2,64,1024], index: 7, kind: output, shape index: {0}]   ;;  %s2640_s8 = inlined_call_operand.vmem [shape: f32[2,64,1], index: 8, kind: output, shape index: {1}]   ;;  %s2641_s9 = inlined_call_operand.vmem [shape: f32[2,64,1], index: 9, kind: output, shape index: {2}]  }
   0x1   :  { %2652 = sst [smem:[#allocation16_spill]] %s2637_s5 }
   0x2   :  { %2653 = sst [smem:[#allocation17_spill]] %s2639_s7 }
   0x3   :  { %s2052_s30 = smov 0   ;;  %s2054_s10 = smov 0  }
   0x4   :  { %s2056_s11 = smov 0   ;;  %s2058_s12 = smov 0  }
   0x5   :  { %s2060_s13 = smov 0   ;;  %s2062_s14 = smov 0  }
   0x6   :  { %s2064_s15 = smov 0   ;;  %s2066_s16 = smov 0  }
   0x7   :  { %s2068_s17 = smov 0   ;;  %s2070_s18 = smov 0  }
   0x8   :  { %s2072_s19 = smov 0  }
   0x9 LB: > { %2654 = sst [smem:[#allocation6_spill]] %s1958_s30  ;;  %s29_s21 = sadd.s32 1, %s1990_s17  ;;  %s1998_s19 = sphi %s2072_s19, %s20_s19   ;;  %s1994_s18 = sphi %s2070_s18, %s2690_s18   ;;  %s1990_s17 = sphi %s2068_s17, %s2689_s17   ;;  %s1986_s16 = sphi %s2066_s16, %s2688_s16   ;;  %s1982_s15 = sphi %s2064_s15, %s2679_s15   ;;  %s1978_s14 = sphi %s2062_s14, %s2687_s14   ;;  %s1974_s13 = sphi %s2060_s13, %s2686_s13   ;;  %s1970_s12 = sphi %s2058_s12, %s2685_s12   ;;  %s1966_s11 = sphi %s2056_s11, %s2684_s11   ;;  %s1962_s10 = sphi %s2054_s10, %s2683_s10   ;;  %s1958_s30 = sphi %s2052_s30, %s2682_s30  }
   0xa   : > { %2655 = sst [smem:[#allocation7_spill]] %s1966_s11  ;;  %p30_p0 = scmp.ge.s32.totalorder %s29_s21, 4 }
   0xb   : > { %2656 = sst [smem:[#allocation8_spill]] %s1974_s13  ;;  %s32_s22 = sadd.s32 1, %s1994_s18 }
   0xc   : > { %2657 = sst [smem:[#allocation9_spill]] %s1982_s15  ;;  %s41_s23 = sadd.s32 1, %s1978_s14 }
   0xd   : > { %2658 = sst [smem:[#allocation10_spill]] %s1990_s17  ;;  %p48_p1 = scmp.ne.s32.totalorder %s1978_s14, %s1974_s13 }
   0xe   : > { %s2692_s21 = smov (%p30_p0, %s29_s21), 0  ;;  %s2694_s22 = smov (!%p30_p0, %s32_s22), %s1994_s18 }
   0xf   : > { %2659 = sst [smem:[#allocation11_spill]] %s2692_s21  ;;  %s37_s24 = ssub.s32 %s1990_s17, %s2692_s21 }
  0x10   : > { %p49_p2 = scmp.eq.s32.totalorder %s1998_s19, 0  ;;  %p34_p3 = scmp.ge.s32.totalorder %s2694_s22, 2 }
  0x11   : > { %s2120_s25 = sshll.u32 %s1990_s17, 1  ;;  %s1657_s28 = sshll.u32 %s2692_s21, 1 }
  0x12   : > { %p2127_p4 = por %p49_p2, %p48_p1  ;;  %s1656_s27 = sadd.s32 4294967295, %s2120_s25 }
  0x13   : > { %s2696_s22 = smov (%p34_p3, %s2694_s22), 0  ;;  %p66_p5 = scmp.gt.s32.totalorder %s1656_s27, 0 }
  0x14   : > { %2661 = sst [smem:[#allocation12_spill]] %s2696_s22  ;;  %s36_s29 = ssub.s32 %s1994_s18, %s2696_s22 }
  0x15   : > { %s1658_s20 = sadd.s32 4294967295, %s1657_s28  ;;  %s38_s7 = sor.u32 %s37_s24, %s36_s29 }
  0x16   : > { %p70_p6 = scmp.gt.s32.totalorder %s1658_s20, 0  ;;  %p39_p7 = scmp.eq.s32.totalorder %s38_s7, 0 }
  0x17   : > { %s77_s17 = sadd.s32 1, %s1970_s12  ;;  %s2698_s27 = smov (!%p66_p5, %s1656_s27), 0 }
  0x18   : > { %s2141_s5 = scalar_select %p39_p7, %s1978_s14, %s41_s23  }
  0x19   : > { %s2700_s20 = smov (!%p70_p6, %s1658_s20), 0  ;;  %p84_p8 = scmp.ne.s32.totalorder %s1970_s12, %s1966_s11 }
  0x1a   : > { %2662 = sst [smem:[#allocation13_spill]] %s2141_s5  ;;  %s101_s22 = sadd.s32 2, %s2120_s25 }
  0x1b   : > { %s73_s21 = ssub.s32 %s2698_s27, %s2700_s20  ;;  %p102_p9 = scmp.lt.s32.totalorder %s101_s22, 7 }
  0x1c   : > { %s74_s24 = sor.u32 %s73_s21, %s36_s29  ;;  %p2149_p10 = por %p84_p8, %p49_p2 }
  0x1d   : > { %p75_p11 = scmp.eq.s32.totalorder %s74_s24, 0  ;;  %s105_s15 = sadd.s32 2, %s1657_s28 }
  0x1e   : > { %s2702_s22 = smov (!%p102_p9, %s101_s22), 7  ;;  %p106_p12 = scmp.lt.s32.totalorder %s105_s15, 7 }
  0x1f   : > { %s2156_s23 = scalar_select %p75_p11, %s1970_s12, %s77_s17  }
  0x20   : > { %p120_p13 = scmp.ne.s32.totalorder %s1962_s10, %s1958_s30  ;;  %s2665_s5 = sadd.s32 4294967295, %s1998_s19  }
  0x21   : > { %2664 = sst [smem:[#allocation14_spill]] %s2156_s23  ;;  %p246_p0 = scmp.eq.s32.totalorder %s2665_s5, 7 }
  0x22   : > { %s2704_s15 = smov (!%p106_p12, %s105_s15), 7  ;;  %p2164_p3 = por %p120_p13, %p49_p2 }
  0x23   : > { %p2171_p5 = por %p246_p0, %p48_p1  ;;  %s109_s28 = ssub.s32 %s2702_s22, %s2704_s15 }
  0x24   : > { %s110_s24 = sor.u32 %s109_s28, %s36_s29  ;;  %s113_s11 = sadd.s32 1, %s1962_s10 }
  0x25   : > { %s2667_s21 = scalar_select %p2171_p5, 1, 0 }
  0x26   : > { %p111_p6 = scmp.eq.s32.totalorder %s110_s24, 0  ;;  %p1662_p7 = scmp.ge.s32.totalorder %s1998_s19, 8 }
  0x27   : > { %2668 = sst [smem:[#allocation15_spill]] %s2667_s21 }
  0x28   : > { %s2178_s17 = scalar_select %p111_p6, %s1962_s10, %s113_s11  }
  0x29   : > { %326 = sbr.rel (%p1662_p7) target bundleno = 78 (0x4e), region = 24 }
  0x30   : > { %329 = sbr.rel (!%p2127_p4) target bundleno = 58 (0x3a), region = 28  ;;  %s331_s5 = sand.u32 (%p2127_p4), 1, %s1978_s14  }
  0x31   : > { %s1665_s23 = sshll.u32 (%p2127_p4), %s1994_s18, 5  ;;  %s1663_s30 = sshll.u32 (%p2127_p4), %s331_s5, 6 }
  0x32   : > { %s336_s13 = sadd.s32 (%p2127_p4), %s1665_s23, %s2120_s25  ;;  %s333_s11 = scalar_lea.vmem (%p2127_p4), [#allocation2], %s1663_s30 }
  0x33   : > { %s1666_s21 = sshll.u32 (%p2127_p4), %s336_s13, 3 }
  0x34   : > { %s338_s28 = scalar_lea.vmem (%p2127_p4), %s2632_s0, %s1666_s21 }
  0x35   : > { %v351_v0 = vld [vmem:[%s338_s28] sm:$0xff] (%p2127_p4)  ;;  %v353_v1 = vld [vmem:[%s338_s28 + $0x8] sm:$0xff] (%p2127_p4) }
  0x36   : > { %v355_v2 = vld [vmem:[%s338_s28 + $0x40] sm:$0xff] (%p2127_p4)  ;;  %352 = vst [vmem:[%s333_s11] sm:$0xff] (%p2127_p4), %v351_v0  ;;  %354 = vst [vmem:[%s333_s11 + $0x8] sm:$0xff] (%p2127_p4), %v353_v1  ;;  %v357_v3 = vld [vmem:[%s338_s28 + $0x48] sm:$0xff] (%p2127_p4) }
  0x37   : > { %356 = vst [vmem:[%s333_s11 + $0x10] sm:$0xff] %v355_v2  ;;  %v359_v4 = vld [vmem:[%s338_s28 + $0x80] sm:$0xff]  ;;  %v361_v5 = vld [vmem:[%s338_s28 + $0x88] sm:$0xff]  ;;  %358 = vst [vmem:[%s333_s11 + $0x18] sm:$0xff] %v357_v3 }
  0x38   : > { %360 = vst [vmem:[%s333_s11 + $0x20] sm:$0xff] %v359_v4  ;;  %362 = vst [vmem:[%s333_s11 + $0x28] sm:$0xff] %v361_v5  ;;  %v363_v6 = vld [vmem:[%s338_s28 + $0xc0] sm:$0xff]  ;;  %v365_v7 = vld [vmem:[%s338_s28 + $0xc8] sm:$0xff] }
  0x39   : > { %364 = vst [vmem:[%s333_s11 + $0x30] sm:$0xff] %v363_v6  ;;  %366 = vst [vmem:[%s333_s11 + $0x38] sm:$0xff] %v365_v7 }
  0x3a PF: > { %372 = sbr.rel (!%p2149_p10) target bundleno = 68 (0x44), region = 51  ;;  %s374_s30 = sand.u32 (%p2149_p10), 1, %s1970_s12  }
  0x3b   : > { %s1670_s13 = sshll.u32 (%p2149_p10), %s1994_s18, 5  ;;  %s1667_s25 = sshll.u32 (%p2149_p10), %s374_s30, 5 }
  0x3c   : > { %s382_s26 = sadd.s32 (%p2149_p10), %s1670_s13, %s2698_s27  ;;  %s376_s15 = scalar_lea.vmem (%p2149_p10), [#allocation3], %s1667_s25 }
  0x3d   : > { %s1671_s23 = sshll.u32 (%p2149_p10), %s382_s26, 3 }
  0x3e   : > { %s384_s5 = scalar_lea.vmem (%p2149_p10), %s2633_s1, %s1671_s23 }
  0x3f   : > { %v418_v8 = vld [vmem:[%s384_s5] sm:$0xff] (%p2149_p10) }
  0x40   : > { %v420_v9 = vld [vmem:[%s384_s5 + $0x40] sm:$0xff] (%p2149_p10)  ;;  %419 = vst [vmem:[%s376_s15] sm:$0xff] (%p2149_p10), %v418_v8 }
  0x41   : > { %v422_v10 = vld [vmem:[%s384_s5 + $0x80] sm:$0xff]  ;;  %421 = vst [vmem:[%s376_s15 + $0x8] sm:$0xff] %v420_v9 }
  0x42   : > { %423 = vst [vmem:[%s376_s15 + $0x10] sm:$0xff] %v422_v10  ;;  %v424_v11 = vld [vmem:[%s384_s5 + $0xc0] sm:$0xff] }
  0x43   : > { %425 = vst [vmem:[%s376_s15 + $0x18] sm:$0xff] %v424_v11 }
  0x44 PF: > { %431 = sbr.rel (!%p2164_p3) target bundleno = 78 (0x4e), region = 89  ;;  %s433_s27 = sand.u32 (%p2164_p3), 1, %s1962_s10  }
  0x45   : > { %s1674_s7 = sshll.u32 (%p2164_p3), %s1994_s18, 5  ;;  %s1672_s29 = sshll.u32 (%p2164_p3), %s433_s27, 5 }
  0x46   : > { %s441_s28 = sadd.s32 (%p2164_p3), %s1674_s7, %s2702_s22  ;;  %s435_s26 = scalar_lea.vmem (%p2164_p3), [#allocation4], %s1672_s29 }
  0x47   : > { %s1675_s11 = sshll.u32 (%p2164_p3), %s441_s28, 3 }
  0x48   : > { %s443_s25 = scalar_lea.vmem (%p2164_p3), %s2634_s2, %s1675_s11 }
  0x49   : > { %v477_v12 = vld [vmem:[%s443_s25] sm:$0xff] (%p2164_p3) }
  0x4a   : > { %v479_v13 = vld [vmem:[%s443_s25 + $0x40] sm:$0xff] (%p2164_p3)  ;;  %478 = vst [vmem:[%s435_s26] sm:$0xff] (%p2164_p3), %v477_v12 }
  0x4b   : > { %v481_v14 = vld [vmem:[%s443_s25 + $0x80] sm:$0xff]  ;;  %480 = vst [vmem:[%s435_s26 + $0x8] sm:$0xff] %v479_v13 }
  0x4c   : > { %482 = vst [vmem:[%s435_s26 + $0x10] sm:$0xff] %v481_v14  ;;  %v483_v15 = vld [vmem:[%s443_s25 + $0xc0] sm:$0xff] }
  0x4d   : > { %484 = vst [vmem:[%s435_s26 + $0x18] sm:$0xff] %v483_v15 }
  0x4e PF: > { %p1676_p1 = scmp.ge.s32.totalorder %s1998_s19, 1  ;;  %p505_p2 = scmp.lt.s32.totalorder %s1998_s19, 9 }
  0x50   : > { %p506_p4 = pnand %p1676_p1, %p505_p2 }
  0x51   : > { %p597_p8 = scmp.lt.s32.totalorder (!%p506_p4), %s1986_s16, 1  ;;  %v2000_v16 = vmov (!%p506_p4), 0   ;;  %v1177_v25 = vld [vmem:[%s2638_s6 + $0x8] sm:$0xff] (!%p506_p4)  ;;  %s2669_s21 = sld [smem:[#allocation8_spill]] (!%p506_p4)  ;;  %v1176_v26 = vld [vmem:[%s2638_s6] sm:$0xff] (!%p506_p4)  ;;  %v1179_v27 = vld [vmem:[%s2638_s6 + $0x18] sm:$0xff] (!%p506_p4) }
  0x52   : > { %509 = sbr.rel (%p506_p4) target bundleno = 723 (0x2d3), region = 135  ;;  %1867 = vset.pattern.permute.xlu1 (!%p506_p4), %v2000_v16  ;;  %1866 = vset.pattern.permute.xlu0 (!%p506_p4), %v2000_v16  ;;  %s2670_s24 = sld [smem:[#allocation7_spill]] (!%p506_p4)  ;;  %v1178_v28 = vld [vmem:[%s2638_s6 + $0x10] sm:$0xff] (!%p506_p4)  ;;  %v1181_v29 = vld [vmem:[%s2638_s6 + $0x28] sm:$0xff] (!%p506_p4)  ;;  %v1180_v30 = vld [vmem:[%s2638_s6 + $0x20] sm:$0xff] (!%p506_p4)  ;;  %vm855_vm0 = vcmask (!%p506_p4), 261120  }
  0x53   : > { %1005 = vmatprep.mubr.bf16.mxu0 (!%p506_p4), %v2000_v16  ;;  %900 = vmatprep.mubr.bf16.mxu1 (!%p506_p4), %v2000_v16  ;;  %s2671_s15 = sld [smem:[#allocation6_spill]] (!%p506_p4)  ;;  %v1183_v31 = vld [vmem:[%s2638_s6 + $0x38] sm:$0xff] (!%p506_p4)  ;;  %v1182_v32 = vld [vmem:[%s2638_s6 + $0x30] sm:$0xff] (!%p506_p4) }
  0x57   : > { %s512_s29 = sand.u32 (!%p506_p4), 1, %s2669_s21  }
  0x58   : > { %s1677_s30 = sshll.u32 (!%p506_p4), %s512_s29, 6 }
  0x59   : > { %s598_s22 = scalar_select %p597_p8, %s1986_s16, 1 }
  0x5a   : > { %s526_s28 = sand.u32 1, %s2671_s15   ;;  %s2258_s26 = scalar_lea.vmem [#allocation2], %s1677_s30 }
  0x5b   : > { %s1736_s20 = sshll.u32 %s598_s22, 5  ;;  %s1738_s23 = sshll.u32 %s598_s22, 6  ;;  %v628_v35 = vld [vmem:[%s2258_s26] sm:$0xff]  ;;  %v629_v36 = vld [vmem:[%s2258_s26 + $0x8] sm:$0xff]  ;;  %v630_v39 = vld [vmem:[%s2258_s26 + $0x10] sm:$0xff] }
  0x5c   : > { %s606_s5 = scalar_lea.vmem %s2636_s4, %s1736_s20  ;;  %s2219_s7 = scalar_lea.vmem %s2640_s8, %s1738_s23  ;;  %v631_v40 = vld [vmem:[%s2258_s26 + $0x18] sm:$0xff]  ;;  %v634_v53 = vld [vmem:[%s2258_s26 + $0x30] sm:$0xff]  ;;  %v632_v61 = vld [vmem:[%s2258_s26 + $0x20] sm:$0xff] }
  0x5d   : > { %s2224_s11 = scalar_lea.vmem %s2641_s9, %s1738_s23  ;;  %v624_v17 = vld [vmem:[%s606_s5] sm:$0xff]  ;;  %s601_s25 = scalar_lea.vmem %s2635_s3, %s1736_s20  ;;  %v625_v19 = vld [vmem:[%s606_s5 + $0x8] sm:$0xff]  ;;  %v627_v23 = vld [vmem:[%s606_s5 + $0x18] sm:$0xff] }
  0x5e   : > { %666 = vperm.xlu1 %1867, %v624_v17   ;;  %v620_v18 = vld [vmem:[%s601_s25] sm:$0xff]  ;;  %v621_v20 = vld [vmem:[%s601_s25 + $0x8] sm:$0xff]  ;;  %v623_v21 = vld [vmem:[%s601_s25 + $0x18] sm:$0xff]  ;;  %s2672_s15 = sld [smem:[#allocation9_spill]] }
  0x5f   : > { %638 = vperm.xlu0 %1866, %v620_v18   ;;  %v622_v22 = vld [vmem:[%s601_s25 + $0x10] sm:$0xff]  ;;  %s1679_s25 = sshll.u32 %s526_s28, 5  ;;  %v635_v54 = vld [vmem:[%s2258_s26 + $0x38] sm:$0xff]  ;;  %v633_v3 = vld [vmem:[%s2258_s26 + $0x28] sm:$0xff] }
  0x60   : > { %v626_v24 = vld [vmem:[%s606_s5 + $0x10] sm:$0xff]  ;;  %s519_s5 = sand.u32 1, %s2670_s24   ;;  %s2265_s24 = scalar_lea.vmem [#allocation4], %s1679_s25 }
  0x61   : > { %s1678_s13 = sshll.u32 %s519_s5, 5  ;;  %v771_v38 = vld [vmem:[%s2265_s24] sm:$0xff]  ;;  %v772_v42 = vld [vmem:[%s2265_s24 + $0x8] sm:$0xff]  ;;  %v774_v56 = vld [vmem:[%s2265_s24 + $0x18] sm:$0xff] }
  0x62   : > { %671 = vperm.xlu1 %1867, %v625_v19   ;;  %s2262_s22 = scalar_lea.vmem [#allocation3], %s1678_s13  ;;  %v773_v5 = vld [vmem:[%s2265_s24 + $0x10] sm:$0xff] }
  0x63   : > { %643 = vperm.xlu0 %1866, %v621_v20   ;;  %v724_v37 = vld [vmem:[%s2262_s22] sm:$0xff]  ;;  %v725_v41 = vld [vmem:[%s2262_s22 + $0x8] sm:$0xff]  ;;  %v727_v55 = vld [vmem:[%s2262_s22 + $0x18] sm:$0xff] }
  0x64   : > { %p752_p9 = scmp.gt.s32.totalorder %s2672_s15, 0  ;;  %v726_v4 = vld [vmem:[%s2262_s22 + $0x10] sm:$0xff]  ;;  %p799_p10 = scmp.lt.s32.totalorder %s2672_s15, 3 }
  0x65   : > { %p1729_p13 = scmp.ne.s32.totalorder %s2672_s15, 0 }
  0x66   : > { %653 = vperm.xlu1 %1867, %v623_v21   ;;  %s753_s20 = scalar_select %p752_p9, 1, 0 }
  0x67   : > { %648 = vperm.xlu0 %1866, %v622_v22   ;;  %s800_s27 = scalar_select %p799_p10, 1, 0 }
  0x68   : > { %s2292_s23 = scvt.s32.f32 %s753_s20  ;;  %vm1260_vm1 = vcmask (!%p1729_p13), 7168  }
  0x69   : > { %s2313_s28 = scvt.s32.f32 %s800_s27 }
  0x6a   : > { %681 = vperm.xlu1 %1867, %v627_v23   ;;  %s757_s5 = sshrl.u32 %s2292_s23, 16  ;;  %p756_p11 = scmp.ne.f32.partialorder %s2292_s23, %s2292_s23 }
  0x6b   : > { %676 = vperm.xlu0 %1866, %v626_v24   ;;  %s758_s30 = sand.u32 1, %s757_s5  ;;  %s804_s13 = sshrl.u32 %s2313_s28, 16 }
  0x6c   : > { %s759_s25 = sadd.s32 32767, %s758_s30  ;;  %s805_s26 = sand.u32 1, %s804_s13 }
  0x6d   : > { %s760_s22 = sadd.s32 %s759_s25, %s2292_s23  ;;  %s806_s24 = sadd.s32 32767, %s805_s26 }
  0x6e   : > { %1191 = vperm.xlu1 %1867, %v1177_v25   ;;  %s761_s20 = sand.u32 4294901760, %s760_s22  ;;  %s807_s27 = sadd.s32 %s806_s24, %s2313_s28 }
  0x6f   : > { %1186 = vperm.xlu0 %1866, %v1176_v26   ;;  %s2706_s20 = smov (%p756_p11, %s761_s20), 2143289344  ;;  %p803_p12 = scmp.ne.f32.partialorder %s2313_s28, %s2313_s28 }
  0x70   : > { %s808_s23 = sand.u32 4294901760, %s807_s27  ;;  %s764_s5 = sshrl.u32 %s2706_s20, 16 }
  0x71   : > { %s2708_s23 = smov (%p803_p12, %s808_s23), 2143289344  ;;  %s765_s30 = sshll.u32 %s764_s5, 16 }
  0x72   : > { %1201 = vperm.xlu1 %1867, %v1179_v27   ;;  %s811_s13 = sshrl.u32 %s2708_s23, 16  ;;  %s766_s25 = sor.u32 %s765_s30, %s764_s5 }
  0x73   : > { %1196 = vperm.xlu0 %1866, %v1178_v28   ;;  %s812_s26 = sshll.u32 %s811_s13, 16  ;;  %s2673_s20 = sld [smem:[#allocation16_spill]] }
  0x74   : > { %s813_s28 = sor.u32 %s812_s26, %s811_s13  ;;  %s1680_s5 = sshll.u32 %s512_s29, 7 }
  0x75   : > { %s2397_s30 = scalar_lea.vmem [#allocation5], %s1680_s5 }
  0x76   : > { %1211 = vperm.xlu1 %1867, %v1181_v29  }
  0x77   : > { %1206 = vperm.xlu0 %1866, %v1180_v30  }
  0x7a   : > { %1221 = vperm.xlu1 %1867, %v1183_v31  }
  0x7b   : > { %1216 = vperm.xlu0 %1866, %v1182_v32  }
  0xdd   : > { %v667_v33 = vpop.permute.xlu1 %666 }
  0xde   : > { %v639_v34 = vpop.permute.xlu0 %638 }
  0xdf   : > { %v656_v44 = vmul.f32 %v639_v34, %v628_v35  ;;  %v657_v45 = vmul.f32 %v639_v34, %v629_v36  ;;  %v728_v46 = vmul.f32 %v724_v37, %v639_v34  ;;  %v775_v47 = vmul.f32 %v771_v38, %v639_v34 }
  0xe1   : > { %v672_v43 = vpop.permute.xlu1 %671  ;;  %v684_v63 = vadd.f32 %v667_v33, %v656_v44  ;;  %v685_v0 = vadd.f32 %v667_v33, %v657_v45  ;;  %v779_v1 = vadd.f32 %v775_v47, %v667_v33  ;;  %v732_v6 = vadd.f32 %v728_v46, %v667_v33 }
  0xe2   : > { %v644_v48 = vpop.permute.xlu0 %643 }
  0xe3   : > { %v658_v49 = vmul.f32 %v644_v48, %v630_v39  ;;  %v659_v50 = vmul.f32 %v644_v48, %v631_v40  ;;  %v729_v51 = vmul.f32 %v725_v41, %v644_v48  ;;  %v776_v52 = vmul.f32 %v772_v42, %v644_v48 }
  0xe5   : > { %v686_v57 = vadd.f32 %v672_v43, %v658_v49  ;;  %v687_v58 = vadd.f32 %v672_v43, %v659_v50  ;;  %v780_v59 = vadd.f32 %v776_v52, %v672_v43  ;;  %v654_v60 = vpop.permute.xlu1 %653  ;;  %v733_v62 = vadd.f32 %v729_v51, %v672_v43 }
  0xe6   : > { %v649_v2 = vpop.permute.xlu0 %648  ;;  %v662_v7 = vmul.f32 %v654_v60, %v634_v53  ;;  %v663_v8 = vmul.f32 %v654_v60, %v635_v54  ;;  %v731_v9 = vmul.f32 %v727_v55, %v654_v60  ;;  %v778_v10 = vmul.f32 %v774_v56, %v654_v60 }
  0xe7   : > { %v2283_v11 = vpack.c.bf16 %v686_v57, %v684_v63  ;;  %v2285_v12 = vpack.c.bf16 %v687_v58, %v685_v0  ;;  %v2287_v13 = vpack.c.bf16 %v733_v62, %v732_v6  ;;  %v2289_v14 = vpack.c.bf16 %v780_v59, %v779_v1 }
  0xe8   : > { %v660_v15 = vmul.f32 %v649_v2, %v632_v61  ;;  %v661_v17 = vmul.f32 %v649_v2, %v633_v3  ;;  %v730_v18 = vmul.f32 %v726_v4, %v649_v2  ;;  %v777_v19 = vmul.f32 %v773_v5, %v649_v2 }
  0xe9   : > { %v682_v20 = vpop.permute.xlu1 %681  ;;  %v696_v30 = vsub.bf16 0, %v2283_v11  ;;  %v697_v31 = vsub.bf16 0, %v2285_v12  ;;  %v738_v32 = vsub.bf16 0, %v2287_v13  ;;  %v785_v33 = vsub.bf16 0, %v2289_v14 }
  0xea   : > { %v690_v21 = vadd.f32 %v682_v20, %v662_v7  ;;  %v691_v22 = vadd.f32 %v682_v20, %v663_v8  ;;  %v735_v23 = vadd.f32 %v731_v9, %v682_v20  ;;  %v782_v24 = vadd.f32 %v778_v10, %v682_v20  ;;  %v677_v25 = vpop.permute.xlu0 %676 }
  0xeb   : > { %v688_v26 = vadd.f32 %v677_v25, %v660_v15  ;;  %v689_v27 = vadd.f32 %v677_v25, %v661_v17  ;;  %v734_v28 = vadd.f32 %v730_v18, %v677_v25  ;;  %v781_v29 = vadd.f32 %v777_v19, %v677_v25 }
  0xec   : > { %v701_v38 = vmul.bf16 1069105081, %v696_v30  ;;  %v704_v39 = vmul.bf16 1069105081, %v697_v31  ;;  %v741_v40 = vmul.bf16 1069105081, %v738_v32  ;;  %v767_v7 = vstv %s766_s25 }
  0xed   : > { %v2300_v34 = vpack.c.bf16 %v782_v24, %v781_v29  ;;  %v2302_v35 = vpack.c.bf16 %v735_v23, %v734_v28  ;;  %v2304_v36 = vpack.c.bf16 %v690_v21, %v688_v26  ;;  %v2306_v37 = vpack.c.bf16 %v691_v22, %v689_v27  ;;  %v1868_v23 = vld [vmem:[%s2673_s20 + $0x20] sm:$0xff]   ;;  %v1870_v27 = vld [vmem:[%s2673_s20 + $0x28] sm:$0xff]   ;;  %v1873_v30 = vld [vmem:[%s2673_s20 + $0x10] sm:$0xff]  }
  0xee   : > { %1880 = vpow.bf16 %v701_v38  ;;  %v788_v49 = vmul.bf16 1069105081, %v785_v33  ;;  %v814_v22 = vstv %s813_s28  ;;  %v1869_v26 = vld [vmem:[%s2673_s20] sm:$0xff]   ;;  %v1871_v28 = vld [vmem:[%s2673_s20 + $0x8] sm:$0xff]   ;;  %v1875_v32 = vld [vmem:[%s2673_s20 + $0x18] sm:$0xff]  }
  0xef   : > { %v786_v41 = vsub.bf16 0, %v2300_v34  ;;  %v739_v42 = vsub.bf16 0, %v2302_v35  ;;  %v698_v43 = vsub.bf16 0, %v2304_v36  ;;  %v699_v44 = vsub.bf16 0, %v2306_v37  ;;  %v1872_v29 = vld [vmem:[%s2673_s20 + $0x40] sm:$0xff]   ;;  %v1874_v31 = vld [vmem:[%s2673_s20 + $0x48] sm:$0xff]  }
  0xf0   : > { %1882 = vpow.bf16 %v704_v39  ;;  %v1876_v33 = vld [vmem:[%s2673_s20 + $0x50] sm:$0xff]  }
  0xf1   : > { %v791_v45 = vmul.bf16 1069105081, %v786_v41  ;;  %v744_v46 = vmul.bf16 1069105081, %v739_v42  ;;  %v707_v47 = vmul.bf16 1069105081, %v698_v43  ;;  %1884 = vpow.bf16 %v741_v40 }
  0xf2   : > { %v710_v48 = vmul.bf16 1069105081, %v699_v44 }
  0xf3   : > { %1886 = vpow.bf16 %v791_v45 }
  0xf4   : > { %1888 = vpow.bf16 %v744_v46 }
  0xf5   : > { %1890 = vpow.bf16 %v707_v47  ;;  %v1187_v47 = vpop.permute.xlu0 %1186 }
  0xf6   : > { %1892 = vpow.bf16 %v710_v48 }
  0xf7   : > { %1894 = vpow.bf16 %v788_v49 }
  0xf9   : > { %v1881_v50 = vpop.eup %1880 }
  0xfa   : > { %v712_v52 = vadd.bf16 1065369472, %v1881_v50 }
  0xfb   : > { %v1883_v51 = vpop.eup %1882 }
  0xfc   : > { %v1885_v53 = vpop.eup %1884  ;;  %v713_v54 = vadd.bf16 1065369472, %v1883_v51  ;;  %1896 = vrcp.bf16 %v712_v52 }
  0xfd   : > { %v746_v56 = vadd.bf16 1065369472, %v1885_v53  ;;  %v1192_v53 = vpop.permute.xlu1 %1191 }
  0xfe   : > { %v1887_v55 = vpop.eup %1886  ;;  %1898 = vrcp.bf16 %v713_v54 }
  0xff   : > { %v1889_v57 = vpop.eup %1888  ;;  %v794_v58 = vadd.bf16 1065369472, %v1887_v55  ;;  %1900 = vrcp.bf16 %v746_v56 }
 0x100   : > { %v1891_v59 = vpop.eup %1890  ;;  %v747_v60 = vadd.bf16 1065369472, %v1889_v57 }
 0x101   : > { %v1893_v61 = vpop.eup %1892  ;;  %1902 = vrcp.bf16 %v794_v58  ;;  %v714_v62 = vadd.bf16 1065369472, %v1891_v59 }
 0x102   : > { %v1895_v63 = vpop.eup %1894  ;;  %1904 = vrcp.bf16 %v747_v60  ;;  %v715_v0 = vadd.bf16 1065369472, %v1893_v61  ;;  %v1197_v61 = vpop.permute.xlu0 %1196 }
 0x103   : > { %1906 = vrcp.bf16 %v714_v62  ;;  %v793_v1 = vadd.bf16 1065369472, %v1895_v63 }
 0x104   : > { %1908 = vrcp.bf16 %v715_v0 }
 0x105   : > { %1910 = vrcp.bf16 %v793_v1 }
 0x107   : > { %v1897_v2 = vpop.eup %1896 }
 0x108   : > { %v717_v4 = vmul.bf16 %v1897_v2, %v2283_v11 }
 0x109   : > { %v1899_v3 = vpop.eup %1898 }
 0x10a   : > { %v1901_v5 = vpop.eup %1900  ;;  %v719_v6 = vmul.bf16 %v1899_v3, %v2285_v12  ;;  %868 = vmatprep.subr.bf16.mxu1 %v717_v4  ;;  %v1202_v3 = vpop.permute.xlu1 %1201 }
 0x10b   : > { %v749_v9 = vmul.bf16 %v1901_v5, %v2287_v13 }
 0x10c   : > { %v1903_v8 = vpop.eup %1902  ;;  %973 = vmatprep.subr.bf16.mxu0 %v719_v6 }
 0x10d   : > { %v1905_v10 = vpop.eup %1904  ;;  %974 = vmatpush1.bf16.msra.mxu0 %v717_v4  ;;  %v769_v18 = vmul.bf16 %v767_v7, %v749_v9  ;;  %v798_v24 = vmul.bf16 %v1903_v8, %v2300_v34  ;;  %v1877_v34 = vld [vmem:[%s2673_s20 + $0x30] sm:$0xff]   ;;  %v1207_v8 = vpop.permute.xlu0 %1206 }
 0x10e   : > { %v1907_v15 = vpop.eup %1906  ;;  %v751_v17 = vmul.bf16 %v1905_v10, %v2302_v35  ;;  %v1878_v35 = vld [vmem:[%s2673_s20 + $0x58] sm:$0xff]  }
 0x10f   : > { %v1909_v19 = vpop.eup %1908  ;;  %v721_v11 = vmul.bf16 %v1907_v15, %v2304_v36  ;;  %869 = vmatpush1.bf16.msra.mxu1 %v769_v18  ;;  %v1879_v36 = vld [vmem:[%s2673_s20 + $0x38] sm:$0xff]  }
 0x110   : > { %v1911_v20 = vpop.eup %1910  ;;  %v770_v21 = vmul.bf16 %v767_v7, %v751_v17  ;;  %v723_v12 = vmul.bf16 %v1909_v19, %v2306_v37 }
 0x111   : > { %870 = vmatprep.subr.bf16.mxu1 %v721_v11  ;;  %v796_v13 = vmul.bf16 %v1911_v20, %v2289_v14  ;;  %v817_v14 = vmul.bf16 %v814_v22, %v798_v24 }
 0x112   : > { %975 = vmatprep.subr.bf16.mxu0 %v723_v12 }
 0x113   : > { %976 = vmatpush1.bf16.msra.mxu0 %v721_v11  ;;  %v816_v25 = vmul.bf16 %v814_v22, %v796_v13  ;;  %871 = vmatpush1.bf16.msra.mxu1 %v770_v21 }
 0x114   : > { %1740 = vmatprep.subr.bf16.mxu1 %v719_v6 }
 0x115   : > { %1087 = vmatprep.subr.bf16.mxu0 %v816_v25 }
 0x116   : > { %1709 = vmatmul.mubr.msk.bf16.vlgmr.msra.gmra.mrb[0].mxu0 %vm855_vm0, %v1868_v23  ;;  %1701 = vmatmul.mubr.msk.bf16.vlgmr.msra.gmra.mrb[0].mxu1 %vm855_vm0, %v1869_v26  ;;  %v1212_v23 = vpop.permute.xlu1 %1211 }
 0x117   : > { %1088 = vmatpush1.bf16.msra.mxu0 %v719_v6  ;;  %1742 = vmatpush1.bf16.msra.mxu1 %v717_v4 }
 0x118   : > { %1089 = vmatprep.subr.bf16.mxu0 %v817_v14  ;;  %1741 = vmatprep.subr.bf16.mxu1 %v723_v12 }
 0x119   : > { %1015 = vmatprep.mubr.bf16.mxu0 %v2000_v16  ;;  %910 = vmatprep.mubr.bf16.mxu1 %v2000_v16 }
 0x11b   : > { %1090 = vmatpush1.bf16.msra.mxu0 %v723_v12  ;;  %1743 = vmatpush1.bf16.msra.mxu1 %v721_v11 }
 0x11e   : > { %1710 = vmatmul.mubr.msk.bf16.gmra.mrb[4].mxu0 %vm855_vm0, %v1870_v27  ;;  %1702 = vmatmul.mubr.msk.bf16.gmra.mrb[4].mxu1 %vm855_vm0, %v1871_v28  ;;  %v1217_v27 = vpop.permute.xlu0 %1216 }
 0x11f   : > { %1119 = vmatprep.mubr.bf16.mxu0 %v2000_v16  ;;  %920 = vmatprep.mubr.bf16.mxu1 %v2000_v16 }
 0x126   : > { %1725 = vmatmul.mubr.msk.bf16.vlgmr.msra.gmra.mrb[0].mxu0 %vm855_vm0, %v1872_v29  ;;  %1703 = vmatmul.mubr.msk.bf16.gmra.mrb[8].mxu1 %vm855_vm0, %v1873_v30 }
 0x127   : > { %1129 = vmatprep.mubr.bf16.mxu0 %v2000_v16  ;;  %930 = vmatprep.mubr.bf16.mxu1 %v2000_v16 }
 0x12e   : > { %1726 = vmatmul.mubr.msk.bf16.gmra.mrb[4].mxu0 %vm855_vm0, %v1874_v31  ;;  %1704 = vmatmul.mubr.msk.bf16.gmra.mrb[12].mxu1 %vm855_vm0, %v1875_v32 }
 0x12f   : > { %1139 = vmatprep.mubr.bf16.mxu0 %v2000_v16  ;;  %1025 = vmatprep.mubr.bf16.mxu1 %v2000_v16 }
 0x136   : > { %1727 = vmatmul.mubr.msk.bf16.gmra.mrb[8].mxu0 %vm855_vm0, %v1876_v33  ;;  %1711 = vmatmul.mubr.msk.bf16.vlgmr.msra.gmra.mrb[8].mxu1 %vm855_vm0, %v1877_v34 }
 0x137   : > { %1149 = vmatprep.mubr.bf16.mxu0 %v2000_v16  ;;  %1035 = vmatprep.mubr.bf16.mxu1 %v2000_v16 }
 0x13e   : > { %1728 = vmatmul.mubr.msk.bf16.gmra.mrb[12].mxu0 %vm855_vm0, %v1878_v35  ;;  %1712 = vmatmul.mubr.msk.bf16.gmra.mrb[12].mxu1 %vm855_vm0, %v1879_v36 }
 0x1e9   : > { %v902_v37 = vpop.f32.mrb[0].mxu1 }
 0x1ea   : > { %v904_v38 = vpop.f32.mrb[1].mxu1 }
 0x1eb   : > { %v906_v39 = vpop.f32.mrb[2].mxu1 }
 0x1ec   : > { %v908_v40 = vpop.f32.mrb[3].mxu1 }
 0x1f1   : > { %v912_v41 = vpop.f32.mrb[4].mxu1 }
 0x1f2   : > { %v914_v42 = vpop.f32.mrb[5].mxu1 }
 0x1f3   : > { %v916_v43 = vpop.f32.mrb[6].mxu1 }
 0x1f4   : > { %v918_v16 = vpop.f32.mrb[7].mxu1 }
 0x1f9   : > { %v1121_v44 = vpop.f32.mrb[0].mxu0 }
 0x1fa   : > { %v1744_v45 = vadd.f32 %v1121_v44, %v902_v37  ;;  %v1123_v46 = vpop.f32.mrb[1].mxu0  ;;  %v2001_v44 = vmov (!%p1729_p13), 0.0  }
 0x1fb   : > { %v1745_v48 = vadd.f32 %v1123_v46, %v904_v38  ;;  %v1125_v49 = vpop.f32.mrb[2].mxu0  ;;  %1261 = vst.msk [vmem:[%s2219_s7] sm:$0xff] (!%p1729_p13), %vm1260_vm1, %v2001_v44  ;;  %1262 = vst.msk [vmem:[%s2219_s7 + $0x8] sm:$0xff] (!%p1729_p13), %vm1260_vm1, %v2001_v44 }
 0x1fc   : > { %v2393_v50 = vadd.f32 %v1744_v45, %v1187_v47  ;;  %v1746_v51 = vadd.f32 %v1125_v49, %v906_v39  ;;  %v1127_v52 = vpop.f32.mrb[3].mxu0  ;;  %1263 = vst.msk [vmem:[%s2219_s7 + $0x10] sm:$0xff] (!%p1729_p13), %vm1260_vm1, %v2001_v44  ;;  %1264 = vst.msk [vmem:[%s2219_s7 + $0x18] sm:$0xff] (!%p1729_p13), %vm1260_vm1, %v2001_v44 }
 0x1fd   : > { %v2395_v54 = vadd.f32 %v1745_v48, %v1187_v47  ;;  %v1747_v55 = vadd.f32 %v1127_v52, %v908_v40  ;;  %v1222_v40 = vpop.permute.xlu1 %1221  ;;  %1265 = vst.msk [vmem:[%s2219_s7 + $0x20] sm:$0xff] (!%p1729_p13), %vm1260_vm1, %v2001_v44  ;;  %1266 = vst.msk [vmem:[%s2219_s7 + $0x28] sm:$0xff] (!%p1729_p13), %vm1260_vm1, %v2001_v44 }
 0x1fe   : > { %1240 = vst [vmem:[%s2397_s30] sm:$0xff] %v2393_v50  ;;  %v2401_v56 = vadd.f32 %v1746_v51, %v1192_v53  ;;  %1267 = vst.msk [vmem:[%s2219_s7 + $0x30] sm:$0xff] (!%p1729_p13), %vm1260_vm1, %v2001_v44 }
 0x1ff   : > { %1241 = vst [vmem:[%s2397_s30 + $0x8] sm:$0xff] %v2395_v54  ;;  %v2405_v57 = vadd.f32 %v1747_v55, %v1192_v53  ;;  %1268 = vst.msk [vmem:[%s2219_s7 + $0x38] sm:$0xff] (!%p1729_p13), %vm1260_vm1, %v2001_v44 }
 0x200   : > { %1242 = vst [vmem:[%s2397_s30 + $0x10] sm:$0xff] %v2401_v56  ;;  %1269 = vst.msk [vmem:[%s2224_s11] sm:$0xff] (!%p1729_p13), %vm1260_vm1, %v2001_v44 }
 0x201   : > { %1243 = vst [vmem:[%s2397_s30 + $0x18] sm:$0xff] %v2405_v57  ;;  %v1131_v58 = vpop.f32.mrb[4].mxu0  ;;  %1270 = vst.msk [vmem:[%s2224_s11 + $0x8] sm:$0xff] (!%p1729_p13), %vm1260_vm1, %v2001_v44 }
 0x202   : > { %v1748_v59 = vadd.f32 %v1131_v58, %v912_v41  ;;  %v1133_v60 = vpop.f32.mrb[5].mxu0  ;;  %1271 = vst.msk [vmem:[%s2224_s11 + $0x10] sm:$0xff] (!%p1729_p13), %vm1260_vm1, %v2001_v44  ;;  %1272 = vst.msk [vmem:[%s2224_s11 + $0x18] sm:$0xff] (!%p1729_p13), %vm1260_vm1, %v2001_v44 }
 0x203   : > { %v1749_v62 = vadd.f32 %v1133_v60, %v914_v42  ;;  %v1135_v63 = vpop.f32.mrb[6].mxu0  ;;  %1273 = vst.msk [vmem:[%s2224_s11 + $0x20] sm:$0xff] (!%p1729_p13), %vm1260_vm1, %v2001_v44  ;;  %1274 = vst.msk [vmem:[%s2224_s11 + $0x28] sm:$0xff] (!%p1729_p13), %vm1260_vm1, %v2001_v44 }
 0x204   : > { %v2411_v0 = vadd.f32 %v1748_v59, %v1197_v61  ;;  %v1750_v1 = vadd.f32 %v1135_v63, %v916_v43  ;;  %v1137_v2 = vpop.f32.mrb[7].mxu0  ;;  %1275 = vst.msk [vmem:[%s2224_s11 + $0x30] sm:$0xff] (!%p1729_p13), %vm1260_vm1, %v2001_v44  ;;  %1276 = vst.msk [vmem:[%s2224_s11 + $0x38] sm:$0xff] (!%p1729_p13), %vm1260_vm1, %v2001_v44 }
 0x205   : > { %v2413_v4 = vadd.f32 %v1749_v62, %v1197_v61  ;;  %v1751_v5 = vadd.f32 %v1137_v2, %v918_v16 }
 0x206   : > { %1244 = vst [vmem:[%s2397_s30 + $0x20] sm:$0xff] %v2411_v0  ;;  %v2417_v6 = vadd.f32 %v1750_v1, %v1202_v3 }
 0x207   : > { %1245 = vst [vmem:[%s2397_s30 + $0x28] sm:$0xff] %v2413_v4  ;;  %v2421_v7 = vadd.f32 %v1751_v5, %v1202_v3 }
 0x208   : > { %1246 = vst [vmem:[%s2397_s30 + $0x30] sm:$0xff] %v2417_v6 }
 0x209   : > { %1247 = vst [vmem:[%s2397_s30 + $0x38] sm:$0xff] %v2421_v7  ;;  %v1141_v9 = vpop.f32.mrb[8].mxu0  ;;  %v1027_v10 = vpop.f32.mrb[8].mxu1 }
 0x20a   : > { %v1143_v15 = vpop.f32.mrb[9].mxu0  ;;  %v1752_v17 = vadd.f32 %v1141_v9, %v1027_v10  ;;  %v1029_v18 = vpop.f32.mrb[9].mxu1 }
 0x20b   : > { %v1145_v19 = vpop.f32.mrb[10].mxu0  ;;  %v1753_v11 = vadd.f32 %v1143_v15, %v1029_v18  ;;  %v1031_v20 = vpop.f32.mrb[10].mxu1 }
 0x20c   : > { %v1147_v21 = vpop.f32.mrb[11].mxu0  ;;  %v2427_v12 = vadd.f32 %v1752_v17, %v1207_v8  ;;  %v1754_v22 = vadd.f32 %v1145_v19, %v1031_v20  ;;  %v1033_v13 = vpop.f32.mrb[11].mxu1 }
 0x20d   : > { %v2429_v24 = vadd.f32 %v1753_v11, %v1207_v8  ;;  %v1755_v25 = vadd.f32 %v1147_v21, %v1033_v13 }
 0x20e   : > { %1248 = vst [vmem:[%s2397_s30 + $0x40] sm:$0xff] %v2427_v12  ;;  %v2433_v26 = vadd.f32 %v1754_v22, %v1212_v23 }
 0x20f   : > { %1249 = vst [vmem:[%s2397_s30 + $0x48] sm:$0xff] %v2429_v24  ;;  %v2437_v14 = vadd.f32 %v1755_v25, %v1212_v23 }
 0x210   : > { %1250 = vst [vmem:[%s2397_s30 + $0x50] sm:$0xff] %v2433_v26 }
 0x211   : > { %v1151_v28 = vpop.f32.mrb[12].mxu0  ;;  %1251 = vst [vmem:[%s2397_s30 + $0x58] sm:$0xff] %v2437_v14  ;;  %v1037_v29 = vpop.f32.mrb[12].mxu1 }
 0x212   : > { %v1153_v30 = vpop.f32.mrb[13].mxu0  ;;  %v1756_v31 = vadd.f32 %v1151_v28, %v1037_v29  ;;  %v1039_v32 = vpop.f32.mrb[13].mxu1 }
 0x213   : > { %v1155_v33 = vpop.f32.mrb[14].mxu0  ;;  %v1757_v34 = vadd.f32 %v1153_v30, %v1039_v32  ;;  %v1041_v35 = vpop.f32.mrb[14].mxu1  ;;  %1259 = sbr.rel (%p1729_p13) target bundleno = 538 (0x21a), region = 151 }
 0x214   : > { %v1157_v36 = vpop.f32.mrb[15].mxu0  ;;  %v2443_v37 = vadd.f32 %v1756_v31, %v1217_v27  ;;  %v1758_v38 = vadd.f32 %v1155_v33, %v1041_v35  ;;  %v1043_v39 = vpop.f32.mrb[15].mxu1 }
 0x215   : > { %v2445_v41 = vadd.f32 %v1757_v34, %v1217_v27  ;;  %v1759_v42 = vadd.f32 %v1157_v36, %v1043_v39 }
 0x216   : > { %1252 = vst [vmem:[%s2397_s30 + $0x60] sm:$0xff] %v2443_v37  ;;  %v1238_v43 = vadd.f32 %v1758_v38, %v1222_v40 }
 0x217   : > { %1253 = vst [vmem:[%s2397_s30 + $0x68] sm:$0xff] %v2445_v41  ;;  %v1239_v16 = vadd.f32 %v1759_v42, %v1222_v40 }
 0x218   : > { %1254 = vst [vmem:[%s2397_s30 + $0x70] sm:$0xff] %v1238_v43 }
 0x219   : > { %1255 = vst [vmem:[%s2397_s30 + $0x78] sm:$0xff] %v1239_v16 }
 0x21a PF: > { %v1291_v45 = vadd.f32 %v2413_v4, %v2411_v0  ;;  %v1285_v46 = vadd.f32 %v2395_v54, %v2393_v50  ;;  %v1294_v47 = vadd.f32 %v2421_v7, %v2417_v6  ;;  %v1288_v48 = vadd.f32 %v2405_v57, %v2401_v56  ;;  %v1279_v18 = vld [vmem:[%s2219_s7 + $0x10] sm:$0xff]  ;;  %v1277_v19 = vld [vmem:[%s2219_s7] sm:$0xff]  ;;  %v1280_v22 = vld [vmem:[%s2219_s7 + $0x18] sm:$0xff]  ;;  %s2675_s21 = sld [smem:[#allocation9_spill]] (%p2171_p5)  ;;  %s1732_s15 = sshll.u32 (%p2171_p5), %s1986_s16, 6 }
 0x21b   : > { %v1300_v49 = vadd.f32 %v2437_v14, %v2433_v26  ;;  %v1297_v51 = vadd.f32 %v2429_v24, %v2427_v12  ;;  %v1306_v52 = vadd.f32 %v1239_v16, %v1238_v43  ;;  %v1303_v53 = vadd.f32 %v2445_v41, %v2443_v37  ;;  %v1278_v13 = vld [vmem:[%s2219_s7 + $0x8] sm:$0xff]  ;;  %v1281_v27 = vld [vmem:[%s2219_s7 + $0x20] sm:$0xff]  ;;  %v1284_v32 = vld [vmem:[%s2219_s7 + $0x38] sm:$0xff]  ;;  %s2676_s28 = sld [smem:[#allocation17_spill]] (%p2171_p5) }
 0x21c   : > { %1292 = vadd.xlane.f32.xlu1 %v1291_v45  ;;  %1286 = vadd.xlane.f32.xlu0 %v1285_v46  ;;  %v1336_v55 = vmul.f32 %v2401_v56, %v2401_v56  ;;  %v1337_v58 = vmul.f32 %v2405_v57, %v2405_v57  ;;  %v1334_v59 = vmul.f32 %v2393_v50, %v2393_v50  ;;  %vm1317_vm2 = vcmask 7168   ;;  %v1283_v33 = vld [vmem:[%s2219_s7 + $0x30] sm:$0xff]  ;;  %v1327_v38 = vld [vmem:[%s2224_s11 + $0x8] sm:$0xff]  ;;  %v1326_v39 = vld [vmem:[%s2224_s11] sm:$0xff] }
 0x21d   : > { %v1335_v60 = vmul.f32 %v2395_v54, %v2395_v54  ;;  %v1340_v61 = vmul.f32 %v2417_v6, %v2417_v6  ;;  %v1341_v62 = vmul.f32 %v2421_v7, %v2421_v7  ;;  %v1338_v56 = vmul.f32 %v2411_v0, %v2411_v0  ;;  %v1328_v44 = vld [vmem:[%s2224_s11 + $0x10] sm:$0xff] }
 0x21e   : > { %v1353_v63 = vadd.f32 %v1337_v58, %v1336_v55  ;;  %v1339_v57 = vmul.f32 %v2413_v4, %v2413_v4  ;;  %v1344_v50 = vmul.f32 %v2433_v26, %v2433_v26  ;;  %v1345_v54 = vmul.f32 %v2437_v14, %v2437_v14  ;;  %v1282_v14 = vld [vmem:[%s2219_s7 + $0x28] sm:$0xff] }
 0x21f   : > { %v1350_v1 = vadd.f32 %v1335_v60, %v1334_v59  ;;  %v1342_v2 = vmul.f32 %v2427_v12, %v2427_v12  ;;  %v1343_v3 = vmul.f32 %v2429_v24, %v2429_v24  ;;  %v1359_v0 = vadd.f32 %v1341_v62, %v1340_v61  ;;  %v1333_v59 = vld [vmem:[%s2224_s11 + $0x38] sm:$0xff]  ;;  %v1332_v60 = vld [vmem:[%s2224_s11 + $0x30] sm:$0xff] }
 0x220   : > { %1295 = vadd.xlane.f32.xlu1 %v1294_v47  ;;  %1289 = vadd.xlane.f32.xlu0 %v1288_v48  ;;  %v1356_v5 = vadd.f32 %v1339_v57, %v1338_v56  ;;  %v1365_v6 = vadd.f32 %v1345_v54, %v1344_v50  ;;  %v1348_v7 = vmul.f32 %v1238_v43, %v1238_v43  ;;  %s1731_s29 = sshll.u32 (%p2171_p5), %s2675_s21, 1  ;;  %v1426_v57 = vld [vmem:[%s2397_s30 + $0x8] sm:$0xff] (%p2171_p5)  ;;  %v1428_v50 = vld [vmem:[%s2397_s30 + $0x10] sm:$0xff] (%p2171_p5)  ;;  %v1430_v54 = vld [vmem:[%s2397_s30 + $0x18] sm:$0xff] (%p2171_p5) }
 0x221   : > { %v1362_v4 = vadd.f32 %v1343_v3, %v1342_v2  ;;  %v1349_v8 = vmul.f32 %v1239_v16, %v1239_v16  ;;  %v1346_v9 = vmul.f32 %v2443_v37, %v2443_v37  ;;  %v1347_v10 = vmul.f32 %v2445_v41, %v2445_v41  ;;  %v1329_v16 = vld [vmem:[%s2224_s11 + $0x18] sm:$0xff]  ;;  %v1432_v2 = vld [vmem:[%s2397_s30 + $0x20] sm:$0xff] (%p2171_p5)  ;;  %v1434_v3 = vld [vmem:[%s2397_s30 + $0x28] sm:$0xff] (%p2171_p5) }
 0x223   : > { %v1371_v15 = vadd.f32 %v1349_v8, %v1348_v7  ;;  %v1368_v17 = vadd.f32 %v1347_v10, %v1346_v9  ;;  %v1444_v7 = vld [vmem:[%s2397_s30 + $0x50] sm:$0xff] (%p2171_p5)  ;;  %v1446_v8 = vld [vmem:[%s2397_s30 + $0x58] sm:$0xff] (%p2171_p5)  ;;  %v1448_v9 = vld [vmem:[%s2397_s30 + $0x60] sm:$0xff] (%p2171_p5) }
 0x224   : > { %1301 = vadd.xlane.f32.xlu1 %v1300_v49  ;;  %1298 = vadd.xlane.f32.xlu0 %v1297_v51  ;;  %v1331_v49 = vld [vmem:[%s2224_s11 + $0x28] sm:$0xff]  ;;  %v1330_v51 = vld [vmem:[%s2224_s11 + $0x20] sm:$0xff] }
 0x225   : > { %v1450_v10 = vld [vmem:[%s2397_s30 + $0x68] sm:$0xff] (%p2171_p5) }
 0x228   : > { %1307 = vadd.xlane.f32.xlu1 %v1306_v52  ;;  %1304 = vadd.xlane.f32.xlu0 %v1303_v53 }
 0x22c   : > { %1354 = vadd.xlane.f32.xlu1 %v1353_v63  ;;  %1351 = vadd.xlane.f32.xlu0 %v1350_v1  ;;  %v1424_v1 = vld [vmem:[%s2397_s30] sm:$0xff] (%p2171_p5) }
 0x230   : > { %1360 = vadd.xlane.f32.xlu1 %v1359_v0  ;;  %1357 = vadd.xlane.f32.xlu0 %v1356_v5  ;;  %v1436_v0 = vld [vmem:[%s2397_s30 + $0x30] sm:$0xff] (%p2171_p5)  ;;  %v1438_v5 = vld [vmem:[%s2397_s30 + $0x38] sm:$0xff] (%p2171_p5) }
 0x234   : > { %1366 = vadd.xlane.f32.xlu1 %v1365_v6  ;;  %1363 = vadd.xlane.f32.xlu0 %v1362_v4  ;;  %v1440_v6 = vld [vmem:[%s2397_s30 + $0x40] sm:$0xff] (%p2171_p5)  ;;  %v1442_v4 = vld [vmem:[%s2397_s30 + $0x48] sm:$0xff] (%p2171_p5) }
 0x238   : > { %1372 = vadd.xlane.f32.xlu1 %v1371_v15  ;;  %1369 = vadd.xlane.f32.xlu0 %v1368_v17  ;;  %v1452_v15 = vld [vmem:[%s2397_s30 + $0x70] sm:$0xff] (%p2171_p5)  ;;  %v1454_v17 = vld [vmem:[%s2397_s30 + $0x78] sm:$0xff] (%p2171_p5) }
 0x2a9   : > { %v1293_v11 = vpop.xlane.xlu1 %1292  ;;  %v1287_v20 = vpop.xlane.xlu0 %1286 }
 0x2aa   : > { %v1311_v21 = vadd.f32 %v1293_v11, %v1279_v18  ;;  %v1309_v12 = vadd.f32 %v1287_v20, %v1277_v19 }
 0x2ac   : > { %1320 = vst.msk [vmem:[%s2219_s7 + $0x10] sm:$0xff] %vm1317_vm2, %v1311_v21  ;;  %1318 = vst.msk [vmem:[%s2219_s7] sm:$0xff] %vm1317_vm2, %v1309_v12 }
 0x2ad   : > { %v1296_v23 = vpop.xlane.xlu1 %1295  ;;  %v1290_v24 = vpop.xlane.xlu0 %1289 }
 0x2ae   : > { %v1312_v25 = vadd.f32 %v1296_v23, %v1280_v22  ;;  %v1310_v26 = vadd.f32 %v1290_v24, %v1278_v13 }
 0x2b0   : > { %1321 = vst.msk [vmem:[%s2219_s7 + $0x18] sm:$0xff] %vm1317_vm2, %v1312_v25  ;;  %1319 = vst.msk [vmem:[%s2219_s7 + $0x8] sm:$0xff] %vm1317_vm2, %v1310_v26 }
 0x2b1   : > { %v1302_v28 = vpop.xlane.xlu1 %1301  ;;  %v1299_v29 = vpop.xlane.xlu0 %1298 }
 0x2b2   : > { %v1314_v30 = vadd.f32 %v1302_v28, %v1282_v14  ;;  %v1313_v31 = vadd.f32 %v1299_v29, %v1281_v27 }
 0x2b4   : > { %1323 = vst.msk [vmem:[%s2219_s7 + $0x28] sm:$0xff] %vm1317_vm2, %v1314_v30  ;;  %1322 = vst.msk [vmem:[%s2219_s7 + $0x20] sm:$0xff] %vm1317_vm2, %v1313_v31 }
 0x2b5   : > { %v1308_v34 = vpop.xlane.xlu1 %1307  ;;  %v1305_v35 = vpop.xlane.xlu0 %1304 }
 0x2b6   : > { %v1316_v36 = vadd.f32 %v1308_v34, %v1284_v32  ;;  %v1315_v37 = vadd.f32 %v1305_v35, %v1283_v33 }
 0x2b8   : > { %1325 = vst.msk [vmem:[%s2219_s7 + $0x38] sm:$0xff] %vm1317_vm2, %v1316_v36  ;;  %1324 = vst.msk [vmem:[%s2219_s7 + $0x30] sm:$0xff] %vm1317_vm2, %v1315_v37 }
 0x2b9   : > { %v1355_v40 = vpop.xlane.xlu1 %1354  ;;  %v1352_v41 = vpop.xlane.xlu0 %1351 }
 0x2ba   : > { %v1375_v42 = vadd.f32 %v1355_v40, %v1327_v38  ;;  %v1374_v43 = vadd.f32 %v1352_v41, %v1326_v39 }
 0x2bc   : > { %1383 = vst.msk [vmem:[%s2224_s11 + $0x8] sm:$0xff] %vm1317_vm2, %v1375_v42  ;;  %1382 = vst.msk [vmem:[%s2224_s11] sm:$0xff] %vm1317_vm2, %v1374_v43 }
 0x2bd   : > { %v1361_v45 = vpop.xlane.xlu1 %1360  ;;  %v1358_v46 = vpop.xlane.xlu0 %1357 }
 0x2be   : > { %v1377_v47 = vadd.f32 %v1361_v45, %v1329_v16  ;;  %v1376_v48 = vadd.f32 %v1358_v46, %v1328_v44 }
 0x2c0   : > { %1385 = vst.msk [vmem:[%s2224_s11 + $0x18] sm:$0xff] %vm1317_vm2, %v1377_v47  ;;  %1384 = vst.msk [vmem:[%s2224_s11 + $0x10] sm:$0xff] %vm1317_vm2, %v1376_v48 }
 0x2c1   : > { %v1367_v52 = vpop.xlane.xlu1 %1366  ;;  %v1364_v53 = vpop.xlane.xlu0 %1363 }
 0x2c2   : > { %v1379_v55 = vadd.f32 %v1367_v52, %v1331_v49  ;;  %v1378_v58 = vadd.f32 %v1364_v53, %v1330_v51  ;;  %1406 = sbr.rel (!%p2171_p5) target bundleno = 723 (0x2d3), region = 155 }
 0x2c4   : > { %1387 = vst.msk [vmem:[%s2224_s11 + $0x28] sm:$0xff] %vm1317_vm2, %v1379_v55  ;;  %1386 = vst.msk [vmem:[%s2224_s11 + $0x20] sm:$0xff] %vm1317_vm2, %v1378_v58 }
 0x2c5   : > { %v1373_v61 = vpop.xlane.xlu1 %1372  ;;  %v1370_v62 = vpop.xlane.xlu0 %1369 }
 0x2c6   : > { %v1381_v56 = vadd.f32 %v1373_v61, %v1333_v59  ;;  %v1380_v63 = vadd.f32 %v1370_v62, %v1332_v60 }
 0x2c8   : > { %1389 = vst.msk [vmem:[%s2224_s11 + $0x38] sm:$0xff] %vm1317_vm2, %v1381_v56  ;;  %1388 = vst.msk [vmem:[%s2224_s11 + $0x30] sm:$0xff] %vm1317_vm2, %v1380_v63  ;;  %s1409_s11 = sadd.s32 (%p2171_p5), %s1732_s15, %s1731_s29 }
 0x2c9   : > { %s1733_s13 = sshll.u32 %s1409_s11, 3 }
 0x2ca   : > { %s1411_s22 = scalar_lea.vmem %s2676_s28, %s1733_s13 }
 0x2cb   : > { %1425 = vst [vmem:[%s1411_s22] sm:$0xff] %v1424_v1  ;;  %1427 = vst [vmem:[%s1411_s22 + $0x8] sm:$0xff] %v1426_v57 }
 0x2cc   : > { %1429 = vst [vmem:[%s1411_s22 + $0x40] sm:$0xff] %v1428_v50  ;;  %1431 = vst [vmem:[%s1411_s22 + $0x48] sm:$0xff] %v1430_v54 }
 0x2cd   : > { %1433 = vst [vmem:[%s1411_s22 + $0x80] sm:$0xff] %v1432_v2  ;;  %1435 = vst [vmem:[%s1411_s22 + $0x88] sm:$0xff] %v1434_v3 }
 0x2ce   : > { %1437 = vst [vmem:[%s1411_s22 + $0xc0] sm:$0xff] %v1436_v0  ;;  %1439 = vst [vmem:[%s1411_s22 + $0xc8] sm:$0xff] %v1438_v5 }
 0x2cf   : > { %1441 = vst [vmem:[%s1411_s22 + $0x100] sm:$0xff] %v1440_v6  ;;  %1443 = vst [vmem:[%s1411_s22 + $0x108] sm:$0xff] %v1442_v4 }
 0x2d0   : > { %1445 = vst [vmem:[%s1411_s22 + $0x140] sm:$0xff] %v1444_v7  ;;  %1447 = vst [vmem:[%s1411_s22 + $0x148] sm:$0xff] %v1446_v8 }
 0x2d1   : > { %1449 = vst [vmem:[%s1411_s22 + $0x180] sm:$0xff] %v1448_v9  ;;  %1451 = vst [vmem:[%s1411_s22 + $0x188] sm:$0xff] %v1450_v10 }
 0x2d2   : > { %1453 = vst [vmem:[%s1411_s22 + $0x1c0] sm:$0xff] %v1452_v15  ;;  %1455 = vst [vmem:[%s1411_s22 + $0x1c8] sm:$0xff] %v1454_v17 }
 0x2d3 PF: > { %s20_s19 = sadd.s32 1, %s1998_s19   ;;  %s2677_s16 = sld [smem:[#allocation14_spill]] }
 0x2d4   : > { %p17_p0 = scmp.ge.s32.totalorder %s20_s19, 10   ;;  %s2678_s24 = sld [smem:[#allocation13_spill]] }
 0x2d5   : > { %s2679_s15 = sld [smem:[#allocation10_spill]]  ;;  %s2680_s27 = sld [smem:[#allocation11_spill]] }
 0x2d6   : > { %s2681_s23 = sld [smem:[#allocation12_spill]]  ;;  %s2682_s30 = smov %s1962_s10 }
 0x2d7   : > { %s2683_s10 = smov %s2178_s17  ;;  %s2684_s11 = smov %s1970_s12 }
 0x2d8   : > { %s2686_s13 = smov %s1978_s14  ;;  %19 = sbr.rel (!%p17_p0) target bundleno = 9 (0x9), region = 257 }
 0x2d9   : > { %s2685_s12 = smov %s2677_s16  ;;  %s2688_s16 = smov %s1994_s18 }
 0x2da   : > { %s2687_s14 = smov %s2678_s24 }
 0x2db   : > { %s2689_s17 = smov %s2680_s27 }
 0x2dc   : > { %s2690_s18 = smov %s2681_s23 }

// kernel: temporal_resnet_block.5
= control target key start
LH: loop header
LB: loop body
LE: loop exit
PB: predicated region body
PF: predicated region fallthrough
CT: control target
= control target key end

     0   :  { %s3028_s0 = inlined_call_operand.vmem [shape: f32[2,32,1024], index: 0, kind: input, shape index: {}]   ;;  %s3029_s1 = inlined_call_operand.vmem [shape: f32[2,64,1024], index: 1, kind: input, shape index: {}, may-alias: {1,2,3}]   ;;  %s3030_s2 = inlined_call_operand.vmem [shape: f32[2,64,1024], index: 2, kind: input, shape index: {}, may-alias: {1,2,3}]   ;;  %s3031_s3 = inlined_call_operand.vmem [shape: f32[2,64,1024], index: 3, kind: input, shape index: {}, may-alias: {1,2,3}]   ;;  %s3032_s4 = inlined_call_operand.vmem [shape: f32[2,64,1], index: 4, kind: input, shape index: {}]   ;;  %s3033_s5 = inlined_call_operand.vmem [shape: f32[2,64,1], index: 5, kind: input, shape index: {}]   ;;  %s3034_s6 = inlined_call_operand.vmem [shape: bf16[3,64,64], index: 6, kind: input, shape index: {}]   ;;  %s3035_s7 = inlined_call_operand.vmem [shape: f32[64,1], index: 7, kind: input, shape index: {}]   ;;  %s3036_s8 = inlined_call_operand.vmem [shape: bf16[64,32], index: 8, kind: input, shape index: {}]   ;;  %s3037_s9 = inlined_call_operand.vmem [shape: f32[64,1], index: 9, kind: input, shape index: {}]   ;;  %s3038_s10 = inlined_call_operand.vmem [shape: f32[2,64,1024], index: 10, kind: output, shape index: {}]  }
   0x1   :  { %3049 = sst [smem:[#allocation16_spill]] %s3034_s6 }
   0x2   :  { %3050 = sst [smem:[#allocation17_spill]] %s3035_s7 }
   0x3   :  { %3051 = sst [smem:[#allocation18_spill]] %s3036_s8 }
   0x4   :  { %3052 = sst [smem:[#allocation19_spill]] %s3038_s10 }
   0x5   :  { %s2425_s13 = smov 0   ;;  %s2427_s14 = smov 0  }
   0x6   :  { %s2429_s15 = smov 0   ;;  %s2431_s16 = smov 0  }
   0x7   :  { %s2433_s17 = smov 0   ;;  %s2435_s18 = smov 0  }
   0x8   :  { %s2437_s19 = smov 0   ;;  %s2439_s20 = smov 0  }
   0x9   :  { %s2441_s21 = smov 0   ;;  %s2443_s22 = smov 0  }
   0xa   :  { %s2445_s23 = smov 0  }
   0xb LB: > { %3053 = sst [smem:[#allocation7_spill]] %s2327_s13  ;;  %s29_s25 = sadd.s32 1, %s2359_s21  ;;  %s2367_s23 = sphi %s2445_s23, %s20_s23   ;;  %s2363_s22 = sphi %s2443_s22, %s3090_s22   ;;  %s2359_s21 = sphi %s2441_s21, %s3089_s21   ;;  %s2355_s20 = sphi %s2439_s20, %s3088_s20   ;;  %s2351_s19 = sphi %s2437_s19, %s3087_s19   ;;  %s2347_s18 = sphi %s2435_s18, %s3086_s18   ;;  %s2343_s17 = sphi %s2433_s17, %s3085_s17   ;;  %s2339_s16 = sphi %s2431_s16, %s3084_s16   ;;  %s2335_s15 = sphi %s2429_s15, %s3083_s15   ;;  %s2331_s14 = sphi %s2427_s14, %s3082_s14   ;;  %s2327_s13 = sphi %s2425_s13, %s3081_s13  }
   0xc   : > { %3054 = sst [smem:[#allocation8_spill]] %s2335_s15  ;;  %p30_p0 = scmp.ge.s32.totalorder %s29_s25, 4 }
   0xd   : > { %3055 = sst [smem:[#allocation9_spill]] %s2351_s19  ;;  %s32_s26 = sadd.s32 1, %s2363_s22 }
   0xe   : > { %3056 = sst [smem:[#allocation10_spill]] %s2359_s21  ;;  %s41_s27 = sadd.s32 1, %s2347_s18 }
   0xf   : > { %p48_p1 = scmp.ne.s32.totalorder %s2347_s18, %s2343_s17  ;;  %s3092_s25 = smov (%p30_p0, %s29_s25), 0 }
  0x10   : > { %3057 = sst [smem:[#allocation11_spill]] %s3092_s25  ;;  %s3094_s26 = smov (!%p30_p0, %s32_s26), %s2363_s22 }
  0x11   : > { %s37_s28 = ssub.s32 %s2359_s21, %s3092_s25  ;;  %p49_p2 = scmp.eq.s32.totalorder %s2367_s23, 0 }
  0x12   : > { %p34_p3 = scmp.ge.s32.totalorder %s3094_s26, 2  ;;  %s2493_s29 = sshll.u32 %s2359_s21, 1 }
  0x13   : > { %p2500_p4 = por %p49_p2, %p48_p1  ;;  %s1940_s11 = sadd.s32 4294967295, %s2493_s29 }
  0x14   : > { %s3096_s26 = smov (%p34_p3, %s3094_s26), 0  ;;  %p94_p5 = scmp.gt.s32.totalorder %s1940_s11, 0 }
  0x15   : > { %3059 = sst [smem:[#allocation12_spill]] %s3096_s26  ;;  %s1941_s12 = sshll.u32 %s3092_s25, 1 }
  0x16   : > { %s36_s24 = ssub.s32 %s2363_s22, %s3096_s26  ;;  %s1942_s10 = sadd.s32 4294967295, %s1941_s12 }
  0x17   : > { %s38_s6 = sor.u32 %s37_s28, %s36_s24  ;;  %p98_p6 = scmp.gt.s32.totalorder %s1942_s10, 0 }
  0x18   : > { %p39_p7 = scmp.eq.s32.totalorder %s38_s6, 0  ;;  %s105_s21 = sadd.s32 1, %s2339_s16 }
  0x19   : > { %s3098_s11 = smov (!%p94_p5, %s1940_s11), 0  ;;  %s3100_s10 = smov (!%p98_p6, %s1942_s10), 0 }
  0x1a   : > { %s2514_s19 = scalar_select %p39_p7, %s2347_s18, %s41_s27  }
  0x1b   : > { %p112_p8 = scmp.ne.s32.totalorder %s2339_s16, %s2335_s15  ;;  %s129_s26 = sadd.s32 2, %s2493_s29 }
  0x1c   : > { %3060 = sst [smem:[#allocation13_spill]] %s2514_s19  ;;  %s101_s25 = ssub.s32 %s3098_s11, %s3100_s10 }
  0x1d   : > { %p130_p9 = scmp.lt.s32.totalorder %s129_s26, 7  ;;  %s102_s28 = sor.u32 %s101_s25, %s36_s24 }
  0x1e   : > { %p2522_p10 = por %p112_p8, %p49_p2  ;;  %p103_p11 = scmp.eq.s32.totalorder %s102_s28, 0 }
  0x1f   : > { %s133_s7 = sadd.s32 2, %s1941_s12  ;;  %s3102_s26 = smov (!%p130_p9, %s129_s26), 7 }
  0x20   : > { %s2529_s27 = scalar_select %p103_p11, %s2339_s16, %s105_s21  }
  0x21   : > { %p134_p12 = scmp.lt.s32.totalorder %s133_s7, 7  ;;  %p148_p13 = scmp.ne.s32.totalorder %s2331_s14, %s2327_s13 }
  0x22   : > { %3062 = sst [smem:[#allocation14_spill]] %s2529_s27  ;;  %s3063_s19 = sadd.s32 4294967295, %s2367_s23  }
  0x23   : > { %p316_p0 = scmp.eq.s32.totalorder %s3063_s19, 7  ;;  %s3104_s7 = smov (!%p134_p12, %s133_s7), 7 }
  0x24   : > { %p2537_p3 = por %p148_p13, %p49_p2  ;;  %s137_s12 = ssub.s32 %s3102_s26, %s3104_s7 }
  0x25   : > { %p2544_p5 = por %p316_p0, %p48_p1  ;;  %s138_s28 = sor.u32 %s137_s12, %s36_s24 }
  0x26   : > { %s141_s15 = sadd.s32 1, %s2331_s14  ;;  %p139_p6 = scmp.eq.s32.totalorder %s138_s28, 0 }
  0x27   : > { %s3065_s25 = scalar_select %p2544_p5, 1, 0 }
  0x28   : > { %s2551_s21 = scalar_select %p139_p6, %s2331_s14, %s141_s15  }
  0x29   : > { %3066 = sst [smem:[#allocation15_spill]] %s3065_s25  ;;  %p1946_p7 = scmp.ge.s32.totalorder %s2367_s23, 8 }
  0x2b   : > { %350 = sbr.rel (%p1946_p7) target bundleno = 102 (0x66), region = 32 }
  0x32   : > { %353 = sbr.rel (!%p2500_p4) target bundleno = 60 (0x3c), region = 36  ;;  %s355_s19 = sand.u32 (%p2500_p4), 1, %s2347_s18  }
  0x33   : > { %s1949_s27 = sshll.u32 (%p2500_p4), %s2363_s22, 5  ;;  %s1947_s13 = sshll.u32 (%p2500_p4), %s355_s19, 6 }
  0x34   : > { %s360_s8 = sadd.s32 (%p2500_p4), %s1949_s27, %s2493_s29  ;;  %s357_s15 = scalar_lea.vmem (%p2500_p4), [#allocation2], %s1947_s13 }
  0x35   : > { %s1950_s25 = sshll.u32 (%p2500_p4), %s360_s8, 3 }
  0x36   : > { %s362_s12 = scalar_lea.vmem (%p2500_p4), %s3028_s0, %s1950_s25 }
  0x37   : > { %v375_v0 = vld [vmem:[%s362_s12] sm:$0xff] (%p2500_p4)  ;;  %v377_v1 = vld [vmem:[%s362_s12 + $0x8] sm:$0xff] (%p2500_p4) }
  0x38   : > { %v379_v2 = vld [vmem:[%s362_s12 + $0x40] sm:$0xff] (%p2500_p4)  ;;  %376 = vst [vmem:[%s357_s15] sm:$0xff] (%p2500_p4), %v375_v0  ;;  %378 = vst [vmem:[%s357_s15 + $0x8] sm:$0xff] (%p2500_p4), %v377_v1  ;;  %v381_v3 = vld [vmem:[%s362_s12 + $0x48] sm:$0xff] (%p2500_p4) }
  0x39   : > { %380 = vst [vmem:[%s357_s15 + $0x10] sm:$0xff] %v379_v2  ;;  %v383_v4 = vld [vmem:[%s362_s12 + $0x80] sm:$0xff]  ;;  %v385_v5 = vld [vmem:[%s362_s12 + $0x88] sm:$0xff]  ;;  %382 = vst [vmem:[%s357_s15 + $0x18] sm:$0xff] %v381_v3 }
  0x3a   : > { %384 = vst [vmem:[%s357_s15 + $0x20] sm:$0xff] %v383_v4  ;;  %386 = vst [vmem:[%s357_s15 + $0x28] sm:$0xff] %v385_v5  ;;  %v387_v6 = vld [vmem:[%s362_s12 + $0xc0] sm:$0xff]  ;;  %v389_v7 = vld [vmem:[%s362_s12 + $0xc8] sm:$0xff] }
  0x3b   : > { %388 = vst [vmem:[%s357_s15 + $0x30] sm:$0xff] %v387_v6  ;;  %390 = vst [vmem:[%s357_s15 + $0x38] sm:$0xff] %v389_v7 }
  0x3c PF: > { %396 = sbr.rel (!%p2500_p4) target bundleno = 74 (0x4a), region = 59  ;;  %s398_s8 = sand.u32 (%p2500_p4), 1, %s2347_s18  }
  0x3d   : > { %s1953_s13 = sshll.u32 (%p2500_p4), %s2363_s22, 6  ;;  %s1951_s27 = sshll.u32 (%p2500_p4), %s398_s8, 7 }
  0x3e   : > { %s403_s25 = sadd.s32 (%p2500_p4), %s1953_s13, %s2493_s29  ;;  %s400_s30 = scalar_lea.vmem (%p2500_p4), [#allocation3], %s1951_s27 }
  0x3f   : > { %s1954_s28 = sshll.u32 (%p2500_p4), %s403_s25, 3 }
  0x40   : > { %s2570_s24 = scalar_lea.vmem (%p2500_p4), %s3029_s1, %s1954_s28 }
  0x41   : > { %v418_v8 = vld [vmem:[%s2570_s24] sm:$0xff] (%p2500_p4)  ;;  %v420_v9 = vld [vmem:[%s2570_s24 + $0x8] sm:$0xff] (%p2500_p4) }
  0x42   : > { %v422_v10 = vld [vmem:[%s2570_s24 + $0x40] sm:$0xff] (%p2500_p4)  ;;  %419 = vst [vmem:[%s400_s30] sm:$0xff] (%p2500_p4), %v418_v8  ;;  %421 = vst [vmem:[%s400_s30 + $0x8] sm:$0xff] (%p2500_p4), %v420_v9  ;;  %v424_v11 = vld [vmem:[%s2570_s24 + $0x48] sm:$0xff] (%p2500_p4) }
  0x43   : > { %423 = vst [vmem:[%s400_s30 + $0x10] sm:$0xff] %v422_v10  ;;  %v426_v12 = vld [vmem:[%s2570_s24 + $0x80] sm:$0xff]  ;;  %v428_v13 = vld [vmem:[%s2570_s24 + $0x88] sm:$0xff]  ;;  %425 = vst [vmem:[%s400_s30 + $0x18] sm:$0xff] %v424_v11 }
  0x44   : > { %427 = vst [vmem:[%s400_s30 + $0x20] sm:$0xff] %v426_v12  ;;  %429 = vst [vmem:[%s400_s30 + $0x28] sm:$0xff] %v428_v13  ;;  %v430_v14 = vld [vmem:[%s2570_s24 + $0xc0] sm:$0xff]  ;;  %v432_v15 = vld [vmem:[%s2570_s24 + $0xc8] sm:$0xff] }
  0x45   : > { %v434_v16 = vld [vmem:[%s2570_s24 + $0x100] sm:$0xff]  ;;  %431 = vst [vmem:[%s400_s30 + $0x30] sm:$0xff] %v430_v14  ;;  %433 = vst [vmem:[%s400_s30 + $0x38] sm:$0xff] %v432_v15  ;;  %v436_v17 = vld [vmem:[%s2570_s24 + $0x108] sm:$0xff] }
  0x46   : > { %435 = vst [vmem:[%s400_s30 + $0x40] sm:$0xff] %v434_v16  ;;  %v438_v18 = vld [vmem:[%s2570_s24 + $0x140] sm:$0xff]  ;;  %v440_v19 = vld [vmem:[%s2570_s24 + $0x148] sm:$0xff]  ;;  %437 = vst [vmem:[%s400_s30 + $0x48] sm:$0xff] %v436_v17 }
  0x47   : > { %439 = vst [vmem:[%s400_s30 + $0x50] sm:$0xff] %v438_v18  ;;  %441 = vst [vmem:[%s400_s30 + $0x58] sm:$0xff] %v440_v19  ;;  %v442_v20 = vld [vmem:[%s2570_s24 + $0x180] sm:$0xff]  ;;  %v444_v21 = vld [vmem:[%s2570_s24 + $0x188] sm:$0xff] }
  0x48   : > { %v446_v22 = vld [vmem:[%s2570_s24 + $0x1c0] sm:$0xff]  ;;  %443 = vst [vmem:[%s400_s30 + $0x60] sm:$0xff] %v442_v20  ;;  %445 = vst [vmem:[%s400_s30 + $0x68] sm:$0xff] %v444_v21  ;;  %v448_v23 = vld [vmem:[%s2570_s24 + $0x1c8] sm:$0xff] }
  0x49   : > { %447 = vst [vmem:[%s400_s30 + $0x70] sm:$0xff] %v446_v22  ;;  %449 = vst [vmem:[%s400_s30 + $0x78] sm:$0xff] %v448_v23 }
  0x4a PF: > { %455 = sbr.rel (!%p2522_p10) target bundleno = 88 (0x58), region = 82  ;;  %s457_s29 = sand.u32 (%p2522_p10), 1, %s2339_s16  }
  0x4b   : > { %s1958_s12 = sshll.u32 (%p2522_p10), %s2363_s22, 6  ;;  %s1955_s15 = sshll.u32 (%p2522_p10), %s457_s29, 6 }
  0x4c   : > { %s465_s8 = sadd.s32 (%p2522_p10), %s1958_s12, %s3098_s11  ;;  %s459_s19 = scalar_lea.vmem (%p2522_p10), [#allocation4], %s1955_s15 }
  0x4d   : > { %s1959_s13 = sshll.u32 (%p2522_p10), %s465_s8, 3 }
  0x4e   : > { %s467_s28 = scalar_lea.vmem (%p2522_p10), %s3030_s2, %s1959_s13 }
  0x4f   : > { %v509_v24 = vld [vmem:[%s467_s28] sm:$0xff] (%p2522_p10) }
  0x50   : > { %v511_v25 = vld [vmem:[%s467_s28 + $0x40] sm:$0xff] (%p2522_p10)  ;;  %510 = vst [vmem:[%s459_s19] sm:$0xff] (%p2522_p10), %v509_v24 }
  0x51   : > { %v513_v26 = vld [vmem:[%s467_s28 + $0x80] sm:$0xff]  ;;  %512 = vst [vmem:[%s459_s19 + $0x8] sm:$0xff] %v511_v25 }
  0x52   : > { %514 = vst [vmem:[%s459_s19 + $0x10] sm:$0xff] %v513_v26  ;;  %v515_v27 = vld [vmem:[%s467_s28 + $0xc0] sm:$0xff] }
  0x53   : > { %v517_v28 = vld [vmem:[%s467_s28 + $0x100] sm:$0xff]  ;;  %516 = vst [vmem:[%s459_s19 + $0x18] sm:$0xff] %v515_v27 }
  0x54   : > { %v519_v29 = vld [vmem:[%s467_s28 + $0x140] sm:$0xff]  ;;  %518 = vst [vmem:[%s459_s19 + $0x20] sm:$0xff] %v517_v28 }
  0x55   : > { %520 = vst [vmem:[%s459_s19 + $0x28] sm:$0xff] %v519_v29  ;;  %v521_v30 = vld [vmem:[%s467_s28 + $0x180] sm:$0xff] }
  0x56   : > { %v523_v31 = vld [vmem:[%s467_s28 + $0x1c0] sm:$0xff]  ;;  %522 = vst [vmem:[%s459_s19 + $0x30] sm:$0xff] %v521_v30 }
  0x57   : > { %524 = vst [vmem:[%s459_s19 + $0x38] sm:$0xff] %v523_v31 }
  0x58 PF: > { %530 = sbr.rel (!%p2537_p3) target bundleno = 102 (0x66), region = 120  ;;  %s532_s11 = sand.u32 (%p2537_p3), 1, %s2331_s14  }
  0x59   : > { %s1962_s6 = sshll.u32 (%p2537_p3), %s2363_s22, 6  ;;  %s1960_s7 = sshll.u32 (%p2537_p3), %s532_s11, 6 }
  0x5a   : > { %s540_s24 = sadd.s32 (%p2537_p3), %s1962_s6, %s3102_s26  ;;  %s534_s8 = scalar_lea.vmem (%p2537_p3), [#allocation5], %s1960_s7 }
  0x5b   : > { %s1963_s30 = sshll.u32 (%p2537_p3), %s540_s24, 3 }
  0x5c   : > { %s542_s15 = scalar_lea.vmem (%p2537_p3), %s3031_s3, %s1963_s30 }
  0x5d   : > { %v584_v32 = vld [vmem:[%s542_s15] sm:$0xff] (%p2537_p3) }
  0x5e   : > { %v586_v33 = vld [vmem:[%s542_s15 + $0x40] sm:$0xff] (%p2537_p3)  ;;  %585 = vst [vmem:[%s534_s8] sm:$0xff] (%p2537_p3), %v584_v32 }
  0x5f   : > { %v588_v34 = vld [vmem:[%s542_s15 + $0x80] sm:$0xff]  ;;  %587 = vst [vmem:[%s534_s8 + $0x8] sm:$0xff] %v586_v33 }
  0x60   : > { %589 = vst [vmem:[%s534_s8 + $0x10] sm:$0xff] %v588_v34  ;;  %v590_v35 = vld [vmem:[%s542_s15 + $0xc0] sm:$0xff] }
  0x61   : > { %v592_v36 = vld [vmem:[%s542_s15 + $0x100] sm:$0xff]  ;;  %591 = vst [vmem:[%s534_s8 + $0x18] sm:$0xff] %v590_v35 }
  0x62   : > { %v594_v37 = vld [vmem:[%s542_s15 + $0x140] sm:$0xff]  ;;  %593 = vst [vmem:[%s534_s8 + $0x20] sm:$0xff] %v592_v36 }
  0x63   : > { %595 = vst [vmem:[%s534_s8 + $0x28] sm:$0xff] %v594_v37  ;;  %v596_v38 = vld [vmem:[%s542_s15 + $0x180] sm:$0xff] }
  0x64   : > { %v598_v39 = vld [vmem:[%s542_s15 + $0x1c0] sm:$0xff]  ;;  %597 = vst [vmem:[%s534_s8 + $0x30] sm:$0xff] %v596_v38 }
  0x65   : > { %599 = vst [vmem:[%s534_s8 + $0x38] sm:$0xff] %v598_v39 }
  0x66 PF: > { %p1964_p1 = scmp.ge.s32.totalorder %s2367_s23, 1  ;;  %p620_p2 = scmp.lt.s32.totalorder %s2367_s23, 9 }
  0x68   : > { %p621_p4 = pnand %p1964_p1, %p620_p2 }
  0x69   : > { %p716_p8 = scmp.lt.s32.totalorder (!%p621_p4), %s2355_s20, 1  ;;  %v2369_v40 = vmov (!%p621_p4), 0   ;;  %s627_s6 = sand.u32 (!%p621_p4), 1, %s2343_s17   ;;  %v750_v57 = vld [vmem:[%s3037_s9 + $0x8] sm:$0xff] (!%p621_p4)  ;;  %v749_v58 = vld [vmem:[%s3037_s9] sm:$0xff] (!%p621_p4)  ;;  %v752_v1 = vld [vmem:[%s3037_s9 + $0x18] sm:$0xff] (!%p621_p4) }
  0x6a   : > { %624 = sbr.rel (%p621_p4) target bundleno = 605 (0x25d), region = 166  ;;  %2200 = vset.pattern.permute.xlu1 (!%p621_p4), %v2369_v40  ;;  %2199 = vset.pattern.permute.xlu0 (!%p621_p4), %v2369_v40  ;;  %s1965_s7 = sshll.u32 (!%p621_p4), %s627_s6, 6  ;;  %v751_v2 = vld [vmem:[%s3037_s9 + $0x10] sm:$0xff] (!%p621_p4)  ;;  %v754_v9 = vld [vmem:[%s3037_s9 + $0x28] sm:$0xff] (!%p621_p4)  ;;  %v753_v10 = vld [vmem:[%s3037_s9 + $0x20] sm:$0xff] (!%p621_p4)  ;;  %vm817_vm0 = vcmask (!%p621_p4), 261120  }
  0x6b   : > { %862 = vmatprep.mubr.bf16.mxu1 (!%p621_p4), %v2369_v40  ;;  %1452 = vmatprep.mubr.bf16.mxu0 (!%p621_p4), %v2369_v40  ;;  %s629_s15 = scalar_lea.vmem (!%p621_p4), [#allocation2], %s1965_s7  ;;  %s3067_s24 = sld [smem:[#allocation18_spill]] (!%p621_p4)  ;;  %v756_v12 = vld [vmem:[%s3037_s9 + $0x38] sm:$0xff] (!%p621_p4)  ;;  %v755_v13 = vld [vmem:[%s3037_s9 + $0x30] sm:$0xff] (!%p621_p4)  ;;  %vm1302_vm1 = vcmask (!%p621_p4), 523264  }
  0x6c   : > { %v738_v59 = vld [vmem:[%s629_s15 + $0x8] sm:$0xff] (!%p621_p4)  ;;  %v740_v60 = vld [vmem:[%s629_s15 + $0x18] sm:$0xff] (!%p621_p4)  ;;  %v737_v62 = vld [vmem:[%s629_s15] sm:$0xff] (!%p621_p4)  ;;  %s3070_s19 = sld [smem:[#allocation7_spill]] (!%p621_p4) }
  0x6d   : > { %v746_v61 = vpack.c.bf16 (!%p621_p4), %v740_v60, %v738_v59  ;;  %v739_v63 = vld [vmem:[%s629_s15 + $0x10] sm:$0xff] (!%p621_p4)  ;;  %v742_v3 = vld [vmem:[%s629_s15 + $0x28] sm:$0xff] (!%p621_p4)  ;;  %v744_v4 = vld [vmem:[%s629_s15 + $0x38] sm:$0xff] (!%p621_p4) }
  0x6e   : > { %v745_v0 = vpack.c.bf16 (!%p621_p4), %v739_v63, %v737_v62  ;;  %v748_v5 = vpack.c.bf16 (!%p621_p4), %v744_v4, %v742_v3  ;;  %v741_v6 = vld [vmem:[%s629_s15 + $0x20] sm:$0xff] (!%p621_p4)  ;;  %v743_v7 = vld [vmem:[%s629_s15 + $0x30] sm:$0xff] (!%p621_p4)  ;;  %s3069_s15 = sld [smem:[#allocation8_spill]] (!%p621_p4) }
  0x6f   : > { %830 = vmatprep.subr.bf16.mxu1 (!%p621_p4), %v746_v61  ;;  %v747_v8 = vpack.c.bf16 (!%p621_p4), %v743_v7, %v741_v6 }
  0x70   : > { %831 = vmatpush1.bf16.msra.mxu1 (!%p621_p4), %v745_v0 }
  0x71   : > { %s717_s26 = scalar_select %p716_p8, %s2355_s20, 1  ;;  %832 = vmatprep.subr.bf16.mxu1 %v748_v5  ;;  %v2201_v11 = vld [vmem:[%s3067_s24] sm:$0xff]   ;;  %v2202_v20 = vld [vmem:[%s3067_s24 + $0x8] sm:$0xff]   ;;  %v2203_v23 = vld [vmem:[%s3067_s24 + $0x10] sm:$0xff]  }
  0x72   : > { %v2204_v24 = vld [vmem:[%s3067_s24 + $0x18] sm:$0xff]   ;;  %s648_s27 = sand.u32 1, %s3070_s19  }
  0x73   : > { %s2028_s10 = sshll.u32 %s717_s26, 6  ;;  %s2702_s26 = sshll.u32 %s627_s6, 7 }
  0x74   : > { %s2615_s25 = scalar_lea.vmem %s3033_s5, %s2028_s10  ;;  %s720_s11 = scalar_lea.vmem %s3032_s4, %s2028_s10  ;;  %833 = vmatpush1.bf16.msra.mxu1 %v747_v8 }
  0x75   : > { %v911_v41 = vld [vmem:[%s2615_s25] sm:$0xff]  ;;  %v912_v43 = vld [vmem:[%s2615_s25 + $0x8] sm:$0xff]  ;;  %v906_v45 = vld [vmem:[%s720_s11 + $0x18] sm:$0xff]  ;;  %s3068_s10 = sld [smem:[#allocation17_spill]]  ;;  %s641_s12 = sand.u32 1, %s3069_s15  }
  0x76   : > { %v903_v42 = vld [vmem:[%s720_s11] sm:$0xff]  ;;  %993 = vperm.xlu1 %2200, %v911_v41   ;;  %v904_v44 = vld [vmem:[%s720_s11 + $0x8] sm:$0xff]  ;;  %v905_v46 = vld [vmem:[%s720_s11 + $0x10] sm:$0xff]  ;;  %s1967_s8 = sshll.u32 %s641_s12, 6  ;;  %s2713_s28 = scalar_lea.vmem [#allocation3], %s2702_s26 }
  0x77   : > { %937 = vperm.xlu0 %2199, %v903_v42   ;;  %v914_v47 = vld [vmem:[%s2615_s25 + $0x18] sm:$0xff]  ;;  %v913_v48 = vld [vmem:[%s2615_s25 + $0x10] sm:$0xff]  ;;  %v908_v49 = vld [vmem:[%s720_s11 + $0x28] sm:$0xff]  ;;  %1978 = vmatmul.mubr.msk.bf16.vlgmr.msra.gmra.mrb[0].mxu1 %vm817_vm0, %v2201_v11  ;;  %s2708_s13 = scalar_lea.vmem [#allocation4], %s1967_s8  ;;  %s1968_s17 = sshll.u32 %s648_s27, 6 }
  0x78   : > { %v907_v50 = vld [vmem:[%s720_s11 + $0x20] sm:$0xff]  ;;  %v916_v51 = vld [vmem:[%s2615_s25 + $0x28] sm:$0xff]  ;;  %v910_v53 = vld [vmem:[%s720_s11 + $0x38] sm:$0xff]  ;;  %872 = vmatprep.mubr.bf16.mxu1 %v2369_v40  ;;  %s2737_s6 = scalar_lea.vmem [#allocation5], %s1968_s17 }
  0x79   : > { %v915_v52 = vld [vmem:[%s2615_s25 + $0x20] sm:$0xff]  ;;  %v909_v54 = vld [vmem:[%s720_s11 + $0x30] sm:$0xff]  ;;  %v918_v55 = vld [vmem:[%s2615_s25 + $0x38] sm:$0xff] }
  0x7a   : > { %998 = vperm.xlu1 %2200, %v912_v43   ;;  %v917_v56 = vld [vmem:[%s2615_s25 + $0x30] sm:$0xff]  ;;  %v1111_v27 = vld [vmem:[%s2708_s13] sm:$0xff]  ;;  %s3071_s25 = sld [smem:[#allocation9_spill]]  ;;  %v922_v30 = vld [vmem:[%s2713_s28 + $0x18] sm:$0xff] }
  0x7b   : > { %942 = vperm.xlu0 %2199, %v904_v44   ;;  %v1624_v14 = vld [vmem:[%s3068_s10 + $0x8] sm:$0xff]  ;;  %v1623_v15 = vld [vmem:[%s3068_s10] sm:$0xff]  ;;  %v1626_v16 = vld [vmem:[%s3068_s10 + $0x18] sm:$0xff] }
  0x7c   : > { %v1625_v17 = vld [vmem:[%s3068_s10 + $0x10] sm:$0xff]  ;;  %v1628_v18 = vld [vmem:[%s3068_s10 + $0x28] sm:$0xff]  ;;  %v1627_v19 = vld [vmem:[%s3068_s10 + $0x20] sm:$0xff] }
  0x7d   : > { %v1630_v21 = vld [vmem:[%s3068_s10 + $0x38] sm:$0xff]  ;;  %v1629_v22 = vld [vmem:[%s3068_s10 + $0x30] sm:$0xff]  ;;  %v919_v28 = vld [vmem:[%s2713_s28] sm:$0xff] }
  0x7e   : > { %952 = vperm.xlu1 %2200, %v906_v45   ;;  %v921_v29 = vld [vmem:[%s2713_s28 + $0x10] sm:$0xff]  ;;  %v1112_v31 = vld [vmem:[%s2708_s13 + $0x8] sm:$0xff]  ;;  %v926_v45 = vld [vmem:[%s2713_s28 + $0x38] sm:$0xff] }
  0x7f   : > { %947 = vperm.xlu0 %2199, %v905_v46   ;;  %1979 = vmatmul.mubr.msk.bf16.gmra.mrb[4].mxu1 %vm817_vm0, %v2202_v20  ;;  %v920_v32 = vld [vmem:[%s2713_s28 + $0x8] sm:$0xff]  ;;  %v925_v44 = vld [vmem:[%s2713_s28 + $0x30] sm:$0xff]  ;;  %v1114_v46 = vld [vmem:[%s2708_s13 + $0x18] sm:$0xff] }
  0x80   : > { %882 = vmatprep.mubr.bf16.mxu1 %v2369_v40  ;;  %p1167_p9 = scmp.gt.s32.totalorder %s3071_s25, 0  ;;  %v930_v20 = vld [vmem:[%s2713_s28 + $0x58] sm:$0xff]  ;;  %p1244_p11 = scmp.lt.s32.totalorder %s3071_s25, 3 }
  0x82   : > { %1008 = vperm.xlu1 %2200, %v914_v47   ;;  %s1168_s15 = scalar_select %p1167_p9, 1, 0 }
  0x83   : > { %1003 = vperm.xlu0 %2199, %v913_v48  }
  0x84   : > { %s2756_s19 = scvt.s32.f32 %s1168_s15 }
  0x86   : > { %962 = vperm.xlu1 %2200, %v908_v49   ;;  %v1191_v49 = vld [vmem:[%s2737_s6 + $0x18] sm:$0xff]  ;;  %s1172_s11 = sshrl.u32 %s2756_s19, 16  ;;  %p1171_p10 = scmp.ne.f32.partialorder %s2756_s19, %s2756_s19 }
  0x87   : > { %957 = vperm.xlu0 %2199, %v907_v50   ;;  %1980 = vmatmul.mubr.msk.bf16.gmra.mrb[8].mxu1 %vm817_vm0, %v2203_v23  ;;  %v927_v23 = vld [vmem:[%s2713_s28 + $0x40] sm:$0xff]  ;;  %s2779_s7 = sand.u32 1, %s1172_s11 }
  0x88   : > { %892 = vmatprep.mubr.bf16.mxu1 %v2369_v40  ;;  %s1174_s30 = sadd.s32 32767, %s2779_s7 }
  0x89   : > { %s2802_s29 = sadd.s32 %s1174_s30, %s2756_s19 }
  0x8a   : > { %1018 = vperm.xlu1 %2200, %v916_v51   ;;  %v923_v51 = vld [vmem:[%s2713_s28 + $0x20] sm:$0xff]  ;;  %s1176_s12 = sand.u32 4294901760, %s2802_s29  ;;  %s3074_s29 = sld [smem:[#allocation9_spill]] (%p2544_p5) }
  0x8b   : > { %1013 = vperm.xlu0 %2199, %v915_v52   ;;  %v924_v52 = vld [vmem:[%s2713_s28 + $0x28] sm:$0xff]  ;;  %s3106_s12 = smov (%p1171_p10, %s1176_s12), 2143289344 }
  0x8c   : > { %s1179_s8 = sshrl.u32 %s3106_s12, 16 }
  0x8d   : > { %s1180_s27 = sshll.u32 %s1179_s8, 16 }
  0x8e   : > { %972 = vperm.xlu1 %2200, %v910_v53  }
  0x8f   : > { %967 = vperm.xlu0 %2199, %v909_v54   ;;  %1981 = vmatmul.mubr.msk.bf16.gmra.mrb[12].mxu1 %vm817_vm0, %v2204_v24 }
  0x90   : > { %1347 = vmatprep.mubr.bf16.mxu1 %v2369_v40  ;;  %s2023_s12 = sshll.u32 (%p2544_p5), %s3074_s29, 1 }
  0x92   : > { %1028 = vperm.xlu1 %2200, %v918_v55  }
  0x93   : > { %1023 = vperm.xlu0 %2199, %v917_v56   ;;  %v1113_v56 = vld [vmem:[%s2708_s13 + $0x10] sm:$0xff] }
  0x96   : > { %764 = vperm.xlu1 %2200, %v750_v57   ;;  %v1190_v57 = vld [vmem:[%s2737_s6 + $0x10] sm:$0xff] }
  0x97   : > { %759 = vperm.xlu0 %2199, %v749_v58  }
  0x9a   : > { %774 = vperm.xlu1 %2200, %v752_v1  }
  0x9b   : > { %769 = vperm.xlu0 %2199, %v751_v2  }
  0x9e   : > { %784 = vperm.xlu1 %2200, %v754_v9  }
  0x9f   : > { %779 = vperm.xlu0 %2199, %v753_v10  }
  0xa2   : > { %794 = vperm.xlu1 %2200, %v756_v12  }
  0xa3   : > { %789 = vperm.xlu0 %2199, %v755_v13  }
  0xa6   : > { %1638 = vperm.xlu1 %2200, %v1624_v14  }
  0xa7   : > { %1633 = vperm.xlu0 %2199, %v1623_v15  }
  0xaa   : > { %1648 = vperm.xlu1 %2200, %v1626_v16  }
  0xab   : > { %1643 = vperm.xlu0 %2199, %v1625_v17   ;;  %v929_v17 = vld [vmem:[%s2713_s28 + $0x50] sm:$0xff] }
  0xae   : > { %1658 = vperm.xlu1 %2200, %v1628_v18  }
  0xaf   : > { %1653 = vperm.xlu0 %2199, %v1627_v19  }
  0xb2   : > { %1668 = vperm.xlu1 %2200, %v1630_v21   ;;  %v1116_v21 = vld [vmem:[%s2708_s13 + $0x28] sm:$0xff] }
  0xb3   : > { %1663 = vperm.xlu0 %2199, %v1629_v22  }
  0xf5   : > { %v2704_v25 = vpop.permute.xlu1 %993 }
  0xf6   : > { %v2706_v26 = vpop.permute.xlu0 %937 }
  0xf7   : > { %v1119_v33 = vmul.f32 %v1111_v27, %v2706_v26  ;;  %v975_v36 = vmul.f32 %v2706_v26, %v919_v28  ;;  %v976_v41 = vmul.f32 %v2706_v26, %v920_v32  ;;  %v928_v27 = vld [vmem:[%s2713_s28 + $0x48] sm:$0xff]  ;;  %v1115_v28 = vld [vmem:[%s2708_s13 + $0x20] sm:$0xff] }
  0xf9   : > { %v2721_v34 = vpop.permute.xlu1 %998  ;;  %v1127_v42 = vadd.f32 %v1119_v33, %v2704_v25  ;;  %v1031_v54 = vadd.f32 %v2704_v25, %v975_v36  ;;  %v1032_v61 = vadd.f32 %v2704_v25, %v976_v41  ;;  %v1188_v41 = vld [vmem:[%s2737_s6] sm:$0xff] }
  0xfa   : > { %v2723_v35 = vpop.permute.xlu0 %942 }
  0xfb   : > { %v977_v37 = vmul.f32 %v2723_v35, %v921_v29  ;;  %v978_v38 = vmul.f32 %v2723_v35, %v922_v30  ;;  %v1120_v39 = vmul.f32 %v1112_v31, %v2723_v35 }
  0xfd   : > { %v1128_v43 = vadd.f32 %v1120_v39, %v2721_v34  ;;  %v1033_v47 = vadd.f32 %v2721_v34, %v977_v37  ;;  %v953_v48 = vpop.permute.xlu1 %952  ;;  %v1034_v53 = vadd.f32 %v2721_v34, %v978_v38 }
  0xfe   : > { %v948_v50 = vpop.permute.xlu0 %947  ;;  %v981_v58 = vmul.f32 %v953_v48, %v925_v44  ;;  %v982_v59 = vmul.f32 %v953_v48, %v926_v45  ;;  %v1122_v60 = vmul.f32 %v1114_v46, %v953_v48  ;;  %v1199_v63 = vmul.f32 %v1191_v49, %v953_v48  ;;  %v1192_v49 = vld [vmem:[%s2737_s6 + $0x20] sm:$0xff] }
  0xff   : > { %v2744_v55 = vpack.c.bf16 %v1128_v43, %v1127_v42  ;;  %v979_v0 = vmul.f32 %v948_v50, %v923_v51  ;;  %v980_v1 = vmul.f32 %v948_v50, %v924_v52  ;;  %v1121_v2 = vmul.f32 %v1113_v56, %v948_v50  ;;  %v1193_v43 = vld [vmem:[%s2737_s6 + $0x28] sm:$0xff] }
 0x100   : > { %v1198_v3 = vmul.f32 %v1190_v57, %v948_v50  ;;  %v2752_v6 = vpack.c.bf16 %v1033_v47, %v1031_v54  ;;  %v2754_v7 = vpack.c.bf16 %v1034_v53, %v1032_v61  ;;  %v1189_v54 = vld [vmem:[%s2737_s6 + $0x8] sm:$0xff] }
 0x101   : > { %v1139_v62 = vsub.bf16 0, %v2744_v55  ;;  %v1009_v4 = vpop.permute.xlu1 %1008 }
 0x102   : > { %v1004_v5 = vpop.permute.xlu0 %1003  ;;  %v1037_v9 = vadd.f32 %v1009_v4, %v981_v58  ;;  %v1038_v10 = vadd.f32 %v1009_v4, %v982_v59  ;;  %v1130_v11 = vadd.f32 %v1122_v60, %v1009_v4  ;;  %v1207_v12 = vadd.f32 %v1199_v63, %v1009_v4 }
 0x103   : > { %v1144_v8 = vmul.bf16 1069105081, %v1139_v62  ;;  %v1035_v13 = vadd.f32 %v1004_v5, %v979_v0  ;;  %v1036_v14 = vadd.f32 %v1004_v5, %v980_v1  ;;  %v1129_v15 = vadd.f32 %v1121_v2, %v1004_v5  ;;  %v933_v0 = vld [vmem:[%s2713_s28 + $0x70] sm:$0xff]  ;;  %v934_v1 = vld [vmem:[%s2713_s28 + $0x78] sm:$0xff] }
 0x104   : > { %v1206_v16 = vadd.f32 %v1198_v3, %v1004_v5  ;;  %v1055_v24 = vsub.bf16 0, %v2752_v6  ;;  %v1056_v33 = vsub.bf16 0, %v2754_v7  ;;  %v1196_v59 = vmul.f32 %v1188_v41, %v2706_v26 }
 0x105   : > { %2217 = vpow.bf16 %v1144_v8  ;;  %v2759_v18 = vpack.c.bf16 %v1130_v11, %v1129_v15  ;;  %v963_v19 = vpop.permute.xlu1 %962  ;;  %v2767_v29 = vpack.c.bf16 %v1037_v9, %v1035_v13  ;;  %v2769_v30 = vpack.c.bf16 %v1038_v10, %v1036_v14  ;;  %v1118_v10 = vld [vmem:[%s2708_s13 + $0x38] sm:$0xff]  ;;  %v931_v11 = vld [vmem:[%s2713_s28 + $0x60] sm:$0xff]  ;;  %v932_v14 = vld [vmem:[%s2713_s28 + $0x68] sm:$0xff]  ;;  %s1181_s28 = sor.u32 %s1180_s27, %s1179_s8  ;;  %s3072_s8 = sld [smem:[#allocation16_spill]] }
 0x106   : > { %v958_v22 = vpop.permute.xlu0 %957  ;;  %v2772_v32 = vpack.c.bf16 %v1207_v12, %v1206_v16  ;;  %v985_v36 = vmul.f32 %v963_v19, %v929_v17  ;;  %v986_v37 = vmul.f32 %v963_v19, %v930_v20  ;;  %v1124_v38 = vmul.f32 %v1116_v21, %v963_v19  ;;  %v1117_v15 = vld [vmem:[%s2708_s13 + $0x30] sm:$0xff]  ;;  %s1245_s13 = scalar_select %p1244_p11, 1, 0 }
 0x107   : > { %v1140_v31 = vsub.bf16 0, %v2759_v18  ;;  %v983_v39 = vmul.f32 %v958_v22, %v927_v23  ;;  %v984_v44 = vmul.f32 %v958_v22, %v928_v27  ;;  %v1123_v45 = vmul.f32 %v1115_v28, %v958_v22 }
 0x108   : > { %v1064_v48 = vmul.bf16 1069105081, %v1055_v24  ;;  %v1057_v52 = vsub.bf16 0, %v2767_v29  ;;  %v1058_v53 = vsub.bf16 0, %v2769_v30  ;;  %v1201_v60 = vmul.f32 %v1193_v43, %v963_v19  ;;  %s2839_s17 = scvt.s32.f32 %s1245_s13 }
 0x109   : > { %v1147_v42 = vmul.bf16 1069105081, %v1140_v31  ;;  %v1019_v46 = vpop.permute.xlu1 %1018  ;;  %v1200_v62 = vmul.f32 %v1192_v49, %v958_v22  ;;  %v1067_v3 = vmul.bf16 1069105081, %v1056_v33  ;;  %v1197_v5 = vmul.f32 %v1189_v54, %v2723_v35 }
 0x10a   : > { %v1014_v47 = vpop.permute.xlu0 %1013  ;;  %v1041_v50 = vadd.f32 %v1019_v46, %v985_v36  ;;  %v1132_v51 = vadd.f32 %v1124_v38, %v1019_v46  ;;  %v1042_v56 = vadd.f32 %v1019_v46, %v986_v37  ;;  %v1217_v26 = vsub.bf16 0, %v2772_v32  ;;  %v1195_v36 = vld [vmem:[%s2737_s6 + $0x38] sm:$0xff]  ;;  %s1249_s25 = sshrl.u32 %s2839_s17, 16  ;;  %p1248_p12 = scmp.ne.f32.partialorder %s2839_s17, %s2839_s17 }
 0x10b   : > { %2219 = vpow.bf16 %v1147_v42  ;;  %v1039_v57 = vadd.f32 %v1014_v47, %v983_v39  ;;  %v1040_v58 = vadd.f32 %v1014_v47, %v984_v44  ;;  %v1131_v61 = vadd.f32 %v1123_v45, %v1014_v47  ;;  %v1194_v45 = vld [vmem:[%s2737_s6 + $0x30] sm:$0xff]  ;;  %s1250_s6 = sand.u32 1, %s1249_s25 }
 0x10c   : > { %2221 = vpow.bf16 %v1064_v48  ;;  %v1209_v8 = vadd.f32 %v1201_v60, %v1019_v46  ;;  %v1208_v13 = vadd.f32 %v1200_v62, %v1014_v47  ;;  %v1070_v16 = vmul.bf16 1069105081, %v1057_v52  ;;  %s1251_s15 = sadd.s32 32767, %s1250_s6  ;;  %s3075_s6 = sld [smem:[#allocation19_spill]] (%p2544_p5) }
 0x10d   : > { %v973_v63 = vpop.permute.xlu1 %972  ;;  %v2788_v4 = vpack.c.bf16 %v1041_v50, %v1039_v57  ;;  %v2792_v9 = vpack.c.bf16 %v1132_v51, %v1131_v61  ;;  %v1073_v17 = vmul.bf16 1069105081, %v1058_v53  ;;  %v2798_v19 = vpack.c.bf16 %v1042_v56, %v1040_v58  ;;  %s1252_s19 = sadd.s32 %s1251_s15, %s2839_s17 }
 0x10e   : > { %v968_v2 = vpop.permute.xlu0 %967  ;;  %v989_v21 = vmul.f32 %v973_v63, %v933_v0  ;;  %v990_v22 = vmul.f32 %v973_v63, %v934_v1  ;;  %v1126_v23 = vmul.f32 %v1118_v10, %v973_v63  ;;  %2223 = vpow.bf16 %v1067_v3  ;;  %s1253_s11 = sand.u32 4294901760, %s1252_s19 }
 0x10f   : > { %v1141_v35 = vsub.bf16 0, %v2792_v9  ;;  %v987_v24 = vmul.f32 %v968_v2, %v931_v11  ;;  %v1059_v31 = vsub.bf16 0, %v2788_v4  ;;  %v988_v37 = vmul.f32 %v968_v2, %v932_v14  ;;  %s3108_s11 = smov (%p1248_p12, %s1253_s11), 2143289344 }
 0x110   : > { %v2218_v12 = vpop.eup %2217  ;;  %v1125_v38 = vmul.f32 %v1117_v15, %v968_v2  ;;  %v1204_v44 = vadd.f32 %v1196_v59, %v2704_v25  ;;  %v1224_v48 = vmul.bf16 1069105081, %v1217_v26  ;;  %v1203_v49 = vmul.f32 %v1195_v36, %v973_v63  ;;  %s1256_s7 = sshrl.u32 %s3108_s11, 16 }
 0x111   : > { %v1155_v20 = vadd.bf16 1065369472, %v2218_v12  ;;  %v1029_v27 = vpop.permute.xlu1 %1028  ;;  %v1150_v33 = vmul.bf16 1069105081, %v1141_v35  ;;  %v1076_v50 = vmul.bf16 1069105081, %v1059_v31  ;;  %v1205_v56 = vadd.f32 %v1197_v5, %v2721_v34 }
 0x112   : > { %v1024_v28 = vpop.permute.xlu0 %1023  ;;  %v1045_v39 = vadd.f32 %v1029_v27, %v989_v21  ;;  %v1046_v41 = vadd.f32 %v1029_v27, %v990_v22  ;;  %v1134_v42 = vadd.f32 %v1126_v23, %v1029_v27  ;;  %v1060_v54 = vsub.bf16 0, %v2798_v19  ;;  %s1257_s30 = sshll.u32 %s1256_s7, 16 }
 0x113   : > { %2225 = vrcp.bf16 %v1155_v20  ;;  %v1043_v43 = vadd.f32 %v1024_v28, %v987_v24  ;;  %v1044_v46 = vadd.f32 %v1024_v28, %v988_v37  ;;  %v1133_v47 = vadd.f32 %v1125_v38, %v1024_v28  ;;  %s1258_s13 = sor.u32 %s1257_s30, %s1256_s7  ;;  %s2946_s30 = scalar_lea.vmem [#allocation6], %s2702_s26 }
 0x114   : > { %2227 = vpow.bf16 %v1150_v33  ;;  %v2824_v57 = vpack.c.bf16 %v1209_v8, %v1208_v13  ;;  %v1202_v58 = vmul.f32 %v1194_v45, %v968_v2  ;;  %v1211_v60 = vadd.f32 %v1203_v49, %v1029_v27 }
 0x115   : > { %v2811_v51 = vpack.c.bf16 %v1045_v39, %v1043_v43  ;;  %v2813_v53 = vpack.c.bf16 %v1134_v42, %v1133_v47  ;;  %2229 = vpow.bf16 %v1070_v16  ;;  %v2821_v25 = vpack.c.bf16 %v1046_v41, %v1044_v46 }
 0x116   : > { %v2220_v52 = vpop.eup %2219  ;;  %2231 = vpow.bf16 %v1073_v17  ;;  %v1210_v0 = vadd.f32 %v1202_v58, %v1024_v28  ;;  %v1079_v5 = vmul.bf16 1069105081, %v1060_v54  ;;  %v1218_v2 = vsub.bf16 0, %v2824_v57 }
 0x117   : > { %v2222_v59 = vpop.eup %2221  ;;  %v1142_v61 = vsub.bf16 0, %v2813_v53  ;;  %2233 = vpow.bf16 %v1076_v50  ;;  %v1061_v62 = vsub.bf16 0, %v2811_v51  ;;  %v1156_v63 = vadd.bf16 1065369472, %v2220_v52 }
 0x118   : > { %v1087_v1 = vadd.bf16 1065369472, %v2222_v59  ;;  %v1062_v3 = vsub.bf16 0, %v2821_v25  ;;  %2235 = vpow.bf16 %v1224_v48  ;;  %v2832_v26 = vpack.c.bf16 %v1205_v56, %v1204_v44 }
 0x119   : > { %v1153_v34 = vmul.bf16 1069105081, %v1142_v61  ;;  %v2224_v8 = vpop.eup %2223  ;;  %v1082_v10 = vmul.bf16 1069105081, %v1061_v62  ;;  %v2836_v11 = vpack.c.bf16 %v1211_v60, %v1210_v0  ;;  %v1227_v16 = vmul.bf16 1069105081, %v1218_v2 }
 0x11a   : > { %2237 = vrcp.bf16 %v1087_v1  ;;  %v1088_v12 = vadd.bf16 1065369472, %v2224_v8  ;;  %v1085_v13 = vmul.bf16 1069105081, %v1062_v3  ;;  %v1216_v17 = vsub.bf16 0, %v2832_v26 }
 0x11b   : > { %2239 = vpow.bf16 %v1153_v34  ;;  %v1219_v21 = vsub.bf16 0, %v2836_v11  ;;  %v2843_v28 = vstv %s1181_s28 }
 0x11c   : > { %2241 = vrcp.bf16 %v1156_v63  ;;  %v1221_v33 = vmul.bf16 1069105081, %v1216_v17  ;;  %v2205_v17 = vld [vmem:[%s3072_s8 + $0x20] sm:$0xff]  }
 0x11d   : > { %2243 = vpow.bf16 %v1079_v5  ;;  %v1230_v38 = vmul.bf16 1069105081, %v1219_v21 }
 0x11e   : > { %v2226_v14 = vpop.eup %2225  ;;  %2245 = vrcp.bf16 %v1088_v12 }
 0x11f   : > { %v2228_v15 = vpop.eup %2227  ;;  %2247 = vpow.bf16 %v1082_v10  ;;  %v1160_v23 = vmul.bf16 %v2226_v14, %v2744_v55 }
 0x120   : > { %v1157_v20 = vadd.bf16 1065369472, %v2228_v15  ;;  %v2230_v35 = vpop.eup %2229  ;;  %2249 = vpow.bf16 %v1085_v13 }
 0x121   : > { %v2232_v22 = vpop.eup %2231  ;;  %v1089_v24 = vadd.bf16 1065369472, %v2230_v35  ;;  %v1184_v41 = vmul.bf16 %v2843_v28, %v1160_v23  ;;  %v2208_v23 = vld [vmem:[%s3072_s8 + $0x8] sm:$0xff]  }
 0x122   : > { %2251 = vrcp.bf16 %v1157_v20  ;;  %v2234_v27 = vpop.eup %2233  ;;  %v1090_v31 = vadd.bf16 1065369472, %v2232_v22  ;;  %v1259_v20 = vstv %s1258_s13  ;;  %s2024_s13 = sshll.u32 (%p2544_p5), %s2355_s20, 6 }
 0x123   : > { %2253 = vpow.bf16 %v1227_v16  ;;  %v1091_v36 = vadd.bf16 1065369472, %v2234_v27  ;;  %v2236_v37 = vpop.eup %2235  ;;  %s1728_s27 = sadd.s32 (%p2544_p5), %s2024_s13, %s2023_s12 }
 0x124   : > { %2255 = vrcp.bf16 %v1089_v24  ;;  %v1233_v60 = vadd.bf16 1065369472, %v2236_v37  ;;  %v2211_v37 = vld [vmem:[%s3072_s8 + $0x38] sm:$0xff]   ;;  %s2025_s28 = sshll.u32 (%p2544_p5), %s1728_s27, 3 }
 0x125   : > { %2257 = vrcp.bf16 %v1090_v31  ;;  %v2238_v39 = vpop.eup %2237  ;;  %s1730_s15 = scalar_lea.vmem (%p2544_p5), %s3075_s6, %s2025_s28 }
 0x126   : > { %2259 = vrcp.bf16 %v1091_v36  ;;  %v2240_v42 = vpop.eup %2239  ;;  %v1096_v55 = vmul.bf16 %v2238_v39, %v2752_v6  ;;  %v2209_v36 = vld [vmem:[%s3072_s8 + $0x30] sm:$0xff]   ;;  %v2214_v39 = vld [vmem:[%s3072_s8 + $0x48] sm:$0xff]  }
 0x127   : > { %2261 = vpow.bf16 %v1221_v33  ;;  %v2242_v43 = vpop.eup %2241  ;;  %v1158_v44 = vadd.bf16 1065369472, %v2240_v42  ;;  %v2216_v42 = vld [vmem:[%s3072_s8 + $0x58] sm:$0xff]  }
 0x128   : > { %v2244_v45 = vpop.eup %2243  ;;  %2263 = vpow.bf16 %v1230_v38  ;;  %1315 = vmatprep.subr.bf16.mxu1 %v1096_v55  ;;  %v1162_v50 = vmul.bf16 %v2242_v43, %v2759_v18  ;;  %v2213_v38 = vld [vmem:[%s3072_s8 + $0x40] sm:$0xff]  }
 0x129   : > { %v2246_v46 = vpop.eup %2245  ;;  %2265 = vrcp.bf16 %v1158_v44  ;;  %1316 = vmatpush1.bf16.msra.mxu1 %v1184_v41  ;;  %v1092_v47 = vadd.bf16 1065369472, %v2244_v45  ;;  %v2215_v41 = vld [vmem:[%s3072_s8 + $0x50] sm:$0xff]  }
 0x12a   : > { %v2248_v48 = vpop.eup %2247  ;;  %v2849_v49 = vmul.bf16 %v2246_v46, %v2754_v7  ;;  %v1185_v61 = vmul.bf16 %v2843_v28, %v1162_v50  ;;  %v760_v50 = vpop.permute.xlu0 %759 }
 0x12b   : > { %v2250_v6 = vpop.eup %2249  ;;  %2267 = vrcp.bf16 %v1092_v47  ;;  %v1093_v52 = vadd.bf16 1065369472, %v2248_v48 }
 0x12c   : > { %1420 = vmatprep.subr.bf16.mxu0 %v2849_v49  ;;  %v1094_v56 = vadd.bf16 1065369472, %v2250_v6  ;;  %v765_v6 = vpop.permute.xlu1 %764 }
 0x12d   : > { %v2252_v54 = vpop.eup %2251  ;;  %1421 = vmatpush1.bf16.msra.mxu0 %v1096_v55  ;;  %2269 = vrcp.bf16 %v1093_v52 }
 0x12e   : > { %v2254_v58 = vpop.eup %2253  ;;  %v1164_v7 = vmul.bf16 %v2252_v54, %v2792_v9  ;;  %2271 = vrcp.bf16 %v1094_v56 }
 0x12f   : > { %v2256_v59 = vpop.eup %2255  ;;  %2273 = vrcp.bf16 %v1233_v60  ;;  %v1234_v34 = vadd.bf16 1065369472, %v2254_v58 }
 0x130   : > { %v2258_v18 = vpop.eup %2257  ;;  %v1100_v62 = vmul.bf16 %v2256_v59, %v2767_v29  ;;  %v1186_v9 = vmul.bf16 %v2843_v28, %v1164_v7  ;;  %v775_v59 = vpop.permute.xlu1 %774 }
 0x131   : > { %v2260_v63 = vpop.eup %2259  ;;  %v1102_v0 = vmul.bf16 %v2258_v18, %v2769_v30 }
 0x132   : > { %v2262_v1 = vpop.eup %2261  ;;  %1317 = vmatprep.subr.bf16.mxu1 %v1100_v62  ;;  %v1104_v3 = vmul.bf16 %v2260_v63, %v2788_v4 }
 0x133   : > { %1422 = vmatprep.subr.bf16.mxu0 %v1102_v0  ;;  %1318 = vmatpush1.bf16.msra.mxu1 %v1185_v61  ;;  %v1232_v5 = vadd.bf16 1065369472, %v2262_v1  ;;  %v2264_v2 = vpop.eup %2263 }
 0x134   : > { %1423 = vmatpush1.bf16.msra.mxu0 %v1100_v62  ;;  %1319 = vmatprep.subr.bf16.mxu1 %v1104_v3  ;;  %v2266_v29 = vpop.eup %2265  ;;  %v1235_v10 = vadd.bf16 1065369472, %v2264_v2  ;;  %v785_v62 = vpop.permute.xlu1 %784 }
 0x135   : > { %2275 = vrcp.bf16 %v1232_v5  ;;  %v1166_v30 = vmul.bf16 %v2266_v29, %v2813_v53  ;;  %v2206_v53 = vld [vmem:[%s3072_s8] sm:$0xff]  }
 0x136   : > { %v2268_v8 = vpop.eup %2267  ;;  %2277 = vrcp.bf16 %v1234_v34 }
 0x137   : > { %1320 = vmatpush1.bf16.msra.mxu1 %v1186_v9  ;;  %v1106_v4 = vmul.bf16 %v2268_v8, %v2798_v19  ;;  %v1187_v13 = vmul.bf16 %v2843_v28, %v1166_v30  ;;  %2279 = vrcp.bf16 %v1235_v10 }
 0x138   : > { %v2270_v12 = vpop.eup %2269  ;;  %v2943_v1 = vpop.permute.xlu1 %794 }
 0x139   : > { %v2272_v14 = vpop.eup %2271  ;;  %1424 = vmatprep.subr.bf16.mxu0 %v1106_v4  ;;  %v1108_v15 = vmul.bf16 %v2270_v12, %v2811_v51 }
 0x13a   : > { %1425 = vmatpush1.bf16.msra.mxu0 %v1104_v3  ;;  %v1110_v16 = vmul.bf16 %v2272_v14, %v2821_v25  ;;  %v2274_v19 = vpop.eup %2273 }
 0x13b   : > { %1321 = vmatprep.subr.bf16.mxu1 %v1108_v15  ;;  %v1239_v35 = vmul.bf16 %v2274_v19, %v2772_v32  ;;  %v2207_v32 = vld [vmem:[%s3072_s8 + $0x28] sm:$0xff]  }
 0x13c   : > { %1426 = vmatprep.subr.bf16.mxu0 %v1110_v16  ;;  %1322 = vmatpush1.bf16.msra.mxu1 %v1187_v13 }
 0x13d   : > { %v1262_v24 = vmul.bf16 %v1259_v20, %v1239_v35 }
 0x13e   : > { %1427 = vmatpush1.bf16.msra.mxu0 %v1108_v15  ;;  %v1639_v15 = vpop.permute.xlu1 %1638 }
 0x13f   : > { %1994 = vmatmul.mubr.msk.bf16.vlgmr.msra.gmra.mrb[0].mxu1 %vm1302_vm1, %v2206_v53 }
 0x140   : > { %v2276_v51 = vpop.eup %2275  ;;  %1357 = vmatprep.mubr.bf16.mxu1 %v2369_v40 }
 0x141   : > { %v1237_v25 = vmul.bf16 %v2276_v51, %v2832_v26  ;;  %v2278_v21 = vpop.eup %2277  ;;  %2002 = vmatmul.mubr.msk.bf16.vlgmr.msra.gmra.mrb[0].mxu0 %vm1302_vm1, %v2205_v17 }
 0x142   : > { %1462 = vmatprep.mubr.bf16.mxu0 %v2369_v40  ;;  %v1241_v27 = vmul.bf16 %v2278_v21, %v2824_v57  ;;  %v2280_v28 = vpop.eup %2279  ;;  %v2210_v57 = vld [vmem:[%s3072_s8 + $0x10] sm:$0xff]  }
 0x143   : > { %v1261_v22 = vmul.bf16 %v1259_v20, %v1237_v25  ;;  %v1243_v31 = vmul.bf16 %v2280_v28, %v2836_v11  ;;  %v2212_v11 = vld [vmem:[%s3072_s8 + $0x18] sm:$0xff]  }
 0x144   : > { %v1263_v26 = vmul.bf16 %v1259_v20, %v1241_v27 }
 0x145   : > { %1534 = vmatprep.subr.bf16.mxu0 %v1261_v22  ;;  %v1264_v33 = vmul.bf16 %v1259_v20, %v1243_v31 }
 0x146   : > { %1535 = vmatpush1.bf16.msra.mxu0 %v2849_v49 }
 0x147   : > { %1536 = vmatprep.subr.bf16.mxu0 %v1262_v24  ;;  %1995 = vmatmul.mubr.msk.bf16.gmra.mrb[4].mxu1 %vm1302_vm1, %v2208_v23 }
 0x148   : > { %1367 = vmatprep.mubr.bf16.mxu1 %v2369_v40 }
 0x149   : > { %2003 = vmatmul.mubr.msk.bf16.gmra.mrb[4].mxu0 %vm1302_vm1, %v2207_v32 }
 0x14a   : > { %1537 = vmatpush1.bf16.msra.mxu0 %v1102_v0  ;;  %1472 = vmatprep.mubr.bf16.mxu0 %v2369_v40 }
 0x14b   : > { %1538 = vmatprep.subr.bf16.mxu0 %v1263_v26 }
 0x14e   : > { %1539 = vmatpush1.bf16.msra.mxu0 %v1106_v4 }
 0x14f   : > { %1540 = vmatprep.subr.bf16.mxu0 %v1264_v33  ;;  %1996 = vmatmul.mubr.msk.bf16.gmra.mrb[8].mxu1 %vm1302_vm1, %v2210_v57  ;;  %v1649_v57 = vpop.permute.xlu1 %1648 }
 0x150   : > { %1377 = vmatprep.mubr.bf16.mxu1 %v2369_v40 }
 0x151   : > { %2004 = vmatmul.mubr.msk.bf16.gmra.mrb[8].mxu0 %vm1302_vm1, %v2209_v36 }
 0x152   : > { %1541 = vmatpush1.bf16.msra.mxu0 %v1110_v16  ;;  %1482 = vmatprep.mubr.bf16.mxu0 %v2369_v40 }
 0x157   : > { %1997 = vmatmul.mubr.msk.bf16.gmra.mrb[12].mxu1 %vm1302_vm1, %v2212_v11 }
 0x159   : > { %2005 = vmatmul.mubr.msk.bf16.gmra.mrb[12].mxu0 %vm1302_vm1, %v2211_v37 }
 0x15a   : > { %1566 = vmatprep.mubr.bf16.mxu0 %v2369_v40 }
 0x161   : > { %2018 = vmatmul.mubr.msk.bf16.vlgmr.msra.gmra.mrb[0].mxu0 %vm1302_vm1, %v2213_v38 }
 0x162   : > { %1576 = vmatprep.mubr.bf16.mxu0 %v2369_v40 }
 0x169   : > { %2019 = vmatmul.mubr.msk.bf16.gmra.mrb[4].mxu0 %vm1302_vm1, %v2214_v39 }
 0x16a   : > { %1586 = vmatprep.mubr.bf16.mxu0 %v2369_v40 }
 0x171   : > { %2020 = vmatmul.mubr.msk.bf16.gmra.mrb[8].mxu0 %vm1302_vm1, %v2215_v41 }
 0x172   : > { %1596 = vmatprep.mubr.bf16.mxu0 %v2369_v40  ;;  %v770_v40 = vpop.permute.xlu0 %769 }
 0x176   : > { %v780_v61 = vpop.permute.xlu0 %779 }
 0x179   : > { %2021 = vmatmul.mubr.msk.bf16.gmra.mrb[12].mxu0 %vm1302_vm1, %v2216_v42 }
 0x17a   : > { %v2941_v0 = vpop.permute.xlu0 %789 }
 0x17e   : > { %v1634_v30 = vpop.permute.xlu0 %1633 }
 0x182   : > { %v1644_v23 = vpop.permute.xlu0 %1643 }
 0x212   : > { %v1349_v55 = vpop.f32.mrb[0].mxu1 }
 0x213   : > { %v1351_v43 = vpop.f32.mrb[1].mxu1  ;;  %v2030_v3 = vadd.f32 %v1349_v55, %v760_v50 }
 0x214   : > { %v1353_v44 = vpop.f32.mrb[2].mxu1  ;;  %v2033_v34 = vadd.f32 %v1351_v43, %v760_v50 }
 0x215   : > { %v1355_v45 = vpop.f32.mrb[3].mxu1  ;;  %v2036_v5 = vadd.f32 %v1353_v44, %v765_v6  ;;  %v1654_v44 = vpop.permute.xlu0 %1653 }
 0x216   : > { %v2039_v8 = vadd.f32 %v1355_v45, %v765_v6  ;;  %v1659_v6 = vpop.permute.xlu1 %1658 }
 0x21a   : > { %v1359_v46 = vpop.f32.mrb[4].mxu1 }
 0x21b   : > { %v1361_v47 = vpop.f32.mrb[5].mxu1  ;;  %v2042_v51 = vadd.f32 %v1359_v46, %v770_v40 }
 0x21c   : > { %v1363_v48 = vpop.f32.mrb[6].mxu1  ;;  %v2045_v20 = vadd.f32 %v1361_v47, %v770_v40 }
 0x21d   : > { %v1365_v49 = vpop.f32.mrb[7].mxu1  ;;  %v2048_v35 = vadd.f32 %v1363_v48, %v775_v59 }
 0x21e   : > { %v2051_v24 = vadd.f32 %v1365_v49, %v775_v59 }
 0x222   : > { %v1369_v52 = vpop.f32.mrb[8].mxu1 }
 0x223   : > { %v1371_v54 = vpop.f32.mrb[9].mxu1  ;;  %v2054_v38 = vadd.f32 %v1369_v52, %v780_v61 }
 0x224   : > { %v1373_v56 = vpop.f32.mrb[10].mxu1  ;;  %v2057_v39 = vadd.f32 %v1371_v54, %v780_v61 }
 0x225   : > { %v1375_v58 = vpop.f32.mrb[11].mxu1  ;;  %v2060_v42 = vadd.f32 %v1373_v56, %v785_v62 }
 0x226   : > { %v2063_v45 = vadd.f32 %v1375_v58, %v785_v62 }
 0x22a   : > { %v2933_v60 = vpop.f32.mrb[12].mxu1 }
 0x22b   : > { %v2935_v7 = vpop.f32.mrb[13].mxu1  ;;  %v2066_v56 = vadd.f32 %v2933_v60, %v2941_v0 }
 0x22c   : > { %v2937_v18 = vpop.f32.mrb[14].mxu1  ;;  %v2069_v58 = vadd.f32 %v2935_v7, %v2941_v0  ;;  %v1669_v0 = vpop.permute.xlu1 %1668 }
 0x22d   : > { %v2939_v63 = vpop.f32.mrb[15].mxu1  ;;  %v2072_v62 = vadd.f32 %v2937_v18, %v2943_v1 }
 0x234   : > { %v1568_v9 = vpop.f32.mrb[0].mxu0 }
 0x235   : > { %v2031_v2 = vadd.f32 %v2030_v3, %v1568_v9  ;;  %v1570_v29 = vpop.f32.mrb[1].mxu0  ;;  %v1664_v9 = vpop.permute.xlu0 %1663 }
 0x236   : > { %v2034_v10 = vadd.f32 %v2033_v34, %v1570_v29  ;;  %v1572_v4 = vpop.f32.mrb[2].mxu0 }
 0x237   : > { %v2032_v12 = vadd.f32 %v2031_v2, %v1634_v30  ;;  %v2037_v13 = vadd.f32 %v2036_v5, %v1572_v4  ;;  %v1574_v14 = vpop.f32.mrb[3].mxu0  ;;  %v2075_v5 = vadd.f32 %v2939_v63, %v2943_v1 }
 0x238   : > { %v2035_v16 = vadd.f32 %v2034_v10, %v1634_v30  ;;  %v2040_v53 = vadd.f32 %v2039_v8, %v1574_v14 }
 0x239   : > { %1703 = vst [vmem:[%s2946_s30] sm:$0xff] %v2032_v12  ;;  %v2038_v19 = vadd.f32 %v2037_v13, %v1639_v15 }
 0x23a   : > { %1704 = vst [vmem:[%s2946_s30 + $0x8] sm:$0xff] %v2035_v16  ;;  %v2041_v17 = vadd.f32 %v2040_v53, %v1639_v15 }
 0x23b   : > { %1705 = vst [vmem:[%s2946_s30 + $0x10] sm:$0xff] %v2038_v19 }
 0x23c   : > { %1706 = vst [vmem:[%s2946_s30 + $0x18] sm:$0xff] %v2041_v17  ;;  %v1578_v25 = vpop.f32.mrb[4].mxu0 }
 0x23d   : > { %v2043_v21 = vadd.f32 %v2042_v51, %v1578_v25  ;;  %v1580_v22 = vpop.f32.mrb[5].mxu0 }
 0x23e   : > { %v2046_v27 = vadd.f32 %v2045_v20, %v1580_v22  ;;  %v1582_v28 = vpop.f32.mrb[6].mxu0 }
 0x23f   : > { %v2044_v32 = vadd.f32 %v2043_v21, %v1644_v23  ;;  %v2049_v26 = vadd.f32 %v2048_v35, %v1582_v28  ;;  %v1584_v31 = vpop.f32.mrb[7].mxu0 }
 0x240   : > { %v2047_v33 = vadd.f32 %v2046_v27, %v1644_v23  ;;  %v2052_v36 = vadd.f32 %v2051_v24, %v1584_v31  ;;  %v1743_v63 = vld [vmem:[%s2946_s30] sm:$0xff] (%p2544_p5) }
 0x241   : > { %1707 = vst [vmem:[%s2946_s30 + $0x20] sm:$0xff] %v2044_v32  ;;  %v2050_v11 = vadd.f32 %v2049_v26, %v1649_v57  ;;  %v1745_v1 = vld [vmem:[%s2946_s30 + $0x8] sm:$0xff] (%p2544_p5)  ;;  %1744 = vst [vmem:[%s1730_s15] sm:$0xff] (%p2544_p5), %v1743_v63 }
 0x242   : > { %1708 = vst [vmem:[%s2946_s30 + $0x28] sm:$0xff] %v2047_v33  ;;  %v2053_v37 = vadd.f32 %v2052_v36, %v1649_v57  ;;  %v1747_v12 = vld [vmem:[%s2946_s30 + $0x10] sm:$0xff] (%p2544_p5)  ;;  %1746 = vst [vmem:[%s1730_s15 + $0x8] sm:$0xff] (%p2544_p5), %v1745_v1 }
 0x243   : > { %1709 = vst [vmem:[%s2946_s30 + $0x30] sm:$0xff] %v2050_v11  ;;  %v1749_v13 = vld [vmem:[%s2946_s30 + $0x18] sm:$0xff] (%p2544_p5)  ;;  %1748 = vst [vmem:[%s1730_s15 + $0x40] sm:$0xff] (%p2544_p5), %v1747_v12 }
 0x244   : > { %1710 = vst [vmem:[%s2946_s30 + $0x38] sm:$0xff] %v2053_v37  ;;  %v1588_v41 = vpop.f32.mrb[8].mxu0  ;;  %1750 = vst [vmem:[%s1730_s15 + $0x48] sm:$0xff] (%p2544_p5), %v1749_v13 }
 0x245   : > { %v2055_v55 = vadd.f32 %v2054_v38, %v1588_v41  ;;  %v1590_v43 = vpop.f32.mrb[9].mxu0 }
 0x246   : > { %v2058_v46 = vadd.f32 %v2057_v39, %v1590_v43  ;;  %v1592_v47 = vpop.f32.mrb[10].mxu0 }
 0x247   : > { %v2056_v48 = vadd.f32 %v2055_v55, %v1654_v44  ;;  %v2061_v49 = vadd.f32 %v2060_v42, %v1592_v47  ;;  %v1594_v50 = vpop.f32.mrb[11].mxu0 }
 0x248   : > { %v2059_v52 = vadd.f32 %v2058_v46, %v1654_v44  ;;  %v2064_v40 = vadd.f32 %v2063_v45, %v1594_v50  ;;  %v1751_v14 = vld [vmem:[%s2946_s30 + $0x20] sm:$0xff] (%p2544_p5) }
 0x249   : > { %1711 = vst [vmem:[%s2946_s30 + $0x40] sm:$0xff] %v2056_v48  ;;  %v2062_v54 = vadd.f32 %v2061_v49, %v1659_v6  ;;  %v1753_v15 = vld [vmem:[%s2946_s30 + $0x28] sm:$0xff] (%p2544_p5)  ;;  %1752 = vst [vmem:[%s1730_s15 + $0x80] sm:$0xff] (%p2544_p5), %v1751_v14 }
 0x24a   : > { %1712 = vst [vmem:[%s2946_s30 + $0x48] sm:$0xff] %v2059_v52  ;;  %v2065_v59 = vadd.f32 %v2064_v40, %v1659_v6  ;;  %v1755_v16 = vld [vmem:[%s2946_s30 + $0x30] sm:$0xff] (%p2544_p5)  ;;  %1754 = vst [vmem:[%s1730_s15 + $0x88] sm:$0xff] (%p2544_p5), %v1753_v15 }
 0x24b   : > { %1713 = vst [vmem:[%s2946_s30 + $0x50] sm:$0xff] %v2062_v54  ;;  %v1757_v53 = vld [vmem:[%s2946_s30 + $0x38] sm:$0xff] (%p2544_p5)  ;;  %1756 = vst [vmem:[%s1730_s15 + $0xc0] sm:$0xff] (%p2544_p5), %v1755_v16 }
 0x24c   : > { %1714 = vst [vmem:[%s2946_s30 + $0x58] sm:$0xff] %v2065_v59  ;;  %v1598_v61 = vpop.f32.mrb[12].mxu0  ;;  %1758 = vst [vmem:[%s1730_s15 + $0xc8] sm:$0xff] (%p2544_p5), %v1757_v53 }
 0x24d   : > { %v2067_v3 = vadd.f32 %v2066_v56, %v1598_v61  ;;  %v1600_v34 = vpop.f32.mrb[13].mxu0 }
 0x24e   : > { %v2070_v60 = vadd.f32 %v2069_v58, %v1600_v34  ;;  %v1602_v2 = vpop.f32.mrb[14].mxu0  ;;  %1725 = sbr.rel (!%p2544_p5) target bundleno = 605 (0x25d), region = 186 }
 0x24f   : > { %v2068_v29 = vadd.f32 %v2067_v3, %v1664_v9  ;;  %v2073_v30 = vadd.f32 %v2072_v62, %v1602_v2  ;;  %v1604_v7 = vpop.f32.mrb[15].mxu0 }
 0x250   : > { %v2071_v8 = vadd.f32 %v2070_v60, %v1664_v9  ;;  %v2076_v10 = vadd.f32 %v2075_v5, %v1604_v7  ;;  %v1759_v19 = vld [vmem:[%s2946_s30 + $0x40] sm:$0xff] (%p2544_p5) }
 0x251   : > { %1715 = vst [vmem:[%s2946_s30 + $0x60] sm:$0xff] %v2068_v29  ;;  %v2074_v4 = vadd.f32 %v2073_v30, %v1669_v0  ;;  %v1761_v17 = vld [vmem:[%s2946_s30 + $0x48] sm:$0xff] (%p2544_p5)  ;;  %1760 = vst [vmem:[%s1730_s15 + $0x100] sm:$0xff] (%p2544_p5), %v1759_v19 }
 0x252   : > { %1716 = vst [vmem:[%s2946_s30 + $0x68] sm:$0xff] %v2071_v8  ;;  %v2077_v18 = vadd.f32 %v2076_v10, %v1669_v0  ;;  %v1763_v51 = vld [vmem:[%s2946_s30 + $0x50] sm:$0xff] (%p2544_p5)  ;;  %1762 = vst [vmem:[%s1730_s15 + $0x108] sm:$0xff] (%p2544_p5), %v1761_v17 }
 0x253   : > { %1717 = vst [vmem:[%s2946_s30 + $0x70] sm:$0xff] %v2074_v4  ;;  %v1765_v20 = vld [vmem:[%s2946_s30 + $0x58] sm:$0xff] (%p2544_p5)  ;;  %1764 = vst [vmem:[%s1730_s15 + $0x140] sm:$0xff] (%p2544_p5), %v1763_v51 }
 0x254   : > { %1718 = vst [vmem:[%s2946_s30 + $0x78] sm:$0xff] %v2077_v18  ;;  %1766 = vst [vmem:[%s1730_s15 + $0x148] sm:$0xff] (%p2544_p5), %v1765_v20 }
 0x258   : > { %v1767_v25 = vld [vmem:[%s2946_s30 + $0x60] sm:$0xff] }
 0x259   : > { %v1769_v35 = vld [vmem:[%s2946_s30 + $0x68] sm:$0xff]  ;;  %1768 = vst [vmem:[%s1730_s15 + $0x180] sm:$0xff] %v1767_v25 }
 0x25a   : > { %v1771_v21 = vld [vmem:[%s2946_s30 + $0x70] sm:$0xff]  ;;  %1770 = vst [vmem:[%s1730_s15 + $0x188] sm:$0xff] %v1769_v35 }
 0x25b   : > { %1772 = vst [vmem:[%s1730_s15 + $0x1c0] sm:$0xff] %v1771_v21  ;;  %v1773_v22 = vld [vmem:[%s2946_s30 + $0x78] sm:$0xff] }
 0x25c   : > { %1774 = vst [vmem:[%s1730_s15 + $0x1c8] sm:$0xff] %v1773_v22 }
 0x25d PF: > { %s20_s23 = sadd.s32 1, %s2367_s23   ;;  %s3076_s20 = sld [smem:[#allocation14_spill]] }
 0x25e   : > { %p17_p13 = scmp.ge.s32.totalorder %s20_s23, 10   ;;  %s3077_s19 = sld [smem:[#allocation13_spill]] }
 0x25f   : > { %s3078_s11 = sld [smem:[#allocation10_spill]]  ;;  %s3079_s7 = sld [smem:[#allocation11_spill]] }
 0x260   : > { %s3080_s26 = sld [smem:[#allocation12_spill]]  ;;  %s3081_s13 = smov %s2331_s14 }
 0x261   : > { %s3082_s14 = smov %s2551_s21  ;;  %s3083_s15 = smov %s2339_s16 }
 0x262   : > { %s3085_s17 = smov %s2347_s18  ;;  %19 = sbr.rel (!%p17_p13) target bundleno = 11 (0xb), region = 272 }
 0x263   : > { %s3084_s16 = smov %s3076_s20  ;;  %s3088_s20 = smov %s2363_s22 }
 0x264   : > { %s3086_s18 = smov %s3077_s19 }
 0x265   : > { %s3087_s19 = smov %s3078_s11  ;;  %s3089_s21 = smov %s3079_s7 }
 0x266   : > { %s3090_s22 = smov %s3080_s26 }

</bundles_post_ra>
